<compile_context>
chip_gen: v6e
topology: v6e:2x2x1
jax: 0.10.0
libtpu: 0.0.40
codegen_flags: <defaults>
</compile_context>

<pallas_src>
import functools

import jax
import jax.numpy as jnp
from jax import lax
from jax.experimental import pallas as pl
from jax.experimental.pallas import tpu as pltpu

PAD_ID, BOS_ID, EOS_ID, UNK_ID = 1, 0, 2, 3
NEG_INF = -1e9
LANE = 128

# Large matmul weights: one VMEM input each, full-array blocks, constant index_map.
WEIGHT_ORDER = (
    "tok_emb", "pos_enc", "pos_dec",
    "enc_self_wqkv", "enc_self_wo", "enc_ffn_w1", "enc_ffn_w2",
    "dec_self_wqkv", "dec_self_wo",
    "dec_cross_wq", "dec_cross_wkv", "dec_cross_wo",
    "dec_ffn_w1", "dec_ffn_w2",
    "outlin_w",
)

# Small (1, N) bias / LayerNorm params: packed into one (rows, 128) array.
SMALL_ORDER = (
    "enc_lnemb_g", "enc_lnemb_b",
    "enc_self_bqkv", "enc_self_bo",
    "enc_ln1_g", "enc_ln1_b",
    "enc_ffn_b1", "enc_ffn_b2",
    "enc_ln2_g", "enc_ln2_b",
    "dec_lnemb_g", "dec_lnemb_b",
    "dec_self_bqkv", "dec_self_bo",
    "dec_ln1_g", "dec_ln1_b",
    "dec_cross_bq", "dec_cross_bkv", "dec_cross_bo",
    "dec_ln2_g", "dec_ln2_b",
    "dec_ffn_b1", "dec_ffn_b2",
    "dec_ln3_g", "dec_ln3_b",
    "outlin_b",
)


# --------------------------- fused generate kernel -------------------------- #

def _make_generate_kernel(S, D, H, V, maxlen, small_layout):
    Dh = D // H
    Tdec = maxlen - 1                       # number of greedy steps
    Tpad = ((Tdec + 7) // 8) * 8            # KV-cache rows padded to sublanes
    scale = 1.0 / float(Dh) ** 0.5
    nw = len(WEIGHT_ORDER)

    def _ln(x, g, b):
        mu = jnp.mean(x, axis=-1, keepdims=True)
        var = jnp.mean(jnp.square(x - mu), axis=-1, keepdims=True)
        return (x - mu) * lax.rsqrt(var + 1e-5) * g + b

    def _softmax(s):                        # exact division (greedy-pick safe)
        s = s - jnp.max(s, axis=-1, keepdims=True)
        p = jnp.exp(s)
        return p / jnp.sum(p, axis=-1, keepdims=True)

    def _dot(a, b):
        return jnp.dot(a, b, preferred_element_type=jnp.float32)

    def _dot_t(a, b):                       # a @ b.T, no explicit transpose
        return lax.dot_general(a, b, (((1,), (1,)), ((), ())),
                               preferred_element_type=jnp.float32)

    def kernel(ids_sm, dstart_sm, ids_v_ref, small_ref, *rest):
        w_refs = dict(zip(WEIGHT_ORDER, rest[:nw]))
        out_ref = rest[nw]
        kcache, vcache = rest[nw + 1], rest[nw + 2]
        b = pl.program_id(0)

        # ------------- hoist all parameter reads (emitted once) ------------- #
        w = {name: r[...] for name, r in w_refs.items()}
        sp = {name: small_ref[row:row + 1, 0:width]
              for name, (row, width) in small_layout.items()}
        tok_emb = w["tok_emb"]
        tok_ref = w_refs["tok_emb"]

        # -------------------- encoder (this batch row) ---------------------- #
        ids_row = ids_v_ref[0]                                      # (1, S) i32
        neg_pad = jnp.where(ids_row == PAD_ID, NEG_INF, 0.0).astype(jnp.float32)

        # token embeddings via direct row gather (scalar ids from SMEM)
        src_rows = [tok_ref[pl.ds(ids_sm[b, s], 1), :] for s in range(S)]
        x = jnp.concatenate(src_rows, axis=0) + w["pos_enc"]        # (S, D)
        x = _ln(x, sp["enc_lnemb_g"], sp["enc_lnemb_b"])

        qkv = _dot(x, w["enc_self_wqkv"]) + sp["enc_self_bqkv"]     # (S, 3D)
        heads = []
        for h in range(H):
            c0 = h * Dh
            q = qkv[:, c0:c0 + Dh]
            k = qkv[:, D + c0:D + c0 + Dh]
            v = qkv[:, 2 * D + c0:2 * D + c0 + Dh]
            s = _dot_t(q, k) * scale + neg_pad                      # (S, S)
            heads.append(_dot(_softmax(s), v))                      # (S, Dh)
        attn = jnp.concatenate(heads, axis=-1)                      # (S, D), in regs
        x = _ln(x + _dot(attn, w["enc_self_wo"]) + sp["enc_self_bo"],
                sp["enc_ln1_g"], sp["enc_ln1_b"])
        hmid = jax.nn.gelu(_dot(x, w["enc_ffn_w1"]) + sp["enc_ffn_b1"])
        enc_out = _ln(x + _dot(hmid, w["enc_ffn_w2"]) + sp["enc_ffn_b2"],
                      sp["enc_ln2_g"], sp["enc_ln2_b"])             # (S, D)

        # cross-attention K/V computed once (encoder-side KV cache, registers)
        kv_c = _dot(enc_out, w["dec_cross_wkv"]) + sp["dec_cross_bkv"]  # (S, 2D)

        # ---------- greedy decode: static unroll, KV cache in VMEM ---------- #
        pos_rows = [w["pos_dec"][t:t + 1, :] for t in range(Tdec)]
        viota = lax.broadcasted_iota(jnp.int32, (1, V), 1)
        vidx_f = viota.astype(jnp.float32)

        start_tok = jnp.full((1, 1), dstart_sm[b], dtype=jnp.int32)
        toks = [start_tok]
        finished = jnp.zeros((1, 1), dtype=jnp.bool_)
        cur_emb = tok_ref[pl.ds(dstart_sm[b], 1), :]                # (1, D) gather

        for t in range(Tdec):
            x = _ln(cur_emb + pos_rows[t],
                    sp["dec_lnemb_g"], sp["dec_lnemb_b"])

            # causal self-attention: write cache row t, attend over rows 0..t
            qkv = _dot(x, w["dec_self_wqkv"]) + sp["dec_self_bqkv"]  # (1, 3D)
            heads = []
            for h in range(H):
                c0 = h * Dh
                r0 = h * Tpad
                kn = qkv[:, D + c0:D + c0 + Dh]
                vn = qkv[:, 2 * D + c0:2 * D + c0 + Dh]
                kcache[r0 + t:r0 + t + 1, :] = kn
                vcache[r0 + t:r0 + t + 1, :] = vn
                if t == 0:
                    heads.append(vn)       # softmax over a single key == its value
                else:
                    q = qkv[:, c0:c0 + Dh]
                    s = _dot_t(q, kcache[r0:r0 + t + 1, :]) * scale  # (1, t+1)
                    heads.append(_dot(_softmax(s), vcache[r0:r0 + t + 1, :]))
            attn = jnp.concatenate(heads, axis=-1)                   # (1, D)
            x = _ln(x + _dot(attn, w["dec_self_wo"]) + sp["dec_self_bo"],
                    sp["dec_ln1_g"], sp["dec_ln1_b"])

            # cross-attention against the precomputed encoder K/V
            qc = _dot(x, w["dec_cross_wq"]) + sp["dec_cross_bq"]     # (1, D)
            heads = []
            for h in range(H):
                c0 = h * Dh
                s = _dot_t(qc[:, c0:c0 + Dh], kv_c[:, c0:c0 + Dh]) * scale + neg_pad
                heads.append(_dot(_softmax(s), kv_c[:, D + c0:D + c0 + Dh]))
            attn = jnp.concatenate(heads, axis=-1)
            x = _ln(x + _dot(attn, w["dec_cross_wo"]) + sp["dec_cross_bo"],
                    sp["dec_ln2_g"], sp["dec_ln2_b"])

            # FFN + final LN
            hmid = jax.nn.gelu(_dot(x, w["dec_ffn_w1"]) + sp["dec_ffn_b1"])
            x = _ln(x + _dot(hmid, w["dec_ffn_w2"]) + sp["dec_ffn_b2"],
                    sp["dec_ln3_g"], sp["dec_ln3_b"])

            # last-token-only vocab projection + greedy pick (first-occurrence
            # argmax; float index encoding exact for V < 2^24)
            logits = _dot(x, w["outlin_w"]) + sp["outlin_b"]         # (1, V)
            mx = jnp.max(logits, axis=-1, keepdims=True)
            cand = jnp.where(logits >= mx, vidx_f, float(V))
            nxt = jnp.min(cand, axis=-1, keepdims=True).astype(jnp.int32)
            nxt = jnp.where(finished, jnp.int32(PAD_ID), nxt)
            finished = jnp.logical_or(finished, nxt == EOS_ID)
            toks.append(nxt)

            if t + 1 < Tdec:
                # next-step input embedding (tiny (1,V)@(V,D) one-hot matmul;
                # at real vocab sizes this would be a gathered row instead)
                oh = (viota == nxt).astype(jnp.float32)
                cur_emb = _dot(oh, tok_emb)                          # (1, D)

        # single lane-dense store of the whole generated row
        out_ref[0] = jnp.concatenate(toks, axis=-1)                  # (1, maxlen)

    return kernel


# ------------------------------- metrics ------------------------------------ #

def seq_accuracies(pred, gold):
    """SeqAccuracies: element/sequence accuracy ignoring pad, unk counts as wrong."""
    mask = gold != PAD_ID
    same = (pred == gold) & (pred != UNK_ID)
    denom = jnp.maximum(jnp.sum(mask, axis=1), 1).astype(jnp.float32)
    elem = jnp.sum((same & mask).astype(jnp.float32), axis=1) / denom
    seqacc = jnp.all(same | ~mask, axis=1).astype(jnp.float32)
    return {"elem_acc": jnp.mean(elem), "seq_acc": jnp.mean(seqacc)}


# ------------------------------- forward ------------------------------------ #

def _pack_small(params):
    """Pack all (1, N) bias / LN params into one (rows, 128) array, one per row."""
    rows, layout = [], {}
    for i, name in enumerate(SMALL_ORDER):
        v = params[name].reshape(1, -1).astype(jnp.float32)
        width = v.shape[-1]
        assert width <= LANE, f"{name} too wide for packed small-param row"
        rows.append(jnp.pad(v, ((0, 0), (0, LANE - width))))
        layout[name] = (i, width)
    packed = jnp.concatenate(rows, axis=0)
    pad_r = (-packed.shape[0]) % 8
    if pad_r:
        packed = jnp.pad(packed, ((0, pad_r), (0, 0)))
    return packed, layout


def bart_generator_test_forward(params, input_ids, output_ids, *, maxlen, n_heads):
    B, S = input_ids.shape
    V, D = params["tok_emb"].shape
    Tdec = maxlen - 1
    Tpad = ((Tdec + 7) // 8) * 8
    Dh = D // n_heads

    small_packed, small_layout = _pack_small(params)

    weights = dict(params)
    weights["pos_enc"] = params["pos_emb"][:S]                      # (S, D)
    weights["pos_dec"] = params["pos_emb"][:Tdec]                   # (Tdec, D)
    weight_args = [weights[name].astype(jnp.float32) for name in WEIGHT_ORDER]

    ids_sm = input_ids.astype(jnp.int32)                            # (B, S) -> SMEM
    dstart_sm = output_ids[:, 0].astype(jnp.int32)                  # (B,)   -> SMEM
    ids_v = input_ids.astype(jnp.int32).reshape(B, 1, S)            # for pad mask

    kernel = _make_generate_kernel(S, D, n_heads, V, maxlen, small_layout)

    const2 = lambda b, ids, dst: (0, 0)                             # weights resident
    grid_spec = pltpu.PrefetchScalarGridSpec(
        num_scalar_prefetch=2,
        grid=(B,),
        in_specs=[pl.BlockSpec((1, 1, S), lambda b, ids, dst: (b, 0, 0)),
                  pl.BlockSpec(small_packed.shape, const2)]
                 + [pl.BlockSpec(w.shape, const2) for w in weight_args],
        out_specs=pl.BlockSpec((1, 1, maxlen), lambda b, ids, dst: (b, 0, 0)),
        scratch_shapes=[
            pltpu.VMEM((n_heads * Tpad, Dh), jnp.float32),          # K cache
            pltpu.VMEM((n_heads * Tpad, Dh), jnp.float32),          # V cache
        ],
    )
    ret = pl.pallas_call(
        kernel,
        grid_spec=grid_spec,
        out_shape=jax.ShapeDtypeStruct((B, 1, maxlen), jnp.int32),
        compiler_params=pltpu.CompilerParams(
            dimension_semantics=("parallel",)),                     # 2nd TC on v7x
    )(ids_sm, dstart_sm, ids_v, small_packed, *weight_args)
    ret = ret.reshape(B, maxlen)

    metrics = seq_accuracies(ret[:, 1:], output_ids[:, 1:])
    # TODO(synk): TreeAccuracy needs the Python `tensor2tree` callable + tree matching; no JAX/Pallas equivalent.
    return metrics, ret


# ------------------------------ parameters ---------------------------------- #

def init_params(key, vocab, d_model, d_ff, max_pos):
    """Random BART-like params, already in the fused (QKV / KV) layout."""
    names_w = {
        "tok_emb": (vocab, d_model),
        "pos_emb": (max_pos, d_model),
        "enc_self_wqkv": (d_model, 3 * d_model),
        "enc_self_wo": (d_model, d_model),
        "enc_ffn_w1": (d_model, d_ff),
        "enc_ffn_w2": (d_ff, d_model),
        "dec_self_wqkv": (d_model, 3 * d_model),
        "dec_self_wo": (d_model, d_model),
        "dec_cross_wq": (d_model, d_model),
        "dec_cross_wkv": (d_model, 2 * d_model),
        "dec_cross_wo": (d_model, d_model),
        "dec_ffn_w1": (d_model, d_ff),
        "dec_ffn_w2": (d_ff, d_model),
        "outlin_w": (d_model, vocab),
    }
    biases = {
        "enc_self_bqkv": 3 * d_model, "enc_self_bo": d_model,
        "enc_ffn_b1": d_ff, "enc_ffn_b2": d_model,
        "dec_self_bqkv": 3 * d_model, "dec_self_bo": d_model,
        "dec_cross_bq": d_model, "dec_cross_bkv": 2 * d_model,
        "dec_cross_bo": d_model,
        "dec_ffn_b1": d_ff, "dec_ffn_b2": d_model,
        "outlin_b": vocab,
    }
    ln_names = ("enc_lnemb", "enc_ln1", "enc_ln2",
                "dec_lnemb", "dec_ln1", "dec_ln2", "dec_ln3")

    params = {}
    items = sorted(names_w.items())
    keys = jax.random.split(key, len(items))
    for k, (name, shp) in zip(keys, items):
        params[name] = 0.05 * jax.random.normal(k, shp, jnp.float32)
    for name, n in biases.items():
        params[name] = jnp.zeros((1, n), jnp.float32)
    for name in ln_names:
        params[name + "_g"] = jnp.ones((1, d_model), jnp.float32)
        params[name + "_b"] = jnp.zeros((1, d_model), jnp.float32)
    return params


# --------------------------------- main -------------------------------------- #

if __name__ == "__main__":
    VOCAB, D_MODEL, D_FF, N_HEADS, MAX_POS = 64, 32, 64, 2, 32
    MAXLEN = 5                      # BartGeneratorTest(maxlen=5, numbeam=None)
    B, SRC_LEN = 2, 8

    params = init_params(jax.random.PRNGKey(42), VOCAB, D_MODEL, D_FF, MAX_POS)

    key = jax.random.PRNGKey(0)
    k_in, k_out = jax.random.split(key)
    input_ids = jax.random.randint(k_in, (B, SRC_LEN), 4, VOCAB, dtype=jnp.int32)
    input_ids = input_ids.at[:, -3].set(EOS_ID)
    input_ids = input_ids.at[:, -2:].set(PAD_ID)        # some padding in the source
    output_ids = jax.random.randint(k_out, (B, MAXLEN), 4, VOCAB, dtype=jnp.int32)
    output_ids = output_ids.at[:, 0].set(BOS_ID)        # decoder start token
    output_ids = output_ids.at[:, -1].set(EOS_ID)

    forward = jax.jit(functools.partial(
        bart_generator_test_forward, maxlen=MAXLEN, n_heads=N_HEADS))
    metrics, ret = forward(params, input_ids, output_ids)
    jax.block_until_ready((metrics, ret))
    assert ret.shape == (B, MAXLEN)
    print("KERNEL_OK")
</pallas_src>

<mosaic_0001>
module attributes {stable_mosaic.version = 11 : i64} {
  func.func @kernel(%arg0: i32, %arg1: memref<2x8xi32, #tpu.memory_space<smem>>, %arg2: memref<2xi32, #tpu.memory_space<smem>>, %arg3: memref<1x1x8xi32, #tpu.memory_space<vmem>>, %arg4: memref<32x128xf32, #tpu.memory_space<vmem>>, %arg5: memref<64x32xf32, #tpu.memory_space<vmem>>, %arg6: memref<8x32xf32, #tpu.memory_space<vmem>>, %arg7: memref<4x32xf32, #tpu.memory_space<vmem>>, %arg8: memref<32x96xf32, #tpu.memory_space<vmem>>, %arg9: memref<32x32xf32, #tpu.memory_space<vmem>>, %arg10: memref<32x64xf32, #tpu.memory_space<vmem>>, %arg11: memref<64x32xf32, #tpu.memory_space<vmem>>, %arg12: memref<32x96xf32, #tpu.memory_space<vmem>>, %arg13: memref<32x32xf32, #tpu.memory_space<vmem>>, %arg14: memref<32x32xf32, #tpu.memory_space<vmem>>, %arg15: memref<32x64xf32, #tpu.memory_space<vmem>>, %arg16: memref<32x32xf32, #tpu.memory_space<vmem>>, %arg17: memref<32x64xf32, #tpu.memory_space<vmem>>, %arg18: memref<64x32xf32, #tpu.memory_space<vmem>>, %arg19: memref<32x64xf32, #tpu.memory_space<vmem>>, %arg20: memref<1x1x5xi32, #tpu.memory_space<vmem>>, %arg21: memref<16x16xf32, #tpu.memory_space<vmem>>, %arg22: memref<16x16xf32, #tpu.memory_space<vmem>>) attributes {dimension_semantics = [#tpu.dimension_semantics<parallel>], iteration_bounds = array<i64: 2>, scalar_prefetch = 2 : i64, scratch_operands = 2 : i64, tpu.core_type = #tpu.core_type<tc>, window_params = [{transform_indices = @transform_0, window_bounds = array<i64: 1, 1, 8>}, {pipeline_mode = #tpu.pipeline_mode<synchronous>, transform_indices = @transform_1, window_bounds = array<i64: 32, 128>}, {pipeline_mode = #tpu.pipeline_mode<synchronous>, transform_indices = @transform_2, window_bounds = array<i64: 64, 32>}, {pipeline_mode = #tpu.pipeline_mode<synchronous>, transform_indices = @transform_3, window_bounds = array<i64: 8, 32>}, {pipeline_mode = #tpu.pipeline_mode<synchronous>, transform_indices = @transform_4, window_bounds = array<i64: 4, 32>}, {pipeline_mode = #tpu.pipeline_mode<synchronous>, transform_indices = @transform_5, window_bounds = array<i64: 32, 96>}, {pipeline_mode = #tpu.pipeline_mode<synchronous>, transform_indices = @transform_6, window_bounds = array<i64: 32, 32>}, {pipeline_mode = #tpu.pipeline_mode<synchronous>, transform_indices = @transform_7, window_bounds = array<i64: 32, 64>}, {pipeline_mode = #tpu.pipeline_mode<synchronous>, transform_indices = @transform_8, window_bounds = array<i64: 64, 32>}, {pipeline_mode = #tpu.pipeline_mode<synchronous>, transform_indices = @transform_9, window_bounds = array<i64: 32, 96>}, {pipeline_mode = #tpu.pipeline_mode<synchronous>, transform_indices = @transform_10, window_bounds = array<i64: 32, 32>}, {pipeline_mode = #tpu.pipeline_mode<synchronous>, transform_indices = @transform_11, window_bounds = array<i64: 32, 32>}, {pipeline_mode = #tpu.pipeline_mode<synchronous>, transform_indices = @transform_12, window_bounds = array<i64: 32, 64>}, {pipeline_mode = #tpu.pipeline_mode<synchronous>, transform_indices = @transform_13, window_bounds = array<i64: 32, 32>}, {pipeline_mode = #tpu.pipeline_mode<synchronous>, transform_indices = @transform_14, window_bounds = array<i64: 32, 64>}, {pipeline_mode = #tpu.pipeline_mode<synchronous>, transform_indices = @transform_15, window_bounds = array<i64: 64, 32>}, {pipeline_mode = #tpu.pipeline_mode<synchronous>, transform_indices = @transform_16, window_bounds = array<i64: 32, 64>}, {transform_indices = @transform_17, window_bounds = array<i64: 1, 1, 5>}]} {
    %c0 = arith.constant 0 : index
    %c0_0 = arith.constant 0 : index
    %0 = vector.load %arg5[%c0, %c0_0] : memref<64x32xf32, #tpu.memory_space<vmem>>, vector<64x32xf32>
    %c0_1 = arith.constant 0 : index
    %c0_2 = arith.constant 0 : index
    %1 = vector.load %arg6[%c0_1, %c0_2] : memref<8x32xf32, #tpu.memory_space<vmem>>, vector<8x32xf32>
    %c0_3 = arith.constant 0 : index
    %c0_4 = arith.constant 0 : index
    %2 = vector.load %arg7[%c0_3, %c0_4] : memref<4x32xf32, #tpu.memory_space<vmem>>, vector<4x32xf32>
    %c0_5 = arith.constant 0 : index
    %c0_6 = arith.constant 0 : index
    %3 = vector.load %arg8[%c0_5, %c0_6] : memref<32x96xf32, #tpu.memory_space<vmem>>, vector<32x96xf32>
    %c0_7 = arith.constant 0 : index
    %c0_8 = arith.constant 0 : index
    %4 = vector.load %arg9[%c0_7, %c0_8] : memref<32x32xf32, #tpu.memory_space<vmem>>, vector<32x32xf32>
    %c0_9 = arith.constant 0 : index
    %c0_10 = arith.constant 0 : index
    %5 = vector.load %arg10[%c0_9, %c0_10] : memref<32x64xf32, #tpu.memory_space<vmem>>, vector<32x64xf32>
    %c0_11 = arith.constant 0 : index
    %c0_12 = arith.constant 0 : index
    %6 = vector.load %arg11[%c0_11, %c0_12] : memref<64x32xf32, #tpu.memory_space<vmem>>, vector<64x32xf32>
    %c0_13 = arith.constant 0 : index
    %c0_14 = arith.constant 0 : index
    %7 = vector.load %arg12[%c0_13, %c0_14] : memref<32x96xf32, #tpu.memory_space<vmem>>, vector<32x96xf32>
    %c0_15 = arith.constant 0 : index
    %c0_16 = arith.constant 0 : index
    %8 = vector.load %arg13[%c0_15, %c0_16] : memref<32x32xf32, #tpu.memory_space<vmem>>, vector<32x32xf32>
    %c0_17 = arith.constant 0 : index
    %c0_18 = arith.constant 0 : index
    %9 = vector.load %arg14[%c0_17, %c0_18] : memref<32x32xf32, #tpu.memory_space<vmem>>, vector<32x32xf32>
    %c0_19 = arith.constant 0 : index
    %c0_20 = arith.constant 0 : index
    %10 = vector.load %arg15[%c0_19, %c0_20] : memref<32x64xf32, #tpu.memory_space<vmem>>, vector<32x64xf32>
    %c0_21 = arith.constant 0 : index
    %c0_22 = arith.constant 0 : index
    %11 = vector.load %arg16[%c0_21, %c0_22] : memref<32x32xf32, #tpu.memory_space<vmem>>, vector<32x32xf32>
    %c0_23 = arith.constant 0 : index
    %c0_24 = arith.constant 0 : index
    %12 = vector.load %arg17[%c0_23, %c0_24] : memref<32x64xf32, #tpu.memory_space<vmem>>, vector<32x64xf32>
    %c0_25 = arith.constant 0 : index
    %c0_26 = arith.constant 0 : index
    %13 = vector.load %arg18[%c0_25, %c0_26] : memref<64x32xf32, #tpu.memory_space<vmem>>, vector<64x32xf32>
    %c0_27 = arith.constant 0 : index
    %c0_28 = arith.constant 0 : index
    %14 = vector.load %arg19[%c0_27, %c0_28] : memref<32x64xf32, #tpu.memory_space<vmem>>, vector<32x64xf32>
    %c0_29 = arith.constant 0 : index
    %c0_30 = arith.constant 0 : index
    %15 = vector.load %arg4[%c0_29, %c0_30] : memref<32x128xf32, #tpu.memory_space<vmem>>, vector<1x32xf32>
    %c1 = arith.constant 1 : index
    %c0_31 = arith.constant 0 : index
    %16 = vector.load %arg4[%c1, %c0_31] : memref<32x128xf32, #tpu.memory_space<vmem>>, vector<1x32xf32>
    %c2 = arith.constant 2 : index
    %c0_32 = arith.constant 0 : index
    %17 = vector.load %arg4[%c2, %c0_32] : memref<32x128xf32, #tpu.memory_space<vmem>>, vector<1x96xf32>
    %c3 = arith.constant 3 : index
    %c0_33 = arith.constant 0 : index
    %18 = vector.load %arg4[%c3, %c0_33] : memref<32x128xf32, #tpu.memory_space<vmem>>, vector<1x32xf32>
    %c4 = arith.constant 4 : index
    %c0_34 = arith.constant 0 : index
    %19 = vector.load %arg4[%c4, %c0_34] : memref<32x128xf32, #tpu.memory_space<vmem>>, vector<1x32xf32>
    %c5 = arith.constant 5 : index
    %c0_35 = arith.constant 0 : index
    %20 = vector.load %arg4[%c5, %c0_35] : memref<32x128xf32, #tpu.memory_space<vmem>>, vector<1x32xf32>
    %c6 = arith.constant 6 : index
    %c0_36 = arith.constant 0 : index
    %21 = vector.load %arg4[%c6, %c0_36] : memref<32x128xf32, #tpu.memory_space<vmem>>, vector<1x64xf32>
    %c7 = arith.constant 7 : index
    %c0_37 = arith.constant 0 : index
    %22 = vector.load %arg4[%c7, %c0_37] : memref<32x128xf32, #tpu.memory_space<vmem>>, vector<1x32xf32>
    %c8 = arith.constant 8 : index
    %c0_38 = arith.constant 0 : index
    %23 = vector.load %arg4[%c8, %c0_38] : memref<32x128xf32, #tpu.memory_space<vmem>>, vector<1x32xf32>
    %c9 = arith.constant 9 : index
    %c0_39 = arith.constant 0 : index
    %24 = vector.load %arg4[%c9, %c0_39] : memref<32x128xf32, #tpu.memory_space<vmem>>, vector<1x32xf32>
    %c10 = arith.constant 10 : index
    %c0_40 = arith.constant 0 : index
    %25 = vector.load %arg4[%c10, %c0_40] : memref<32x128xf32, #tpu.memory_space<vmem>>, vector<1x32xf32>
    %c11 = arith.constant 11 : index
    %c0_41 = arith.constant 0 : index
    %26 = vector.load %arg4[%c11, %c0_41] : memref<32x128xf32, #tpu.memory_space<vmem>>, vector<1x32xf32>
    %c12 = arith.constant 12 : index
    %c0_42 = arith.constant 0 : index
    %27 = vector.load %arg4[%c12, %c0_42] : memref<32x128xf32, #tpu.memory_space<vmem>>, vector<1x96xf32>
    %c13 = arith.constant 13 : index
    %c0_43 = arith.constant 0 : index
    %28 = vector.load %arg4[%c13, %c0_43] : memref<32x128xf32, #tpu.memory_space<vmem>>, vector<1x32xf32>
    %c14 = arith.constant 14 : index
    %c0_44 = arith.constant 0 : index
    %29 = vector.load %arg4[%c14, %c0_44] : memref<32x128xf32, #tpu.memory_space<vmem>>, vector<1x32xf32>
    %c15 = arith.constant 15 : index
    %c0_45 = arith.constant 0 : index
    %30 = vector.load %arg4[%c15, %c0_45] : memref<32x128xf32, #tpu.memory_space<vmem>>, vector<1x32xf32>
    %c16 = arith.constant 16 : index
    %c0_46 = arith.constant 0 : index
    %31 = vector.load %arg4[%c16, %c0_46] : memref<32x128xf32, #tpu.memory_space<vmem>>, vector<1x32xf32>
    %c17 = arith.constant 17 : index
    %c0_47 = arith.constant 0 : index
    %32 = vector.load %arg4[%c17, %c0_47] : memref<32x128xf32, #tpu.memory_space<vmem>>, vector<1x64xf32>
    %c18 = arith.constant 18 : index
    %c0_48 = arith.constant 0 : index
    %33 = vector.load %arg4[%c18, %c0_48] : memref<32x128xf32, #tpu.memory_space<vmem>>, vector<1x32xf32>
    %c19 = arith.constant 19 : index
    %c0_49 = arith.constant 0 : index
    %34 = vector.load %arg4[%c19, %c0_49] : memref<32x128xf32, #tpu.memory_space<vmem>>, vector<1x32xf32>
    %c20 = arith.constant 20 : index
    %c0_50 = arith.constant 0 : index
    %35 = vector.load %arg4[%c20, %c0_50] : memref<32x128xf32, #tpu.memory_space<vmem>>, vector<1x32xf32>
    %c21 = arith.constant 21 : index
    %c0_51 = arith.constant 0 : index
    %36 = vector.load %arg4[%c21, %c0_51] : memref<32x128xf32, #tpu.memory_space<vmem>>, vector<1x64xf32>
    %c22 = arith.constant 22 : index
    %c0_52 = arith.constant 0 : index
    %37 = vector.load %arg4[%c22, %c0_52] : memref<32x128xf32, #tpu.memory_space<vmem>>, vector<1x32xf32>
    %c23 = arith.constant 23 : index
    %c0_53 = arith.constant 0 : index
    %38 = vector.load %arg4[%c23, %c0_53] : memref<32x128xf32, #tpu.memory_space<vmem>>, vector<1x32xf32>
    %c24 = arith.constant 24 : index
    %c0_54 = arith.constant 0 : index
    %39 = vector.load %arg4[%c24, %c0_54] : memref<32x128xf32, #tpu.memory_space<vmem>>, vector<1x32xf32>
    %c25 = arith.constant 25 : index
    %c0_55 = arith.constant 0 : index
    %40 = vector.load %arg4[%c25, %c0_55] : memref<32x128xf32, #tpu.memory_space<vmem>>, vector<1x64xf32>
    %c0_56 = arith.constant 0 : index
    %c0_57 = arith.constant 0 : index
    %c0_58 = arith.constant 0 : index
    %41 = vector.load %arg3[%c0_56, %c0_57, %c0_58] : memref<1x1x8xi32, #tpu.memory_space<vmem>>, vector<1x1x8xi32>
    %42 = vector.shape_cast %41 : vector<1x1x8xi32> to vector<1x8xi32>
    %c1_i32 = arith.constant 1 : i32
    %43 = vector.broadcast %c1_i32 : i32 to vector<1x8xi32>
    %44 = arith.cmpi eq, %42, %43 : vector<1x8xi32>
    %cst = arith.constant -1.000000e+09 : f32
    %cst_59 = arith.constant 0.000000e+00 : f32
    %45 = vector.broadcast %cst : f32 to vector<1x8xf32>
    %46 = vector.broadcast %cst_59 : f32 to vector<1x8xf32>
    %47 = arith.select %44, %45, %46 : vector<1x8xi1>, vector<1x8xf32>
    %48 = arith.index_cast %arg0 : i32 to index
    %c0_60 = arith.constant 0 : index
    %49 = memref.load %arg1[%48, %c0_60] : memref<2x8xi32, #tpu.memory_space<smem>>
    %50 = arith.index_cast %49 : i32 to index
    %c0_61 = arith.constant 0 : index
    %51 = vector.load %arg5[%50, %c0_61] : memref<64x32xf32, #tpu.memory_space<vmem>>, vector<1x32xf32>
    %52 = arith.index_cast %arg0 : i32 to index
    %c1_62 = arith.constant 1 : index
    %53 = memref.load %arg1[%52, %c1_62] : memref<2x8xi32, #tpu.memory_space<smem>>
    %54 = arith.index_cast %53 : i32 to index
    %c0_63 = arith.constant 0 : index
    %55 = vector.load %arg5[%54, %c0_63] : memref<64x32xf32, #tpu.memory_space<vmem>>, vector<1x32xf32>
    %56 = arith.index_cast %arg0 : i32 to index
    %c2_64 = arith.constant 2 : index
    %57 = memref.load %arg1[%56, %c2_64] : memref<2x8xi32, #tpu.memory_space<smem>>
    %58 = arith.index_cast %57 : i32 to index
    %c0_65 = arith.constant 0 : index
    %59 = vector.load %arg5[%58, %c0_65] : memref<64x32xf32, #tpu.memory_space<vmem>>, vector<1x32xf32>
    %60 = arith.index_cast %arg0 : i32 to index
    %c3_66 = arith.constant 3 : index
    %61 = memref.load %arg1[%60, %c3_66] : memref<2x8xi32, #tpu.memory_space<smem>>
    %62 = arith.index_cast %61 : i32 to index
    %c0_67 = arith.constant 0 : index
    %63 = vector.load %arg5[%62, %c0_67] : memref<64x32xf32, #tpu.memory_space<vmem>>, vector<1x32xf32>
    %64 = arith.index_cast %arg0 : i32 to index
    %c4_68 = arith.constant 4 : index
    %65 = memref.load %arg1[%64, %c4_68] : memref<2x8xi32, #tpu.memory_space<smem>>
    %66 = arith.index_cast %65 : i32 to index
    %c0_69 = arith.constant 0 : index
    %67 = vector.load %arg5[%66, %c0_69] : memref<64x32xf32, #tpu.memory_space<vmem>>, vector<1x32xf32>
    %68 = arith.index_cast %arg0 : i32 to index
    %c5_70 = arith.constant 5 : index
    %69 = memref.load %arg1[%68, %c5_70] : memref<2x8xi32, #tpu.memory_space<smem>>
    %70 = arith.index_cast %69 : i32 to index
    %c0_71 = arith.constant 0 : index
    %71 = vector.load %arg5[%70, %c0_71] : memref<64x32xf32, #tpu.memory_space<vmem>>, vector<1x32xf32>
    %72 = arith.index_cast %arg0 : i32 to index
    %c6_72 = arith.constant 6 : index
    %73 = memref.load %arg1[%72, %c6_72] : memref<2x8xi32, #tpu.memory_space<smem>>
    %74 = arith.index_cast %73 : i32 to index
    %c0_73 = arith.constant 0 : index
    %75 = vector.load %arg5[%74, %c0_73] : memref<64x32xf32, #tpu.memory_space<vmem>>, vector<1x32xf32>
    %76 = arith.index_cast %arg0 : i32 to index
    %c7_74 = arith.constant 7 : index
    %77 = memref.load %arg1[%76, %c7_74] : memref<2x8xi32, #tpu.memory_space<smem>>
    %78 = arith.index_cast %77 : i32 to index
    %c0_75 = arith.constant 0 : index
    %79 = vector.load %arg5[%78, %c0_75] : memref<64x32xf32, #tpu.memory_space<vmem>>, vector<1x32xf32>
    %80 = tpu.concatenate %51, %55, %59, %63, %67, %71, %75, %79 in 0 : vector<1x32xf32>, vector<1x32xf32>, vector<1x32xf32>, vector<1x32xf32>, vector<1x32xf32>, vector<1x32xf32>, vector<1x32xf32>, vector<1x32xf32> -> vector<8x32xf32>
    %81 = arith.addf %80, %1 : vector<8x32xf32>
    %cst_76 = arith.constant dense<0.000000e+00> : vector<8xf32>
    %82 = vector.multi_reduction <add>, %81, %cst_76 [1] : vector<8x32xf32> to vector<8xf32>
    %83 = vector.shape_cast %82 : vector<8xf32> to vector<8x1xf32>
    %cst_77 = arith.constant 3.200000e+01 : f32
    %84 = vector.broadcast %cst_77 : f32 to vector<8x1xf32>
    %85 = arith.divf %83, %84 : vector<8x1xf32>
    %86 = vector.broadcast %85 : vector<8x1xf32> to vector<8x32xf32>
    %87 = arith.subf %81, %86 : vector<8x32xf32>
    %88 = arith.mulf %87, %87 : vector<8x32xf32>
    %cst_78 = arith.constant dense<0.000000e+00> : vector<8xf32>
    %89 = vector.multi_reduction <add>, %88, %cst_78 [1] : vector<8x32xf32> to vector<8xf32>
    %90 = vector.shape_cast %89 : vector<8xf32> to vector<8x1xf32>
    %cst_79 = arith.constant 3.200000e+01 : f32
    %91 = vector.broadcast %cst_79 : f32 to vector<8x1xf32>
    %92 = arith.divf %90, %91 : vector<8x1xf32>
    %93 = vector.broadcast %85 : vector<8x1xf32> to vector<8x32xf32>
    %94 = arith.subf %81, %93 : vector<8x32xf32>
    %cst_80 = arith.constant 9.99999974E-6 : f32
    %95 = vector.broadcast %cst_80 : f32 to vector<8x1xf32>
    %96 = arith.addf %92, %95 : vector<8x1xf32>
    %97 = math.rsqrt %96 : vector<8x1xf32>
    %98 = vector.broadcast %97 : vector<8x1xf32> to vector<8x32xf32>
    %99 = arith.mulf %94, %98 : vector<8x32xf32>
    %100 = vector.broadcast %15 : vector<1x32xf32> to vector<8x32xf32>
    %101 = arith.mulf %99, %100 : vector<8x32xf32>
    %102 = vector.broadcast %16 : vector<1x32xf32> to vector<8x32xf32>
    %103 = arith.addf %101, %102 : vector<8x32xf32>
    %cst_81 = arith.constant dense<0.000000e+00> : vector<8x96xf32>
    %104 = tpu.matmul %103, %3, %cst_81 {dimension_numbers = #tpu.dot_dimension_numbers<[1], [0], [0], [1], [0, 0, 1, 1], [], []>} : vector<8x32xf32>, vector<32x96xf32>, vector<8x96xf32> -> vector<8x96xf32>
    %105 = vector.broadcast %17 : vector<1x96xf32> to vector<8x96xf32>
    %106 = arith.addf %104, %105 : vector<8x96xf32>
    %107 = vector.extract_strided_slice %106 {offsets = [0, 0], sizes = [8, 16], strides = [1, 1]} : vector<8x96xf32> to vector<8x16xf32>
    %108 = vector.extract_strided_slice %106 {offsets = [0, 32], sizes = [8, 16], strides = [1, 1]} : vector<8x96xf32> to vector<8x16xf32>
    %109 = vector.extract_strided_slice %106 {offsets = [0, 64], sizes = [8, 16], strides = [1, 1]} : vector<8x96xf32> to vector<8x16xf32>
    %cst_82 = arith.constant dense<0.000000e+00> : vector<8x8xf32>
    %110 = tpu.matmul %107, %108, %cst_82 {dimension_numbers = #tpu.dot_dimension_numbers<[1], [1], [0], [0], [0, 0, 1, 0], [], []>} : vector<8x16xf32>, vector<8x16xf32>, vector<8x8xf32> -> vector<8x8xf32>
    %cst_83 = arith.constant 2.500000e-01 : f32
    %111 = vector.broadcast %cst_83 : f32 to vector<8x8xf32>
    %112 = arith.mulf %110, %111 : vector<8x8xf32>
    %113 = vector.broadcast %47 : vector<1x8xf32> to vector<8x8xf32>
    %114 = arith.addf %112, %113 : vector<8x8xf32>
    %cst_84 = arith.constant dense<0xFF800000> : vector<8xf32>
    %115 = vector.multi_reduction <maximumf>, %114, %cst_84 [1] : vector<8x8xf32> to vector<8xf32>
    %116 = vector.shape_cast %115 : vector<8xf32> to vector<8x1xf32>
    %117 = vector.broadcast %116 : vector<8x1xf32> to vector<8x8xf32>
    %118 = arith.subf %114, %117 : vector<8x8xf32>
    %119 = math.exp %118 : vector<8x8xf32>
    %cst_85 = arith.constant dense<0.000000e+00> : vector<8xf32>
    %120 = vector.multi_reduction <add>, %119, %cst_85 [1] : vector<8x8xf32> to vector<8xf32>
    %121 = vector.shape_cast %120 : vector<8xf32> to vector<8x1xf32>
    %122 = vector.broadcast %121 : vector<8x1xf32> to vector<8x8xf32>
    %123 = arith.divf %119, %122 : vector<8x8xf32>
    %cst_86 = arith.constant dense<0.000000e+00> : vector<8x16xf32>
    %124 = tpu.matmul %123, %109, %cst_86 {dimension_numbers = #tpu.dot_dimension_numbers<[1], [0], [0], [1], [0, 0, 1, 1], [], []>} : vector<8x8xf32>, vector<8x16xf32>, vector<8x16xf32> -> vector<8x16xf32>
    %125 = vector.extract_strided_slice %106 {offsets = [0, 16], sizes = [8, 16], strides = [1, 1]} : vector<8x96xf32> to vector<8x16xf32>
    %126 = vector.extract_strided_slice %106 {offsets = [0, 48], sizes = [8, 16], strides = [1, 1]} : vector<8x96xf32> to vector<8x16xf32>
    %127 = vector.extract_strided_slice %106 {offsets = [0, 80], sizes = [8, 16], strides = [1, 1]} : vector<8x96xf32> to vector<8x16xf32>
    %cst_87 = arith.constant dense<0.000000e+00> : vector<8x8xf32>
    %128 = tpu.matmul %125, %126, %cst_87 {dimension_numbers = #tpu.dot_dimension_numbers<[1], [1], [0], [0], [0, 0, 1, 0], [], []>} : vector<8x16xf32>, vector<8x16xf32>, vector<8x8xf32> -> vector<8x8xf32>
    %cst_88 = arith.constant 2.500000e-01 : f32
    %129 = vector.broadcast %cst_88 : f32 to vector<8x8xf32>
    %130 = arith.mulf %128, %129 : vector<8x8xf32>
    %131 = vector.broadcast %47 : vector<1x8xf32> to vector<8x8xf32>
    %132 = arith.addf %130, %131 : vector<8x8xf32>
    %cst_89 = arith.constant dense<0xFF800000> : vector<8xf32>
    %133 = vector.multi_reduction <maximumf>, %132, %cst_89 [1] : vector<8x8xf32> to vector<8xf32>
    %134 = vector.shape_cast %133 : vector<8xf32> to vector<8x1xf32>
    %135 = vector.broadcast %134 : vector<8x1xf32> to vector<8x8xf32>
    %136 = arith.subf %132, %135 : vector<8x8xf32>
    %137 = math.exp %136 : vector<8x8xf32>
    %cst_90 = arith.constant dense<0.000000e+00> : vector<8xf32>
    %138 = vector.multi_reduction <add>, %137, %cst_90 [1] : vector<8x8xf32> to vector<8xf32>
    %139 = vector.shape_cast %138 : vector<8xf32> to vector<8x1xf32>
    %140 = vector.broadcast %139 : vector<8x1xf32> to vector<8x8xf32>
    %141 = arith.divf %137, %140 : vector<8x8xf32>
    %cst_91 = arith.constant dense<0.000000e+00> : vector<8x16xf32>
    %142 = tpu.matmul %141, %127, %cst_91 {dimension_numbers = #tpu.dot_dimension_numbers<[1], [0], [0], [1], [0, 0, 1, 1], [], []>} : vector<8x8xf32>, vector<8x16xf32>, vector<8x16xf32> -> vector<8x16xf32>
    %143 = tpu.concatenate %124, %142 in 1 : vector<8x16xf32>, vector<8x16xf32> -> vector<8x32xf32>
    %cst_92 = arith.constant dense<0.000000e+00> : vector<8x32xf32>
    %144 = tpu.matmul %143, %4, %cst_92 {dimension_numbers = #tpu.dot_dimension_numbers<[1], [0], [0], [1], [0, 0, 1, 1], [], []>} : vector<8x32xf32>, vector<32x32xf32>, vector<8x32xf32> -> vector<8x32xf32>
    %145 = arith.addf %103, %144 : vector<8x32xf32>
    %146 = vector.broadcast %18 : vector<1x32xf32> to vector<8x32xf32>
    %147 = arith.addf %145, %146 : vector<8x32xf32>
    %cst_93 = arith.constant dense<0.000000e+00> : vector<8xf32>
    %148 = vector.multi_reduction <add>, %147, %cst_93 [1] : vector<8x32xf32> to vector<8xf32>
    %149 = vector.shape_cast %148 : vector<8xf32> to vector<8x1xf32>
    %cst_94 = arith.constant 3.200000e+01 : f32
    %150 = vector.broadcast %cst_94 : f32 to vector<8x1xf32>
    %151 = arith.divf %149, %150 : vector<8x1xf32>
    %152 = vector.broadcast %151 : vector<8x1xf32> to vector<8x32xf32>
    %153 = arith.subf %147, %152 : vector<8x32xf32>
    %154 = arith.mulf %153, %153 : vector<8x32xf32>
    %cst_95 = arith.constant dense<0.000000e+00> : vector<8xf32>
    %155 = vector.multi_reduction <add>, %154, %cst_95 [1] : vector<8x32xf32> to vector<8xf32>
    %156 = vector.shape_cast %155 : vector<8xf32> to vector<8x1xf32>
    %cst_96 = arith.constant 3.200000e+01 : f32
    %157 = vector.broadcast %cst_96 : f32 to vector<8x1xf32>
    %158 = arith.divf %156, %157 : vector<8x1xf32>
    %159 = vector.broadcast %151 : vector<8x1xf32> to vector<8x32xf32>
    %160 = arith.subf %147, %159 : vector<8x32xf32>
    %cst_97 = arith.constant 9.99999974E-6 : f32
    %161 = vector.broadcast %cst_97 : f32 to vector<8x1xf32>
    %162 = arith.addf %158, %161 : vector<8x1xf32>
    %163 = math.rsqrt %162 : vector<8x1xf32>
    %164 = vector.broadcast %163 : vector<8x1xf32> to vector<8x32xf32>
    %165 = arith.mulf %160, %164 : vector<8x32xf32>
    %166 = vector.broadcast %19 : vector<1x32xf32> to vector<8x32xf32>
    %167 = arith.mulf %165, %166 : vector<8x32xf32>
    %168 = vector.broadcast %20 : vector<1x32xf32> to vector<8x32xf32>
    %169 = arith.addf %167, %168 : vector<8x32xf32>
    %cst_98 = arith.constant dense<0.000000e+00> : vector<8x64xf32>
    %170 = tpu.matmul %169, %5, %cst_98 {dimension_numbers = #tpu.dot_dimension_numbers<[1], [0], [0], [1], [0, 0, 1, 1], [], []>} : vector<8x32xf32>, vector<32x64xf32>, vector<8x64xf32> -> vector<8x64xf32>
    %171 = vector.broadcast %21 : vector<1x64xf32> to vector<8x64xf32>
    %172 = arith.addf %170, %171 : vector<8x64xf32>
    %173 = arith.mulf %172, %172 : vector<8x64xf32>
    %174 = arith.mulf %172, %173 : vector<8x64xf32>
    %cst_99 = arith.constant 4.471500e-02 : f32
    %175 = vector.broadcast %cst_99 : f32 to vector<8x64xf32>
    %176 = arith.mulf %175, %174 : vector<8x64xf32>
    %177 = arith.addf %172, %176 : vector<8x64xf32>
    %cst_100 = arith.constant 0.797884583 : f32
    %178 = vector.broadcast %cst_100 : f32 to vector<8x64xf32>
    %179 = arith.mulf %178, %177 : vector<8x64xf32>
    %180 = math.tanh %179 : vector<8x64xf32>
    %cst_101 = arith.constant 1.000000e+00 : f32
    %181 = vector.broadcast %cst_101 : f32 to vector<8x64xf32>
    %182 = arith.addf %181, %180 : vector<8x64xf32>
    %cst_102 = arith.constant 5.000000e-01 : f32
    %183 = vector.broadcast %cst_102 : f32 to vector<8x64xf32>
    %184 = arith.mulf %183, %182 : vector<8x64xf32>
    %185 = arith.mulf %172, %184 : vector<8x64xf32>
    %cst_103 = arith.constant dense<0.000000e+00> : vector<8x32xf32>
    %186 = tpu.matmul %185, %6, %cst_103 {dimension_numbers = #tpu.dot_dimension_numbers<[1], [0], [0], [1], [0, 0, 1, 1], [], []>} : vector<8x64xf32>, vector<64x32xf32>, vector<8x32xf32> -> vector<8x32xf32>
    %187 = arith.addf %169, %186 : vector<8x32xf32>
    %188 = vector.broadcast %22 : vector<1x32xf32> to vector<8x32xf32>
    %189 = arith.addf %187, %188 : vector<8x32xf32>
    %cst_104 = arith.constant dense<0.000000e+00> : vector<8xf32>
    %190 = vector.multi_reduction <add>, %189, %cst_104 [1] : vector<8x32xf32> to vector<8xf32>
    %191 = vector.shape_cast %190 : vector<8xf32> to vector<8x1xf32>
    %cst_105 = arith.constant 3.200000e+01 : f32
    %192 = vector.broadcast %cst_105 : f32 to vector<8x1xf32>
    %193 = arith.divf %191, %192 : vector<8x1xf32>
    %194 = vector.broadcast %193 : vector<8x1xf32> to vector<8x32xf32>
    %195 = arith.subf %189, %194 : vector<8x32xf32>
    %196 = arith.mulf %195, %195 : vector<8x32xf32>
    %cst_106 = arith.constant dense<0.000000e+00> : vector<8xf32>
    %197 = vector.multi_reduction <add>, %196, %cst_106 [1] : vector<8x32xf32> to vector<8xf32>
    %198 = vector.shape_cast %197 : vector<8xf32> to vector<8x1xf32>
    %cst_107 = arith.constant 3.200000e+01 : f32
    %199 = vector.broadcast %cst_107 : f32 to vector<8x1xf32>
    %200 = arith.divf %198, %199 : vector<8x1xf32>
    %201 = vector.broadcast %193 : vector<8x1xf32> to vector<8x32xf32>
    %202 = arith.subf %189, %201 : vector<8x32xf32>
    %cst_108 = arith.constant 9.99999974E-6 : f32
    %203 = vector.broadcast %cst_108 : f32 to vector<8x1xf32>
    %204 = arith.addf %200, %203 : vector<8x1xf32>
    %205 = math.rsqrt %204 : vector<8x1xf32>
    %206 = vector.broadcast %205 : vector<8x1xf32> to vector<8x32xf32>
    %207 = arith.mulf %202, %206 : vector<8x32xf32>
    %208 = vector.broadcast %23 : vector<1x32xf32> to vector<8x32xf32>
    %209 = arith.mulf %207, %208 : vector<8x32xf32>
    %210 = vector.broadcast %24 : vector<1x32xf32> to vector<8x32xf32>
    %211 = arith.addf %209, %210 : vector<8x32xf32>
    %cst_109 = arith.constant dense<0.000000e+00> : vector<8x64xf32>
    %212 = tpu.matmul %211, %10, %cst_109 {dimension_numbers = #tpu.dot_dimension_numbers<[1], [0], [0], [1], [0, 0, 1, 1], [], []>} : vector<8x32xf32>, vector<32x64xf32>, vector<8x64xf32> -> vector<8x64xf32>
    %213 = vector.broadcast %32 : vector<1x64xf32> to vector<8x64xf32>
    %214 = arith.addf %212, %213 : vector<8x64xf32>
    %215 = vector.extract_strided_slice %2 {offsets = [0, 0], sizes = [1, 32], strides = [1, 1]} : vector<4x32xf32> to vector<1x32xf32>
    %216 = vector.extract_strided_slice %2 {offsets = [1, 0], sizes = [1, 32], strides = [1, 1]} : vector<4x32xf32> to vector<1x32xf32>
    %217 = vector.extract_strided_slice %2 {offsets = [2, 0], sizes = [1, 32], strides = [1, 1]} : vector<4x32xf32> to vector<1x32xf32>
    %218 = vector.extract_strided_slice %2 {offsets = [3, 0], sizes = [1, 32], strides = [1, 1]} : vector<4x32xf32> to vector<1x32xf32>
    %219 = tpu.iota {dimensions = array<i32: 1>} : vector<1x64xi32>
    %220 = arith.sitofp %219 : vector<1x64xi32> to vector<1x64xf32>
    %221 = arith.index_cast %arg0 : i32 to index
    %222 = memref.load %arg2[%221] : memref<2xi32, #tpu.memory_space<smem>>
    %223 = vector.broadcast %222 : i32 to vector<1x1xi32>
    %false = arith.constant false
    %224 = vector.broadcast %false : i1 to vector<1x1xi1>
    %225 = arith.index_cast %arg0 : i32 to index
    %226 = memref.load %arg2[%225] : memref<2xi32, #tpu.memory_space<smem>>
    %227 = arith.index_cast %226 : i32 to index
    %c0_110 = arith.constant 0 : index
    %228 = vector.load %arg5[%227, %c0_110] : memref<64x32xf32, #tpu.memory_space<vmem>>, vector<1x32xf32>
    %229 = arith.addf %228, %215 : vector<1x32xf32>
    %cst_111 = arith.constant dense<0.000000e+00> : vector<1xf32>
    %230 = vector.multi_reduction <add>, %229, %cst_111 [1] : vector<1x32xf32> to vector<1xf32>
    %231 = vector.shape_cast %230 : vector<1xf32> to vector<1x1xf32>
    %cst_112 = arith.constant 3.200000e+01 : f32
    %232 = vector.broadcast %cst_112 : f32 to vector<1x1xf32>
    %233 = arith.divf %231, %232 : vector<1x1xf32>
    %234 = vector.broadcast %233 : vector<1x1xf32> to vector<1x32xf32>
    %235 = arith.subf %229, %234 : vector<1x32xf32>
    %236 = arith.mulf %235, %235 : vector<1x32xf32>
    %cst_113 = arith.constant dense<0.000000e+00> : vector<1xf32>
    %237 = vector.multi_reduction <add>, %236, %cst_113 [1] : vector<1x32xf32> to vector<1xf32>
    %238 = vector.shape_cast %237 : vector<1xf32> to vector<1x1xf32>
    %cst_114 = arith.constant 3.200000e+01 : f32
    %239 = vector.broadcast %cst_114 : f32 to vector<1x1xf32>
    %240 = arith.divf %238, %239 : vector<1x1xf32>
    %241 = vector.broadcast %233 : vector<1x1xf32> to vector<1x32xf32>
    %242 = arith.subf %229, %241 : vector<1x32xf32>
    %cst_115 = arith.constant 9.99999974E-6 : f32
    %243 = vector.broadcast %cst_115 : f32 to vector<1x1xf32>
    %244 = arith.addf %240, %243 : vector<1x1xf32>
    %245 = math.rsqrt %244 : vector<1x1xf32>
    %246 = vector.broadcast %245 : vector<1x1xf32> to vector<1x32xf32>
    %247 = arith.mulf %242, %246 : vector<1x32xf32>
    %248 = arith.mulf %247, %25 : vector<1x32xf32>
    %249 = arith.addf %248, %26 : vector<1x32xf32>
    %cst_116 = arith.constant dense<0.000000e+00> : vector<1x96xf32>
    %250 = tpu.matmul %249, %7, %cst_116 {dimension_numbers = #tpu.dot_dimension_numbers<[1], [0], [0], [1], [0, 0, 1, 1], [], []>} : vector<1x32xf32>, vector<32x96xf32>, vector<1x96xf32> -> vector<1x96xf32>
    %251 = arith.addf %250, %27 : vector<1x96xf32>
    %252 = vector.extract_strided_slice %251 {offsets = [0, 32], sizes = [1, 16], strides = [1, 1]} : vector<1x96xf32> to vector<1x16xf32>
    %253 = vector.extract_strided_slice %251 {offsets = [0, 64], sizes = [1, 16], strides = [1, 1]} : vector<1x96xf32> to vector<1x16xf32>
    %c0_117 = arith.constant 0 : index
    %c0_118 = arith.constant 0 : index
    %254 = vector.load %arg21[%c0_117, %c0_118] : memref<16x16xf32, #tpu.memory_space<vmem>>, vector<1x16xf32>
    tpu.vector_store %arg21[%c0_117, %c0_118], %252 {strides = array<i32>} : memref<16x16xf32, #tpu.memory_space<vmem>>, vector<1x16xf32>,
    %c0_119 = arith.constant 0 : index
    %c0_120 = arith.constant 0 : index
    %255 = vector.load %arg22[%c0_119, %c0_120] : memref<16x16xf32, #tpu.memory_space<vmem>>, vector<1x16xf32>
    tpu.vector_store %arg22[%c0_119, %c0_120], %253 {strides = array<i32>} : memref<16x16xf32, #tpu.memory_space<vmem>>, vector<1x16xf32>,
    %256 = vector.extract_strided_slice %251 {offsets = [0, 48], sizes = [1, 16], strides = [1, 1]} : vector<1x96xf32> to vector<1x16xf32>
    %257 = vector.extract_strided_slice %251 {offsets = [0, 80], sizes = [1, 16], strides = [1, 1]} : vector<1x96xf32> to vector<1x16xf32>
    %c8_121 = arith.constant 8 : index
    %c0_122 = arith.constant 0 : index
    %258 = vector.load %arg21[%c8_121, %c0_122] : memref<16x16xf32, #tpu.memory_space<vmem>>, vector<1x16xf32>
    tpu.vector_store %arg21[%c8_121, %c0_122], %256 {strides = array<i32>} : memref<16x16xf32, #tpu.memory_space<vmem>>, vector<1x16xf32>,
    %c8_123 = arith.constant 8 : index
    %c0_124 = arith.constant 0 : index
    %259 = vector.load %arg22[%c8_123, %c0_124] : memref<16x16xf32, #tpu.memory_space<vmem>>, vector<1x16xf32>
    tpu.vector_store %arg22[%c8_123, %c0_124], %257 {strides = array<i32>} : memref<16x16xf32, #tpu.memory_space<vmem>>, vector<1x16xf32>,
    %260 = tpu.concatenate %253, %257 in 1 : vector<1x16xf32>, vector<1x16xf32> -> vector<1x32xf32>
    %cst_125 = arith.constant dense<0.000000e+00> : vector<1x32xf32>
    %261 = tpu.matmul %260, %8, %cst_125 {dimension_numbers = #tpu.dot_dimension_numbers<[1], [0], [0], [1], [0, 0, 1, 1], [], []>} : vector<1x32xf32>, vector<32x32xf32>, vector<1x32xf32> -> vector<1x32xf32>
    %262 = arith.addf %249, %261 : vector<1x32xf32>
    %263 = arith.addf %262, %28 : vector<1x32xf32>
    %cst_126 = arith.constant dense<0.000000e+00> : vector<1xf32>
    %264 = vector.multi_reduction <add>, %263, %cst_126 [1] : vector<1x32xf32> to vector<1xf32>
    %265 = vector.shape_cast %264 : vector<1xf32> to vector<1x1xf32>
    %cst_127 = arith.constant 3.200000e+01 : f32
    %266 = vector.broadcast %cst_127 : f32 to vector<1x1xf32>
    %267 = arith.divf %265, %266 : vector<1x1xf32>
    %268 = vector.broadcast %267 : vector<1x1xf32> to vector<1x32xf32>
    %269 = arith.subf %263, %268 : vector<1x32xf32>
    %270 = arith.mulf %269, %269 : vector<1x32xf32>
    %cst_128 = arith.constant dense<0.000000e+00> : vector<1xf32>
    %271 = vector.multi_reduction <add>, %270, %cst_128 [1] : vector<1x32xf32> to vector<1xf32>
    %272 = vector.shape_cast %271 : vector<1xf32> to vector<1x1xf32>
    %cst_129 = arith.constant 3.200000e+01 : f32
    %273 = vector.broadcast %cst_129 : f32 to vector<1x1xf32>
    %274 = arith.divf %272, %273 : vector<1x1xf32>
    %275 = vector.broadcast %267 : vector<1x1xf32> to vector<1x32xf32>
    %276 = arith.subf %263, %275 : vector<1x32xf32>
    %cst_130 = arith.constant 9.99999974E-6 : f32
    %277 = vector.broadcast %cst_130 : f32 to vector<1x1xf32>
    %278 = arith.addf %274, %277 : vector<1x1xf32>
    %279 = math.rsqrt %278 : vector<1x1xf32>
    %280 = vector.broadcast %279 : vector<1x1xf32> to vector<1x32xf32>
    %281 = arith.mulf %276, %280 : vector<1x32xf32>
    %282 = arith.mulf %281, %29 : vector<1x32xf32>
    %283 = arith.addf %282, %30 : vector<1x32xf32>
    %cst_131 = arith.constant dense<0.000000e+00> : vector<1x32xf32>
    %284 = tpu.matmul %283, %9, %cst_131 {dimension_numbers = #tpu.dot_dimension_numbers<[1], [0], [0], [1], [0, 0, 1, 1], [], []>} : vector<1x32xf32>, vector<32x32xf32>, vector<1x32xf32> -> vector<1x32xf32>
    %285 = arith.addf %284, %31 : vector<1x32xf32>
    %286 = vector.extract_strided_slice %285 {offsets = [0, 0], sizes = [1, 16], strides = [1, 1]} : vector<1x32xf32> to vector<1x16xf32>
    %287 = vector.extract_strided_slice %214 {offsets = [0, 0], sizes = [8, 16], strides = [1, 1]} : vector<8x64xf32> to vector<8x16xf32>
    %cst_132 = arith.constant dense<0.000000e+00> : vector<1x8xf32>
    %288 = tpu.matmul %286, %287, %cst_132 {dimension_numbers = #tpu.dot_dimension_numbers<[1], [1], [0], [0], [0, 0, 1, 0], [], []>} : vector<1x16xf32>, vector<8x16xf32>, vector<1x8xf32> -> vector<1x8xf32>
    %cst_133 = arith.constant 2.500000e-01 : f32
    %289 = vector.broadcast %cst_133 : f32 to vector<1x8xf32>
    %290 = arith.mulf %288, %289 : vector<1x8xf32>
    %291 = arith.addf %290, %47 : vector<1x8xf32>
    %cst_134 = arith.constant dense<0xFF800000> : vector<1xf32>
    %292 = vector.multi_reduction <maximumf>, %291, %cst_134 [1] : vector<1x8xf32> to vector<1xf32>
    %293 = vector.shape_cast %292 : vector<1xf32> to vector<1x1xf32>
    %294 = vector.broadcast %293 : vector<1x1xf32> to vector<1x8xf32>
    %295 = arith.subf %291, %294 : vector<1x8xf32>
    %296 = math.exp %295 : vector<1x8xf32>
    %cst_135 = arith.constant dense<0.000000e+00> : vector<1xf32>
    %297 = vector.multi_reduction <add>, %296, %cst_135 [1] : vector<1x8xf32> to vector<1xf32>
    %298 = vector.shape_cast %297 : vector<1xf32> to vector<1x1xf32>
    %299 = vector.broadcast %298 : vector<1x1xf32> to vector<1x8xf32>
    %300 = arith.divf %296, %299 : vector<1x8xf32>
    %301 = vector.extract_strided_slice %214 {offsets = [0, 32], sizes = [8, 16], strides = [1, 1]} : vector<8x64xf32> to vector<8x16xf32>
    %cst_136 = arith.constant dense<0.000000e+00> : vector<1x16xf32>
    %302 = tpu.matmul %300, %301, %cst_136 {dimension_numbers = #tpu.dot_dimension_numbers<[1], [0], [0], [1], [0, 0, 1, 1], [], []>} : vector<1x8xf32>, vector<8x16xf32>, vector<1x16xf32> -> vector<1x16xf32>
    %303 = vector.extract_strided_slice %285 {offsets = [0, 16], sizes = [1, 16], strides = [1, 1]} : vector<1x32xf32> to vector<1x16xf32>
    %304 = vector.extract_strided_slice %214 {offsets = [0, 16], sizes = [8, 16], strides = [1, 1]} : vector<8x64xf32> to vector<8x16xf32>
    %cst_137 = arith.constant dense<0.000000e+00> : vector<1x8xf32>
    %305 = tpu.matmul %303, %304, %cst_137 {dimension_numbers = #tpu.dot_dimension_numbers<[1], [1], [0], [0], [0, 0, 1, 0], [], []>} : vector<1x16xf32>, vector<8x16xf32>, vector<1x8xf32> -> vector<1x8xf32>
    %cst_138 = arith.constant 2.500000e-01 : f32
    %306 = vector.broadcast %cst_138 : f32 to vector<1x8xf32>
    %307 = arith.mulf %305, %306 : vector<1x8xf32>
    %308 = arith.addf %307, %47 : vector<1x8xf32>
    %cst_139 = arith.constant dense<0xFF800000> : vector<1xf32>
    %309 = vector.multi_reduction <maximumf>, %308, %cst_139 [1] : vector<1x8xf32> to vector<1xf32>
    %310 = vector.shape_cast %309 : vector<1xf32> to vector<1x1xf32>
    %311 = vector.broadcast %310 : vector<1x1xf32> to vector<1x8xf32>
    %312 = arith.subf %308, %311 : vector<1x8xf32>
    %313 = math.exp %312 : vector<1x8xf32>
    %cst_140 = arith.constant dense<0.000000e+00> : vector<1xf32>
    %314 = vector.multi_reduction <add>, %313, %cst_140 [1] : vector<1x8xf32> to vector<1xf32>
    %315 = vector.shape_cast %314 : vector<1xf32> to vector<1x1xf32>
    %316 = vector.broadcast %315 : vector<1x1xf32> to vector<1x8xf32>
    %317 = arith.divf %313, %316 : vector<1x8xf32>
    %318 = vector.extract_strided_slice %214 {offsets = [0, 48], sizes = [8, 16], strides = [1, 1]} : vector<8x64xf32> to vector<8x16xf32>
    %cst_141 = arith.constant dense<0.000000e+00> : vector<1x16xf32>
    %319 = tpu.matmul %317, %318, %cst_141 {dimension_numbers = #tpu.dot_dimension_numbers<[1], [0], [0], [1], [0, 0, 1, 1], [], []>} : vector<1x8xf32>, vector<8x16xf32>, vector<1x16xf32> -> vector<1x16xf32>
    %320 = tpu.concatenate %302, %319 in 1 : vector<1x16xf32>, vector<1x16xf32> -> vector<1x32xf32>
    %cst_142 = arith.constant dense<0.000000e+00> : vector<1x32xf32>
    %321 = tpu.matmul %320, %11, %cst_142 {dimension_numbers = #tpu.dot_dimension_numbers<[1], [0], [0], [1], [0, 0, 1, 1], [], []>} : vector<1x32xf32>, vector<32x32xf32>, vector<1x32xf32> -> vector<1x32xf32>
    %322 = arith.addf %283, %321 : vector<1x32xf32>
    %323 = arith.addf %322, %33 : vector<1x32xf32>
    %cst_143 = arith.constant dense<0.000000e+00> : vector<1xf32>
    %324 = vector.multi_reduction <add>, %323, %cst_143 [1] : vector<1x32xf32> to vector<1xf32>
    %325 = vector.shape_cast %324 : vector<1xf32> to vector<1x1xf32>
    %cst_144 = arith.constant 3.200000e+01 : f32
    %326 = vector.broadcast %cst_144 : f32 to vector<1x1xf32>
    %327 = arith.divf %325, %326 : vector<1x1xf32>
    %328 = vector.broadcast %327 : vector<1x1xf32> to vector<1x32xf32>
    %329 = arith.subf %323, %328 : vector<1x32xf32>
    %330 = arith.mulf %329, %329 : vector<1x32xf32>
    %cst_145 = arith.constant dense<0.000000e+00> : vector<1xf32>
    %331 = vector.multi_reduction <add>, %330, %cst_145 [1] : vector<1x32xf32> to vector<1xf32>
    %332 = vector.shape_cast %331 : vector<1xf32> to vector<1x1xf32>
    %cst_146 = arith.constant 3.200000e+01 : f32
    %333 = vector.broadcast %cst_146 : f32 to vector<1x1xf32>
    %334 = arith.divf %332, %333 : vector<1x1xf32>
    %335 = vector.broadcast %327 : vector<1x1xf32> to vector<1x32xf32>
    %336 = arith.subf %323, %335 : vector<1x32xf32>
    %cst_147 = arith.constant 9.99999974E-6 : f32
    %337 = vector.broadcast %cst_147 : f32 to vector<1x1xf32>
    %338 = arith.addf %334, %337 : vector<1x1xf32>
    %339 = math.rsqrt %338 : vector<1x1xf32>
    %340 = vector.broadcast %339 : vector<1x1xf32> to vector<1x32xf32>
    %341 = arith.mulf %336, %340 : vector<1x32xf32>
    %342 = arith.mulf %341, %34 : vector<1x32xf32>
    %343 = arith.addf %342, %35 : vector<1x32xf32>
    %cst_148 = arith.constant dense<0.000000e+00> : vector<1x64xf32>
    %344 = tpu.matmul %343, %12, %cst_148 {dimension_numbers = #tpu.dot_dimension_numbers<[1], [0], [0], [1], [0, 0, 1, 1], [], []>} : vector<1x32xf32>, vector<32x64xf32>, vector<1x64xf32> -> vector<1x64xf32>
    %345 = arith.addf %344, %36 : vector<1x64xf32>
    %346 = arith.mulf %345, %345 : vector<1x64xf32>
    %347 = arith.mulf %345, %346 : vector<1x64xf32>
    %cst_149 = arith.constant 4.471500e-02 : f32
    %348 = vector.broadcast %cst_149 : f32 to vector<1x64xf32>
    %349 = arith.mulf %348, %347 : vector<1x64xf32>
    %350 = arith.addf %345, %349 : vector<1x64xf32>
    %cst_150 = arith.constant 0.797884583 : f32
    %351 = vector.broadcast %cst_150 : f32 to vector<1x64xf32>
    %352 = arith.mulf %351, %350 : vector<1x64xf32>
    %353 = math.tanh %352 : vector<1x64xf32>
    %cst_151 = arith.constant 1.000000e+00 : f32
    %354 = vector.broadcast %cst_151 : f32 to vector<1x64xf32>
    %355 = arith.addf %354, %353 : vector<1x64xf32>
    %cst_152 = arith.constant 5.000000e-01 : f32
    %356 = vector.broadcast %cst_152 : f32 to vector<1x64xf32>
    %357 = arith.mulf %356, %355 : vector<1x64xf32>
    %358 = arith.mulf %345, %357 : vector<1x64xf32>
    %cst_153 = arith.constant dense<0.000000e+00> : vector<1x32xf32>
    %359 = tpu.matmul %358, %13, %cst_153 {dimension_numbers = #tpu.dot_dimension_numbers<[1], [0], [0], [1], [0, 0, 1, 1], [], []>} : vector<1x64xf32>, vector<64x32xf32>, vector<1x32xf32> -> vector<1x32xf32>
    %360 = arith.addf %343, %359 : vector<1x32xf32>
    %361 = arith.addf %360, %37 : vector<1x32xf32>
    %cst_154 = arith.constant dense<0.000000e+00> : vector<1xf32>
    %362 = vector.multi_reduction <add>, %361, %cst_154 [1] : vector<1x32xf32> to vector<1xf32>
    %363 = vector.shape_cast %362 : vector<1xf32> to vector<1x1xf32>
    %cst_155 = arith.constant 3.200000e+01 : f32
    %364 = vector.broadcast %cst_155 : f32 to vector<1x1xf32>
    %365 = arith.divf %363, %364 : vector<1x1xf32>
    %366 = vector.broadcast %365 : vector<1x1xf32> to vector<1x32xf32>
    %367 = arith.subf %361, %366 : vector<1x32xf32>
    %368 = arith.mulf %367, %367 : vector<1x32xf32>
    %cst_156 = arith.constant dense<0.000000e+00> : vector<1xf32>
    %369 = vector.multi_reduction <add>, %368, %cst_156 [1] : vector<1x32xf32> to vector<1xf32>
    %370 = vector.shape_cast %369 : vector<1xf32> to vector<1x1xf32>
    %cst_157 = arith.constant 3.200000e+01 : f32
    %371 = vector.broadcast %cst_157 : f32 to vector<1x1xf32>
    %372 = arith.divf %370, %371 : vector<1x1xf32>
    %373 = vector.broadcast %365 : vector<1x1xf32> to vector<1x32xf32>
    %374 = arith.subf %361, %373 : vector<1x32xf32>
    %cst_158 = arith.constant 9.99999974E-6 : f32
    %375 = vector.broadcast %cst_158 : f32 to vector<1x1xf32>
    %376 = arith.addf %372, %375 : vector<1x1xf32>
    %377 = math.rsqrt %376 : vector<1x1xf32>
    %378 = vector.broadcast %377 : vector<1x1xf32> to vector<1x32xf32>
    %379 = arith.mulf %374, %378 : vector<1x32xf32>
    %380 = arith.mulf %379, %38 : vector<1x32xf32>
    %381 = arith.addf %380, %39 : vector<1x32xf32>
    %cst_159 = arith.constant dense<0.000000e+00> : vector<1x64xf32>
    %382 = tpu.matmul %381, %14, %cst_159 {dimension_numbers = #tpu.dot_dimension_numbers<[1], [0], [0], [1], [0, 0, 1, 1], [], []>} : vector<1x32xf32>, vector<32x64xf32>, vector<1x64xf32> -> vector<1x64xf32>
    %383 = arith.addf %382, %40 : vector<1x64xf32>
    %cst_160 = arith.constant dense<0xFF800000> : vector<1xf32>
    %384 = vector.multi_reduction <maximumf>, %383, %cst_160 [1] : vector<1x64xf32> to vector<1xf32>
    %385 = vector.shape_cast %384 : vector<1xf32> to vector<1x1xf32>
    %386 = vector.broadcast %385 : vector<1x1xf32> to vector<1x64xf32>
    %387 = arith.cmpf oge, %383, %386 : vector<1x64xf32>
    %cst_161 = arith.constant 6.400000e+01 : f32
    %388 = vector.broadcast %cst_161 : f32 to vector<1x64xf32>
    %389 = arith.select %387, %220, %388 : vector<1x64xi1>, vector<1x64xf32>
    %cst_162 = arith.constant dense<0x7F800000> : vector<1xf32>
    %390 = vector.multi_reduction <minimumf>, %389, %cst_162 [1] : vector<1x64xf32> to vector<1xf32>
    %391 = vector.shape_cast %390 : vector<1xf32> to vector<1x1xf32>
    %392 = arith.fptosi %391 : vector<1x1xf32> to vector<1x1xi32>
    %c1_i32_163 = arith.constant 1 : i32
    %393 = vector.broadcast %c1_i32_163 : i32 to vector<1x1xi32>
    %394 = arith.select %224, %393, %392 : vector<1x1xi1>, vector<1x1xi32>
    %c2_i32 = arith.constant 2 : i32
    %395 = vector.broadcast %c2_i32 : i32 to vector<1x1xi32>
    %396 = arith.cmpi eq, %394, %395 : vector<1x1xi32>
    %397 = arith.ori %224, %396 : vector<1x1xi1>
    %398 = vector.broadcast %394 : vector<1x1xi32> to vector<1x64xi32>
    %399 = arith.cmpi eq, %219, %398 : vector<1x64xi32>
    %400 = arith.extui %399 : vector<1x64xi1> to vector<1x64xi32>
    %401 = arith.sitofp %400 : vector<1x64xi32> to vector<1x64xf32>
    %cst_164 = arith.constant dense<0.000000e+00> : vector<1x32xf32>
    %402 = tpu.matmul %401, %0, %cst_164 {dimension_numbers = #tpu.dot_dimension_numbers<[1], [0], [0], [1], [0, 0, 1, 1], [], []>} : vector<1x64xf32>, vector<64x32xf32>, vector<1x32xf32> -> vector<1x32xf32>
    %403 = arith.addf %402, %216 : vector<1x32xf32>
    %cst_165 = arith.constant dense<0.000000e+00> : vector<1xf32>
    %404 = vector.multi_reduction <add>, %403, %cst_165 [1] : vector<1x32xf32> to vector<1xf32>
    %405 = vector.shape_cast %404 : vector<1xf32> to vector<1x1xf32>
    %cst_166 = arith.constant 3.200000e+01 : f32
    %406 = vector.broadcast %cst_166 : f32 to vector<1x1xf32>
    %407 = arith.divf %405, %406 : vector<1x1xf32>
    %408 = vector.broadcast %407 : vector<1x1xf32> to vector<1x32xf32>
    %409 = arith.subf %403, %408 : vector<1x32xf32>
    %410 = arith.mulf %409, %409 : vector<1x32xf32>
    %cst_167 = arith.constant dense<0.000000e+00> : vector<1xf32>
    %411 = vector.multi_reduction <add>, %410, %cst_167 [1] : vector<1x32xf32> to vector<1xf32>
    %412 = vector.shape_cast %411 : vector<1xf32> to vector<1x1xf32>
    %cst_168 = arith.constant 3.200000e+01 : f32
    %413 = vector.broadcast %cst_168 : f32 to vector<1x1xf32>
    %414 = arith.divf %412, %413 : vector<1x1xf32>
    %415 = vector.broadcast %407 : vector<1x1xf32> to vector<1x32xf32>
    %416 = arith.subf %403, %415 : vector<1x32xf32>
    %cst_169 = arith.constant 9.99999974E-6 : f32
    %417 = vector.broadcast %cst_169 : f32 to vector<1x1xf32>
    %418 = arith.addf %414, %417 : vector<1x1xf32>
    %419 = math.rsqrt %418 : vector<1x1xf32>
    %420 = vector.broadcast %419 : vector<1x1xf32> to vector<1x32xf32>
    %421 = arith.mulf %416, %420 : vector<1x32xf32>
    %422 = arith.mulf %421, %25 : vector<1x32xf32>
    %423 = arith.addf %422, %26 : vector<1x32xf32>
    %cst_170 = arith.constant dense<0.000000e+00> : vector<1x96xf32>
    %424 = tpu.matmul %423, %7, %cst_170 {dimension_numbers = #tpu.dot_dimension_numbers<[1], [0], [0], [1], [0, 0, 1, 1], [], []>} : vector<1x32xf32>, vector<32x96xf32>, vector<1x96xf32> -> vector<1x96xf32>
    %425 = arith.addf %424, %27 : vector<1x96xf32>
    %426 = vector.extract_strided_slice %425 {offsets = [0, 32], sizes = [1, 16], strides = [1, 1]} : vector<1x96xf32> to vector<1x16xf32>
    %427 = vector.extract_strided_slice %425 {offsets = [0, 64], sizes = [1, 16], strides = [1, 1]} : vector<1x96xf32> to vector<1x16xf32>
    %c1_171 = arith.constant 1 : index
    %c0_172 = arith.constant 0 : index
    %428 = vector.load %arg21[%c1_171, %c0_172] : memref<16x16xf32, #tpu.memory_space<vmem>>, vector<1x16xf32>
    tpu.vector_store %arg21[%c1_171, %c0_172], %426 {strides = array<i32>} : memref<16x16xf32, #tpu.memory_space<vmem>>, vector<1x16xf32>,
    %c1_173 = arith.constant 1 : index
    %c0_174 = arith.constant 0 : index
    %429 = vector.load %arg22[%c1_173, %c0_174] : memref<16x16xf32, #tpu.memory_space<vmem>>, vector<1x16xf32>
    tpu.vector_store %arg22[%c1_173, %c0_174], %427 {strides = array<i32>} : memref<16x16xf32, #tpu.memory_space<vmem>>, vector<1x16xf32>,
    %430 = vector.extract_strided_slice %425 {offsets = [0, 0], sizes = [1, 16], strides = [1, 1]} : vector<1x96xf32> to vector<1x16xf32>
    %c0_175 = arith.constant 0 : index
    %c0_176 = arith.constant 0 : index
    %431 = vector.load %arg21[%c0_175, %c0_176] : memref<16x16xf32, #tpu.memory_space<vmem>>, vector<2x16xf32>
    %cst_177 = arith.constant dense<0.000000e+00> : vector<1x2xf32>
    %432 = tpu.matmul %430, %431, %cst_177 {dimension_numbers = #tpu.dot_dimension_numbers<[1], [1], [0], [0], [0, 0, 1, 0], [], []>} : vector<1x16xf32>, vector<2x16xf32>, vector<1x2xf32> -> vector<1x2xf32>
    %cst_178 = arith.constant 2.500000e-01 : f32
    %433 = vector.broadcast %cst_178 : f32 to vector<1x2xf32>
    %434 = arith.mulf %432, %433 : vector<1x2xf32>
    %cst_179 = arith.constant dense<0xFF800000> : vector<1xf32>
    %435 = vector.multi_reduction <maximumf>, %434, %cst_179 [1] : vector<1x2xf32> to vector<1xf32>
    %436 = vector.shape_cast %435 : vector<1xf32> to vector<1x1xf32>
    %437 = vector.broadcast %436 : vector<1x1xf32> to vector<1x2xf32>
    %438 = arith.subf %434, %437 : vector<1x2xf32>
    %439 = math.exp %438 : vector<1x2xf32>
    %cst_180 = arith.constant dense<0.000000e+00> : vector<1xf32>
    %440 = vector.multi_reduction <add>, %439, %cst_180 [1] : vector<1x2xf32> to vector<1xf32>
    %441 = vector.shape_cast %440 : vector<1xf32> to vector<1x1xf32>
    %442 = vector.broadcast %441 : vector<1x1xf32> to vector<1x2xf32>
    %443 = arith.divf %439, %442 : vector<1x2xf32>
    %c0_181 = arith.constant 0 : index
    %c0_182 = arith.constant 0 : index
    %444 = vector.load %arg22[%c0_181, %c0_182] : memref<16x16xf32, #tpu.memory_space<vmem>>, vector<2x16xf32>
    %cst_183 = arith.constant dense<0.000000e+00> : vector<1x16xf32>
    %445 = tpu.matmul %443, %444, %cst_183 {dimension_numbers = #tpu.dot_dimension_numbers<[1], [0], [0], [1], [0, 0, 1, 1], [], []>} : vector<1x2xf32>, vector<2x16xf32>, vector<1x16xf32> -> vector<1x16xf32>
    %446 = vector.extract_strided_slice %425 {offsets = [0, 48], sizes = [1, 16], strides = [1, 1]} : vector<1x96xf32> to vector<1x16xf32>
    %447 = vector.extract_strided_slice %425 {offsets = [0, 80], sizes = [1, 16], strides = [1, 1]} : vector<1x96xf32> to vector<1x16xf32>
    %c9_184 = arith.constant 9 : index
    %c0_185 = arith.constant 0 : index
    %448 = vector.load %arg21[%c9_184, %c0_185] : memref<16x16xf32, #tpu.memory_space<vmem>>, vector<1x16xf32>
    tpu.vector_store %arg21[%c9_184, %c0_185], %446 {strides = array<i32>} : memref<16x16xf32, #tpu.memory_space<vmem>>, vector<1x16xf32>,
    %c9_186 = arith.constant 9 : index
    %c0_187 = arith.constant 0 : index
    %449 = vector.load %arg22[%c9_186, %c0_187] : memref<16x16xf32, #tpu.memory_space<vmem>>, vector<1x16xf32>
    tpu.vector_store %arg22[%c9_186, %c0_187], %447 {strides = array<i32>} : memref<16x16xf32, #tpu.memory_space<vmem>>, vector<1x16xf32>,
    %450 = vector.extract_strided_slice %425 {offsets = [0, 16], sizes = [1, 16], strides = [1, 1]} : vector<1x96xf32> to vector<1x16xf32>
    %c8_188 = arith.constant 8 : index
    %c0_189 = arith.constant 0 : index
    %451 = vector.load %arg21[%c8_188, %c0_189] : memref<16x16xf32, #tpu.memory_space<vmem>>, vector<2x16xf32>
    %cst_190 = arith.constant dense<0.000000e+00> : vector<1x2xf32>
    %452 = tpu.matmul %450, %451, %cst_190 {dimension_numbers = #tpu.dot_dimension_numbers<[1], [1], [0], [0], [0, 0, 1, 0], [], []>} : vector<1x16xf32>, vector<2x16xf32>, vector<1x2xf32> -> vector<1x2xf32>
    %cst_191 = arith.constant 2.500000e-01 : f32
    %453 = vector.broadcast %cst_191 : f32 to vector<1x2xf32>
    %454 = arith.mulf %452, %453 : vector<1x2xf32>
    %cst_192 = arith.constant dense<0xFF800000> : vector<1xf32>
    %455 = vector.multi_reduction <maximumf>, %454, %cst_192 [1] : vector<1x2xf32> to vector<1xf32>
    %456 = vector.shape_cast %455 : vector<1xf32> to vector<1x1xf32>
    %457 = vector.broadcast %456 : vector<1x1xf32> to vector<1x2xf32>
    %458 = arith.subf %454, %457 : vector<1x2xf32>
    %459 = math.exp %458 : vector<1x2xf32>
    %cst_193 = arith.constant dense<0.000000e+00> : vector<1xf32>
    %460 = vector.multi_reduction <add>, %459, %cst_193 [1] : vector<1x2xf32> to vector<1xf32>
    %461 = vector.shape_cast %460 : vector<1xf32> to vector<1x1xf32>
    %462 = vector.broadcast %461 : vector<1x1xf32> to vector<1x2xf32>
    %463 = arith.divf %459, %462 : vector<1x2xf32>
    %c8_194 = arith.constant 8 : index
    %c0_195 = arith.constant 0 : index
    %464 = vector.load %arg22[%c8_194, %c0_195] : memref<16x16xf32, #tpu.memory_space<vmem>>, vector<2x16xf32>
    %cst_196 = arith.constant dense<0.000000e+00> : vector<1x16xf32>
    %465 = tpu.matmul %463, %464, %cst_196 {dimension_numbers = #tpu.dot_dimension_numbers<[1], [0], [0], [1], [0, 0, 1, 1], [], []>} : vector<1x2xf32>, vector<2x16xf32>, vector<1x16xf32> -> vector<1x16xf32>
    %466 = tpu.concatenate %445, %465 in 1 : vector<1x16xf32>, vector<1x16xf32> -> vector<1x32xf32>
    %cst_197 = arith.constant dense<0.000000e+00> : vector<1x32xf32>
    %467 = tpu.matmul %466, %8, %cst_197 {dimension_numbers = #tpu.dot_dimension_numbers<[1], [0], [0], [1], [0, 0, 1, 1], [], []>} : vector<1x32xf32>, vector<32x32xf32>, vector<1x32xf32> -> vector<1x32xf32>
    %468 = arith.addf %423, %467 : vector<1x32xf32>
    %469 = arith.addf %468, %28 : vector<1x32xf32>
    %cst_198 = arith.constant dense<0.000000e+00> : vector<1xf32>
    %470 = vector.multi_reduction <add>, %469, %cst_198 [1] : vector<1x32xf32> to vector<1xf32>
    %471 = vector.shape_cast %470 : vector<1xf32> to vector<1x1xf32>
    %cst_199 = arith.constant 3.200000e+01 : f32
    %472 = vector.broadcast %cst_199 : f32 to vector<1x1xf32>
    %473 = arith.divf %471, %472 : vector<1x1xf32>
    %474 = vector.broadcast %473 : vector<1x1xf32> to vector<1x32xf32>
    %475 = arith.subf %469, %474 : vector<1x32xf32>
    %476 = arith.mulf %475, %475 : vector<1x32xf32>
    %cst_200 = arith.constant dense<0.000000e+00> : vector<1xf32>
    %477 = vector.multi_reduction <add>, %476, %cst_200 [1] : vector<1x32xf32> to vector<1xf32>
    %478 = vector.shape_cast %477 : vector<1xf32> to vector<1x1xf32>
    %cst_201 = arith.constant 3.200000e+01 : f32
    %479 = vector.broadcast %cst_201 : f32 to vector<1x1xf32>
    %480 = arith.divf %478, %479 : vector<1x1xf32>
    %481 = vector.broadcast %473 : vector<1x1xf32> to vector<1x32xf32>
    %482 = arith.subf %469, %481 : vector<1x32xf32>
    %cst_202 = arith.constant 9.99999974E-6 : f32
    %483 = vector.broadcast %cst_202 : f32 to vector<1x1xf32>
    %484 = arith.addf %480, %483 : vector<1x1xf32>
    %485 = math.rsqrt %484 : vector<1x1xf32>
    %486 = vector.broadcast %485 : vector<1x1xf32> to vector<1x32xf32>
    %487 = arith.mulf %482, %486 : vector<1x32xf32>
    %488 = arith.mulf %487, %29 : vector<1x32xf32>
    %489 = arith.addf %488, %30 : vector<1x32xf32>
    %cst_203 = arith.constant dense<0.000000e+00> : vector<1x32xf32>
    %490 = tpu.matmul %489, %9, %cst_203 {dimension_numbers = #tpu.dot_dimension_numbers<[1], [0], [0], [1], [0, 0, 1, 1], [], []>} : vector<1x32xf32>, vector<32x32xf32>, vector<1x32xf32> -> vector<1x32xf32>
    %491 = arith.addf %490, %31 : vector<1x32xf32>
    %492 = vector.extract_strided_slice %491 {offsets = [0, 0], sizes = [1, 16], strides = [1, 1]} : vector<1x32xf32> to vector<1x16xf32>
    %493 = vector.extract_strided_slice %214 {offsets = [0, 0], sizes = [8, 16], strides = [1, 1]} : vector<8x64xf32> to vector<8x16xf32>
    %cst_204 = arith.constant dense<0.000000e+00> : vector<1x8xf32>
    %494 = tpu.matmul %492, %493, %cst_204 {dimension_numbers = #tpu.dot_dimension_numbers<[1], [1], [0], [0], [0, 0, 1, 0], [], []>} : vector<1x16xf32>, vector<8x16xf32>, vector<1x8xf32> -> vector<1x8xf32>
    %cst_205 = arith.constant 2.500000e-01 : f32
    %495 = vector.broadcast %cst_205 : f32 to vector<1x8xf32>
    %496 = arith.mulf %494, %495 : vector<1x8xf32>
    %497 = arith.addf %496, %47 : vector<1x8xf32>
    %cst_206 = arith.constant dense<0xFF800000> : vector<1xf32>
    %498 = vector.multi_reduction <maximumf>, %497, %cst_206 [1] : vector<1x8xf32> to vector<1xf32>
    %499 = vector.shape_cast %498 : vector<1xf32> to vector<1x1xf32>
    %500 = vector.broadcast %499 : vector<1x1xf32> to vector<1x8xf32>
    %501 = arith.subf %497, %500 : vector<1x8xf32>
    %502 = math.exp %501 : vector<1x8xf32>
    %cst_207 = arith.constant dense<0.000000e+00> : vector<1xf32>
    %503 = vector.multi_reduction <add>, %502, %cst_207 [1] : vector<1x8xf32> to vector<1xf32>
    %504 = vector.shape_cast %503 : vector<1xf32> to vector<1x1xf32>
    %505 = vector.broadcast %504 : vector<1x1xf32> to vector<1x8xf32>
    %506 = arith.divf %502, %505 : vector<1x8xf32>
    %507 = vector.extract_strided_slice %214 {offsets = [0, 32], sizes = [8, 16], strides = [1, 1]} : vector<8x64xf32> to vector<8x16xf32>
    %cst_208 = arith.constant dense<0.000000e+00> : vector<1x16xf32>
    %508 = tpu.matmul %506, %507, %cst_208 {dimension_numbers = #tpu.dot_dimension_numbers<[1], [0], [0], [1], [0, 0, 1, 1], [], []>} : vector<1x8xf32>, vector<8x16xf32>, vector<1x16xf32> -> vector<1x16xf32>
    %509 = vector.extract_strided_slice %491 {offsets = [0, 16], sizes = [1, 16], strides = [1, 1]} : vector<1x32xf32> to vector<1x16xf32>
    %510 = vector.extract_strided_slice %214 {offsets = [0, 16], sizes = [8, 16], strides = [1, 1]} : vector<8x64xf32> to vector<8x16xf32>
    %cst_209 = arith.constant dense<0.000000e+00> : vector<1x8xf32>
    %511 = tpu.matmul %509, %510, %cst_209 {dimension_numbers = #tpu.dot_dimension_numbers<[1], [1], [0], [0], [0, 0, 1, 0], [], []>} : vector<1x16xf32>, vector<8x16xf32>, vector<1x8xf32> -> vector<1x8xf32>
    %cst_210 = arith.constant 2.500000e-01 : f32
    %512 = vector.broadcast %cst_210 : f32 to vector<1x8xf32>
    %513 = arith.mulf %511, %512 : vector<1x8xf32>
    %514 = arith.addf %513, %47 : vector<1x8xf32>
    %cst_211 = arith.constant dense<0xFF800000> : vector<1xf32>
    %515 = vector.multi_reduction <maximumf>, %514, %cst_211 [1] : vector<1x8xf32> to vector<1xf32>
    %516 = vector.shape_cast %515 : vector<1xf32> to vector<1x1xf32>
    %517 = vector.broadcast %516 : vector<1x1xf32> to vector<1x8xf32>
    %518 = arith.subf %514, %517 : vector<1x8xf32>
    %519 = math.exp %518 : vector<1x8xf32>
    %cst_212 = arith.constant dense<0.000000e+00> : vector<1xf32>
    %520 = vector.multi_reduction <add>, %519, %cst_212 [1] : vector<1x8xf32> to vector<1xf32>
    %521 = vector.shape_cast %520 : vector<1xf32> to vector<1x1xf32>
    %522 = vector.broadcast %521 : vector<1x1xf32> to vector<1x8xf32>
    %523 = arith.divf %519, %522 : vector<1x8xf32>
    %524 = vector.extract_strided_slice %214 {offsets = [0, 48], sizes = [8, 16], strides = [1, 1]} : vector<8x64xf32> to vector<8x16xf32>
    %cst_213 = arith.constant dense<0.000000e+00> : vector<1x16xf32>
    %525 = tpu.matmul %523, %524, %cst_213 {dimension_numbers = #tpu.dot_dimension_numbers<[1], [0], [0], [1], [0, 0, 1, 1], [], []>} : vector<1x8xf32>, vector<8x16xf32>, vector<1x16xf32> -> vector<1x16xf32>
    %526 = tpu.concatenate %508, %525 in 1 : vector<1x16xf32>, vector<1x16xf32> -> vector<1x32xf32>
    %cst_214 = arith.constant dense<0.000000e+00> : vector<1x32xf32>
    %527 = tpu.matmul %526, %11, %cst_214 {dimension_numbers = #tpu.dot_dimension_numbers<[1], [0], [0], [1], [0, 0, 1, 1], [], []>} : vector<1x32xf32>, vector<32x32xf32>, vector<1x32xf32> -> vector<1x32xf32>
    %528 = arith.addf %489, %527 : vector<1x32xf32>
    %529 = arith.addf %528, %33 : vector<1x32xf32>
    %cst_215 = arith.constant dense<0.000000e+00> : vector<1xf32>
    %530 = vector.multi_reduction <add>, %529, %cst_215 [1] : vector<1x32xf32> to vector<1xf32>
    %531 = vector.shape_cast %530 : vector<1xf32> to vector<1x1xf32>
    %cst_216 = arith.constant 3.200000e+01 : f32
    %532 = vector.broadcast %cst_216 : f32 to vector<1x1xf32>
    %533 = arith.divf %531, %532 : vector<1x1xf32>
    %534 = vector.broadcast %533 : vector<1x1xf32> to vector<1x32xf32>
    %535 = arith.subf %529, %534 : vector<1x32xf32>
    %536 = arith.mulf %535, %535 : vector<1x32xf32>
    %cst_217 = arith.constant dense<0.000000e+00> : vector<1xf32>
    %537 = vector.multi_reduction <add>, %536, %cst_217 [1] : vector<1x32xf32> to vector<1xf32>
    %538 = vector.shape_cast %537 : vector<1xf32> to vector<1x1xf32>
    %cst_218 = arith.constant 3.200000e+01 : f32
    %539 = vector.broadcast %cst_218 : f32 to vector<1x1xf32>
    %540 = arith.divf %538, %539 : vector<1x1xf32>
    %541 = vector.broadcast %533 : vector<1x1xf32> to vector<1x32xf32>
    %542 = arith.subf %529, %541 : vector<1x32xf32>
    %cst_219 = arith.constant 9.99999974E-6 : f32
    %543 = vector.broadcast %cst_219 : f32 to vector<1x1xf32>
    %544 = arith.addf %540, %543 : vector<1x1xf32>
    %545 = math.rsqrt %544 : vector<1x1xf32>
    %546 = vector.broadcast %545 : vector<1x1xf32> to vector<1x32xf32>
    %547 = arith.mulf %542, %546 : vector<1x32xf32>
    %548 = arith.mulf %547, %34 : vector<1x32xf32>
    %549 = arith.addf %548, %35 : vector<1x32xf32>
    %cst_220 = arith.constant dense<0.000000e+00> : vector<1x64xf32>
    %550 = tpu.matmul %549, %12, %cst_220 {dimension_numbers = #tpu.dot_dimension_numbers<[1], [0], [0], [1], [0, 0, 1, 1], [], []>} : vector<1x32xf32>, vector<32x64xf32>, vector<1x64xf32> -> vector<1x64xf32>
    %551 = arith.addf %550, %36 : vector<1x64xf32>
    %552 = arith.mulf %551, %551 : vector<1x64xf32>
    %553 = arith.mulf %551, %552 : vector<1x64xf32>
    %cst_221 = arith.constant 4.471500e-02 : f32
    %554 = vector.broadcast %cst_221 : f32 to vector<1x64xf32>
    %555 = arith.mulf %554, %553 : vector<1x64xf32>
    %556 = arith.addf %551, %555 : vector<1x64xf32>
    %cst_222 = arith.constant 0.797884583 : f32
    %557 = vector.broadcast %cst_222 : f32 to vector<1x64xf32>
    %558 = arith.mulf %557, %556 : vector<1x64xf32>
    %559 = math.tanh %558 : vector<1x64xf32>
    %cst_223 = arith.constant 1.000000e+00 : f32
    %560 = vector.broadcast %cst_223 : f32 to vector<1x64xf32>
    %561 = arith.addf %560, %559 : vector<1x64xf32>
    %cst_224 = arith.constant 5.000000e-01 : f32
    %562 = vector.broadcast %cst_224 : f32 to vector<1x64xf32>
    %563 = arith.mulf %562, %561 : vector<1x64xf32>
    %564 = arith.mulf %551, %563 : vector<1x64xf32>
    %cst_225 = arith.constant dense<0.000000e+00> : vector<1x32xf32>
    %565 = tpu.matmul %564, %13, %cst_225 {dimension_numbers = #tpu.dot_dimension_numbers<[1], [0], [0], [1], [0, 0, 1, 1], [], []>} : vector<1x64xf32>, vector<64x32xf32>, vector<1x32xf32> -> vector<1x32xf32>
    %566 = arith.addf %549, %565 : vector<1x32xf32>
    %567 = arith.addf %566, %37 : vector<1x32xf32>
    %cst_226 = arith.constant dense<0.000000e+00> : vector<1xf32>
    %568 = vector.multi_reduction <add>, %567, %cst_226 [1] : vector<1x32xf32> to vector<1xf32>
    %569 = vector.shape_cast %568 : vector<1xf32> to vector<1x1xf32>
    %cst_227 = arith.constant 3.200000e+01 : f32
    %570 = vector.broadcast %cst_227 : f32 to vector<1x1xf32>
    %571 = arith.divf %569, %570 : vector<1x1xf32>
    %572 = vector.broadcast %571 : vector<1x1xf32> to vector<1x32xf32>
    %573 = arith.subf %567, %572 : vector<1x32xf32>
    %574 = arith.mulf %573, %573 : vector<1x32xf32>
    %cst_228 = arith.constant dense<0.000000e+00> : vector<1xf32>
    %575 = vector.multi_reduction <add>, %574, %cst_228 [1] : vector<1x32xf32> to vector<1xf32>
    %576 = vector.shape_cast %575 : vector<1xf32> to vector<1x1xf32>
    %cst_229 = arith.constant 3.200000e+01 : f32
    %577 = vector.broadcast %cst_229 : f32 to vector<1x1xf32>
    %578 = arith.divf %576, %577 : vector<1x1xf32>
    %579 = vector.broadcast %571 : vector<1x1xf32> to vector<1x32xf32>
    %580 = arith.subf %567, %579 : vector<1x32xf32>
    %cst_230 = arith.constant 9.99999974E-6 : f32
    %581 = vector.broadcast %cst_230 : f32 to vector<1x1xf32>
    %582 = arith.addf %578, %581 : vector<1x1xf32>
    %583 = math.rsqrt %582 : vector<1x1xf32>
    %584 = vector.broadcast %583 : vector<1x1xf32> to vector<1x32xf32>
    %585 = arith.mulf %580, %584 : vector<1x32xf32>
    %586 = arith.mulf %585, %38 : vector<1x32xf32>
    %587 = arith.addf %586, %39 : vector<1x32xf32>
    %cst_231 = arith.constant dense<0.000000e+00> : vector<1x64xf32>
    %588 = tpu.matmul %587, %14, %cst_231 {dimension_numbers = #tpu.dot_dimension_numbers<[1], [0], [0], [1], [0, 0, 1, 1], [], []>} : vector<1x32xf32>, vector<32x64xf32>, vector<1x64xf32> -> vector<1x64xf32>
    %589 = arith.addf %588, %40 : vector<1x64xf32>
    %cst_232 = arith.constant dense<0xFF800000> : vector<1xf32>
    %590 = vector.multi_reduction <maximumf>, %589, %cst_232 [1] : vector<1x64xf32> to vector<1xf32>
    %591 = vector.shape_cast %590 : vector<1xf32> to vector<1x1xf32>
    %592 = vector.broadcast %591 : vector<1x1xf32> to vector<1x64xf32>
    %593 = arith.cmpf oge, %589, %592 : vector<1x64xf32>
    %cst_233 = arith.constant 6.400000e+01 : f32
    %594 = vector.broadcast %cst_233 : f32 to vector<1x64xf32>
    %595 = arith.select %593, %220, %594 : vector<1x64xi1>, vector<1x64xf32>
    %cst_234 = arith.constant dense<0x7F800000> : vector<1xf32>
    %596 = vector.multi_reduction <minimumf>, %595, %cst_234 [1] : vector<1x64xf32> to vector<1xf32>
    %597 = vector.shape_cast %596 : vector<1xf32> to vector<1x1xf32>
    %598 = arith.fptosi %597 : vector<1x1xf32> to vector<1x1xi32>
    %c1_i32_235 = arith.constant 1 : i32
    %599 = vector.broadcast %c1_i32_235 : i32 to vector<1x1xi32>
    %600 = arith.select %397, %599, %598 : vector<1x1xi1>, vector<1x1xi32>
    %c2_i32_236 = arith.constant 2 : i32
    %601 = vector.broadcast %c2_i32_236 : i32 to vector<1x1xi32>
    %602 = arith.cmpi eq, %600, %601 : vector<1x1xi32>
    %603 = arith.ori %397, %602 : vector<1x1xi1>
    %604 = vector.broadcast %600 : vector<1x1xi32> to vector<1x64xi32>
    %605 = arith.cmpi eq, %219, %604 : vector<1x64xi32>
    %606 = arith.extui %605 : vector<1x64xi1> to vector<1x64xi32>
    %607 = arith.sitofp %606 : vector<1x64xi32> to vector<1x64xf32>
    %cst_237 = arith.constant dense<0.000000e+00> : vector<1x32xf32>
    %608 = tpu.matmul %607, %0, %cst_237 {dimension_numbers = #tpu.dot_dimension_numbers<[1], [0], [0], [1], [0, 0, 1, 1], [], []>} : vector<1x64xf32>, vector<64x32xf32>, vector<1x32xf32> -> vector<1x32xf32>
    %609 = arith.addf %608, %217 : vector<1x32xf32>
    %cst_238 = arith.constant dense<0.000000e+00> : vector<1xf32>
    %610 = vector.multi_reduction <add>, %609, %cst_238 [1] : vector<1x32xf32> to vector<1xf32>
    %611 = vector.shape_cast %610 : vector<1xf32> to vector<1x1xf32>
    %cst_239 = arith.constant 3.200000e+01 : f32
    %612 = vector.broadcast %cst_239 : f32 to vector<1x1xf32>
    %613 = arith.divf %611, %612 : vector<1x1xf32>
    %614 = vector.broadcast %613 : vector<1x1xf32> to vector<1x32xf32>
    %615 = arith.subf %609, %614 : vector<1x32xf32>
    %616 = arith.mulf %615, %615 : vector<1x32xf32>
    %cst_240 = arith.constant dense<0.000000e+00> : vector<1xf32>
    %617 = vector.multi_reduction <add>, %616, %cst_240 [1] : vector<1x32xf32> to vector<1xf32>
    %618 = vector.shape_cast %617 : vector<1xf32> to vector<1x1xf32>
    %cst_241 = arith.constant 3.200000e+01 : f32
    %619 = vector.broadcast %cst_241 : f32 to vector<1x1xf32>
    %620 = arith.divf %618, %619 : vector<1x1xf32>
    %621 = vector.broadcast %613 : vector<1x1xf32> to vector<1x32xf32>
    %622 = arith.subf %609, %621 : vector<1x32xf32>
    %cst_242 = arith.constant 9.99999974E-6 : f32
    %623 = vector.broadcast %cst_242 : f32 to vector<1x1xf32>
    %624 = arith.addf %620, %623 : vector<1x1xf32>
    %625 = math.rsqrt %624 : vector<1x1xf32>
    %626 = vector.broadcast %625 : vector<1x1xf32> to vector<1x32xf32>
    %627 = arith.mulf %622, %626 : vector<1x32xf32>
    %628 = arith.mulf %627, %25 : vector<1x32xf32>
    %629 = arith.addf %628, %26 : vector<1x32xf32>
    %cst_243 = arith.constant dense<0.000000e+00> : vector<1x96xf32>
    %630 = tpu.matmul %629, %7, %cst_243 {dimension_numbers = #tpu.dot_dimension_numbers<[1], [0], [0], [1], [0, 0, 1, 1], [], []>} : vector<1x32xf32>, vector<32x96xf32>, vector<1x96xf32> -> vector<1x96xf32>
    %631 = arith.addf %630, %27 : vector<1x96xf32>
    %632 = vector.extract_strided_slice %631 {offsets = [0, 32], sizes = [1, 16], strides = [1, 1]} : vector<1x96xf32> to vector<1x16xf32>
    %633 = vector.extract_strided_slice %631 {offsets = [0, 64], sizes = [1, 16], strides = [1, 1]} : vector<1x96xf32> to vector<1x16xf32>
    %c2_244 = arith.constant 2 : index
    %c0_245 = arith.constant 0 : index
    %634 = vector.load %arg21[%c2_244, %c0_245] : memref<16x16xf32, #tpu.memory_space<vmem>>, vector<1x16xf32>
    tpu.vector_store %arg21[%c2_244, %c0_245], %632 {strides = array<i32>} : memref<16x16xf32, #tpu.memory_space<vmem>>, vector<1x16xf32>,
    %c2_246 = arith.constant 2 : index
    %c0_247 = arith.constant 0 : index
    %635 = vector.load %arg22[%c2_246, %c0_247] : memref<16x16xf32, #tpu.memory_space<vmem>>, vector<1x16xf32>
    tpu.vector_store %arg22[%c2_246, %c0_247], %633 {strides = array<i32>} : memref<16x16xf32, #tpu.memory_space<vmem>>, vector<1x16xf32>,
    %636 = vector.extract_strided_slice %631 {offsets = [0, 0], sizes = [1, 16], strides = [1, 1]} : vector<1x96xf32> to vector<1x16xf32>
    %c0_248 = arith.constant 0 : index
    %c0_249 = arith.constant 0 : index
    %637 = vector.load %arg21[%c0_248, %c0_249] : memref<16x16xf32, #tpu.memory_space<vmem>>, vector<3x16xf32>
    %cst_250 = arith.constant dense<0.000000e+00> : vector<1x3xf32>
    %638 = tpu.matmul %636, %637, %cst_250 {dimension_numbers = #tpu.dot_dimension_numbers<[1], [1], [0], [0], [0, 0, 1, 0], [], []>} : vector<1x16xf32>, vector<3x16xf32>, vector<1x3xf32> -> vector<1x3xf32>
    %cst_251 = arith.constant 2.500000e-01 : f32
    %639 = vector.broadcast %cst_251 : f32 to vector<1x3xf32>
    %640 = arith.mulf %638, %639 : vector<1x3xf32>
    %cst_252 = arith.constant dense<0xFF800000> : vector<1xf32>
    %641 = vector.multi_reduction <maximumf>, %640, %cst_252 [1] : vector<1x3xf32> to vector<1xf32>
    %642 = vector.shape_cast %641 : vector<1xf32> to vector<1x1xf32>
    %643 = vector.broadcast %642 : vector<1x1xf32> to vector<1x3xf32>
    %644 = arith.subf %640, %643 : vector<1x3xf32>
    %645 = math.exp %644 : vector<1x3xf32>
    %cst_253 = arith.constant dense<0.000000e+00> : vector<1xf32>
    %646 = vector.multi_reduction <add>, %645, %cst_253 [1] : vector<1x3xf32> to vector<1xf32>
    %647 = vector.shape_cast %646 : vector<1xf32> to vector<1x1xf32>
    %648 = vector.broadcast %647 : vector<1x1xf32> to vector<1x3xf32>
    %649 = arith.divf %645, %648 : vector<1x3xf32>
    %c0_254 = arith.constant 0 : index
    %c0_255 = arith.constant 0 : index
    %650 = vector.load %arg22[%c0_254, %c0_255] : memref<16x16xf32, #tpu.memory_space<vmem>>, vector<3x16xf32>
    %cst_256 = arith.constant dense<0.000000e+00> : vector<1x16xf32>
    %651 = tpu.matmul %649, %650, %cst_256 {dimension_numbers = #tpu.dot_dimension_numbers<[1], [0], [0], [1], [0, 0, 1, 1], [], []>} : vector<1x3xf32>, vector<3x16xf32>, vector<1x16xf32> -> vector<1x16xf32>
    %652 = vector.extract_strided_slice %631 {offsets = [0, 48], sizes = [1, 16], strides = [1, 1]} : vector<1x96xf32> to vector<1x16xf32>
    %653 = vector.extract_strided_slice %631 {offsets = [0, 80], sizes = [1, 16], strides = [1, 1]} : vector<1x96xf32> to vector<1x16xf32>
    %c10_257 = arith.constant 10 : index
    %c0_258 = arith.constant 0 : index
    %654 = vector.load %arg21[%c10_257, %c0_258] : memref<16x16xf32, #tpu.memory_space<vmem>>, vector<1x16xf32>
    tpu.vector_store %arg21[%c10_257, %c0_258], %652 {strides = array<i32>} : memref<16x16xf32, #tpu.memory_space<vmem>>, vector<1x16xf32>,
    %c10_259 = arith.constant 10 : index
    %c0_260 = arith.constant 0 : index
    %655 = vector.load %arg22[%c10_259, %c0_260] : memref<16x16xf32, #tpu.memory_space<vmem>>, vector<1x16xf32>
    tpu.vector_store %arg22[%c10_259, %c0_260], %653 {strides = array<i32>} : memref<16x16xf32, #tpu.memory_space<vmem>>, vector<1x16xf32>,
    %656 = vector.extract_strided_slice %631 {offsets = [0, 16], sizes = [1, 16], strides = [1, 1]} : vector<1x96xf32> to vector<1x16xf32>
    %c8_261 = arith.constant 8 : index
    %c0_262 = arith.constant 0 : index
    %657 = vector.load %arg21[%c8_261, %c0_262] : memref<16x16xf32, #tpu.memory_space<vmem>>, vector<3x16xf32>
    %cst_263 = arith.constant dense<0.000000e+00> : vector<1x3xf32>
    %658 = tpu.matmul %656, %657, %cst_263 {dimension_numbers = #tpu.dot_dimension_numbers<[1], [1], [0], [0], [0, 0, 1, 0], [], []>} : vector<1x16xf32>, vector<3x16xf32>, vector<1x3xf32> -> vector<1x3xf32>
    %cst_264 = arith.constant 2.500000e-01 : f32
    %659 = vector.broadcast %cst_264 : f32 to vector<1x3xf32>
    %660 = arith.mulf %658, %659 : vector<1x3xf32>
    %cst_265 = arith.constant dense<0xFF800000> : vector<1xf32>
    %661 = vector.multi_reduction <maximumf>, %660, %cst_265 [1] : vector<1x3xf32> to vector<1xf32>
    %662 = vector.shape_cast %661 : vector<1xf32> to vector<1x1xf32>
    %663 = vector.broadcast %662 : vector<1x1xf32> to vector<1x3xf32>
    %664 = arith.subf %660, %663 : vector<1x3xf32>
    %665 = math.exp %664 : vector<1x3xf32>
    %cst_266 = arith.constant dense<0.000000e+00> : vector<1xf32>
    %666 = vector.multi_reduction <add>, %665, %cst_266 [1] : vector<1x3xf32> to vector<1xf32>
    %667 = vector.shape_cast %666 : vector<1xf32> to vector<1x1xf32>
    %668 = vector.broadcast %667 : vector<1x1xf32> to vector<1x3xf32>
    %669 = arith.divf %665, %668 : vector<1x3xf32>
    %c8_267 = arith.constant 8 : index
    %c0_268 = arith.constant 0 : index
    %670 = vector.load %arg22[%c8_267, %c0_268] : memref<16x16xf32, #tpu.memory_space<vmem>>, vector<3x16xf32>
    %cst_269 = arith.constant dense<0.000000e+00> : vector<1x16xf32>
    %671 = tpu.matmul %669, %670, %cst_269 {dimension_numbers = #tpu.dot_dimension_numbers<[1], [0], [0], [1], [0, 0, 1, 1], [], []>} : vector<1x3xf32>, vector<3x16xf32>, vector<1x16xf32> -> vector<1x16xf32>
    %672 = tpu.concatenate %651, %671 in 1 : vector<1x16xf32>, vector<1x16xf32> -> vector<1x32xf32>
    %cst_270 = arith.constant dense<0.000000e+00> : vector<1x32xf32>
    %673 = tpu.matmul %672, %8, %cst_270 {dimension_numbers = #tpu.dot_dimension_numbers<[1], [0], [0], [1], [0, 0, 1, 1], [], []>} : vector<1x32xf32>, vector<32x32xf32>, vector<1x32xf32> -> vector<1x32xf32>
    %674 = arith.addf %629, %673 : vector<1x32xf32>
    %675 = arith.addf %674, %28 : vector<1x32xf32>
    %cst_271 = arith.constant dense<0.000000e+00> : vector<1xf32>
    %676 = vector.multi_reduction <add>, %675, %cst_271 [1] : vector<1x32xf32> to vector<1xf32>
    %677 = vector.shape_cast %676 : vector<1xf32> to vector<1x1xf32>
    %cst_272 = arith.constant 3.200000e+01 : f32
    %678 = vector.broadcast %cst_272 : f32 to vector<1x1xf32>
    %679 = arith.divf %677, %678 : vector<1x1xf32>
    %680 = vector.broadcast %679 : vector<1x1xf32> to vector<1x32xf32>
    %681 = arith.subf %675, %680 : vector<1x32xf32>
    %682 = arith.mulf %681, %681 : vector<1x32xf32>
    %cst_273 = arith.constant dense<0.000000e+00> : vector<1xf32>
    %683 = vector.multi_reduction <add>, %682, %cst_273 [1] : vector<1x32xf32> to vector<1xf32>
    %684 = vector.shape_cast %683 : vector<1xf32> to vector<1x1xf32>
    %cst_274 = arith.constant 3.200000e+01 : f32
    %685 = vector.broadcast %cst_274 : f32 to vector<1x1xf32>
    %686 = arith.divf %684, %685 : vector<1x1xf32>
    %687 = vector.broadcast %679 : vector<1x1xf32> to vector<1x32xf32>
    %688 = arith.subf %675, %687 : vector<1x32xf32>
    %cst_275 = arith.constant 9.99999974E-6 : f32
    %689 = vector.broadcast %cst_275 : f32 to vector<1x1xf32>
    %690 = arith.addf %686, %689 : vector<1x1xf32>
    %691 = math.rsqrt %690 : vector<1x1xf32>
    %692 = vector.broadcast %691 : vector<1x1xf32> to vector<1x32xf32>
    %693 = arith.mulf %688, %692 : vector<1x32xf32>
    %694 = arith.mulf %693, %29 : vector<1x32xf32>
    %695 = arith.addf %694, %30 : vector<1x32xf32>
    %cst_276 = arith.constant dense<0.000000e+00> : vector<1x32xf32>
    %696 = tpu.matmul %695, %9, %cst_276 {dimension_numbers = #tpu.dot_dimension_numbers<[1], [0], [0], [1], [0, 0, 1, 1], [], []>} : vector<1x32xf32>, vector<32x32xf32>, vector<1x32xf32> -> vector<1x32xf32>
    %697 = arith.addf %696, %31 : vector<1x32xf32>
    %698 = vector.extract_strided_slice %697 {offsets = [0, 0], sizes = [1, 16], strides = [1, 1]} : vector<1x32xf32> to vector<1x16xf32>
    %699 = vector.extract_strided_slice %214 {offsets = [0, 0], sizes = [8, 16], strides = [1, 1]} : vector<8x64xf32> to vector<8x16xf32>
    %cst_277 = arith.constant dense<0.000000e+00> : vector<1x8xf32>
    %700 = tpu.matmul %698, %699, %cst_277 {dimension_numbers = #tpu.dot_dimension_numbers<[1], [1], [0], [0], [0, 0, 1, 0], [], []>} : vector<1x16xf32>, vector<8x16xf32>, vector<1x8xf32> -> vector<1x8xf32>
    %cst_278 = arith.constant 2.500000e-01 : f32
    %701 = vector.broadcast %cst_278 : f32 to vector<1x8xf32>
    %702 = arith.mulf %700, %701 : vector<1x8xf32>
    %703 = arith.addf %702, %47 : vector<1x8xf32>
    %cst_279 = arith.constant dense<0xFF800000> : vector<1xf32>
    %704 = vector.multi_reduction <maximumf>, %703, %cst_279 [1] : vector<1x8xf32> to vector<1xf32>
    %705 = vector.shape_cast %704 : vector<1xf32> to vector<1x1xf32>
    %706 = vector.broadcast %705 : vector<1x1xf32> to vector<1x8xf32>
    %707 = arith.subf %703, %706 : vector<1x8xf32>
    %708 = math.exp %707 : vector<1x8xf32>
    %cst_280 = arith.constant dense<0.000000e+00> : vector<1xf32>
    %709 = vector.multi_reduction <add>, %708, %cst_280 [1] : vector<1x8xf32> to vector<1xf32>
    %710 = vector.shape_cast %709 : vector<1xf32> to vector<1x1xf32>
    %711 = vector.broadcast %710 : vector<1x1xf32> to vector<1x8xf32>
    %712 = arith.divf %708, %711 : vector<1x8xf32>
    %713 = vector.extract_strided_slice %214 {offsets = [0, 32], sizes = [8, 16], strides = [1, 1]} : vector<8x64xf32> to vector<8x16xf32>
    %cst_281 = arith.constant dense<0.000000e+00> : vector<1x16xf32>
    %714 = tpu.matmul %712, %713, %cst_281 {dimension_numbers = #tpu.dot_dimension_numbers<[1], [0], [0], [1], [0, 0, 1, 1], [], []>} : vector<1x8xf32>, vector<8x16xf32>, vector<1x16xf32> -> vector<1x16xf32>
    %715 = vector.extract_strided_slice %697 {offsets = [0, 16], sizes = [1, 16], strides = [1, 1]} : vector<1x32xf32> to vector<1x16xf32>
    %716 = vector.extract_strided_slice %214 {offsets = [0, 16], sizes = [8, 16], strides = [1, 1]} : vector<8x64xf32> to vector<8x16xf32>
    %cst_282 = arith.constant dense<0.000000e+00> : vector<1x8xf32>
    %717 = tpu.matmul %715, %716, %cst_282 {dimension_numbers = #tpu.dot_dimension_numbers<[1], [1], [0], [0], [0, 0, 1, 0], [], []>} : vector<1x16xf32>, vector<8x16xf32>, vector<1x8xf32> -> vector<1x8xf32>
    %cst_283 = arith.constant 2.500000e-01 : f32
    %718 = vector.broadcast %cst_283 : f32 to vector<1x8xf32>
    %719 = arith.mulf %717, %718 : vector<1x8xf32>
    %720 = arith.addf %719, %47 : vector<1x8xf32>
    %cst_284 = arith.constant dense<0xFF800000> : vector<1xf32>
    %721 = vector.multi_reduction <maximumf>, %720, %cst_284 [1] : vector<1x8xf32> to vector<1xf32>
    %722 = vector.shape_cast %721 : vector<1xf32> to vector<1x1xf32>
    %723 = vector.broadcast %722 : vector<1x1xf32> to vector<1x8xf32>
    %724 = arith.subf %720, %723 : vector<1x8xf32>
    %725 = math.exp %724 : vector<1x8xf32>
    %cst_285 = arith.constant dense<0.000000e+00> : vector<1xf32>
    %726 = vector.multi_reduction <add>, %725, %cst_285 [1] : vector<1x8xf32> to vector<1xf32>
    %727 = vector.shape_cast %726 : vector<1xf32> to vector<1x1xf32>
    %728 = vector.broadcast %727 : vector<1x1xf32> to vector<1x8xf32>
    %729 = arith.divf %725, %728 : vector<1x8xf32>
    %730 = vector.extract_strided_slice %214 {offsets = [0, 48], sizes = [8, 16], strides = [1, 1]} : vector<8x64xf32> to vector<8x16xf32>
    %cst_286 = arith.constant dense<0.000000e+00> : vector<1x16xf32>
    %731 = tpu.matmul %729, %730, %cst_286 {dimension_numbers = #tpu.dot_dimension_numbers<[1], [0], [0], [1], [0, 0, 1, 1], [], []>} : vector<1x8xf32>, vector<8x16xf32>, vector<1x16xf32> -> vector<1x16xf32>
    %732 = tpu.concatenate %714, %731 in 1 : vector<1x16xf32>, vector<1x16xf32> -> vector<1x32xf32>
    %cst_287 = arith.constant dense<0.000000e+00> : vector<1x32xf32>
    %733 = tpu.matmul %732, %11, %cst_287 {dimension_numbers = #tpu.dot_dimension_numbers<[1], [0], [0], [1], [0, 0, 1, 1], [], []>} : vector<1x32xf32>, vector<32x32xf32>, vector<1x32xf32> -> vector<1x32xf32>
    %734 = arith.addf %695, %733 : vector<1x32xf32>
    %735 = arith.addf %734, %33 : vector<1x32xf32>
    %cst_288 = arith.constant dense<0.000000e+00> : vector<1xf32>
    %736 = vector.multi_reduction <add>, %735, %cst_288 [1] : vector<1x32xf32> to vector<1xf32>
    %737 = vector.shape_cast %736 : vector<1xf32> to vector<1x1xf32>
    %cst_289 = arith.constant 3.200000e+01 : f32
    %738 = vector.broadcast %cst_289 : f32 to vector<1x1xf32>
    %739 = arith.divf %737, %738 : vector<1x1xf32>
    %740 = vector.broadcast %739 : vector<1x1xf32> to vector<1x32xf32>
    %741 = arith.subf %735, %740 : vector<1x32xf32>
    %742 = arith.mulf %741, %741 : vector<1x32xf32>
    %cst_290 = arith.constant dense<0.000000e+00> : vector<1xf32>
    %743 = vector.multi_reduction <add>, %742, %cst_290 [1] : vector<1x32xf32> to vector<1xf32>
    %744 = vector.shape_cast %743 : vector<1xf32> to vector<1x1xf32>
    %cst_291 = arith.constant 3.200000e+01 : f32
    %745 = vector.broadcast %cst_291 : f32 to vector<1x1xf32>
    %746 = arith.divf %744, %745 : vector<1x1xf32>
    %747 = vector.broadcast %739 : vector<1x1xf32> to vector<1x32xf32>
    %748 = arith.subf %735, %747 : vector<1x32xf32>
    %cst_292 = arith.constant 9.99999974E-6 : f32
    %749 = vector.broadcast %cst_292 : f32 to vector<1x1xf32>
    %750 = arith.addf %746, %749 : vector<1x1xf32>
    %751 = math.rsqrt %750 : vector<1x1xf32>
    %752 = vector.broadcast %751 : vector<1x1xf32> to vector<1x32xf32>
    %753 = arith.mulf %748, %752 : vector<1x32xf32>
    %754 = arith.mulf %753, %34 : vector<1x32xf32>
    %755 = arith.addf %754, %35 : vector<1x32xf32>
    %cst_293 = arith.constant dense<0.000000e+00> : vector<1x64xf32>
    %756 = tpu.matmul %755, %12, %cst_293 {dimension_numbers = #tpu.dot_dimension_numbers<[1], [0], [0], [1], [0, 0, 1, 1], [], []>} : vector<1x32xf32>, vector<32x64xf32>, vector<1x64xf32> -> vector<1x64xf32>
    %757 = arith.addf %756, %36 : vector<1x64xf32>
    %758 = arith.mulf %757, %757 : vector<1x64xf32>
    %759 = arith.mulf %757, %758 : vector<1x64xf32>
    %cst_294 = arith.constant 4.471500e-02 : f32
    %760 = vector.broadcast %cst_294 : f32 to vector<1x64xf32>
    %761 = arith.mulf %760, %759 : vector<1x64xf32>
    %762 = arith.addf %757, %761 : vector<1x64xf32>
    %cst_295 = arith.constant 0.797884583 : f32
    %763 = vector.broadcast %cst_295 : f32 to vector<1x64xf32>
    %764 = arith.mulf %763, %762 : vector<1x64xf32>
    %765 = math.tanh %764 : vector<1x64xf32>
    %cst_296 = arith.constant 1.000000e+00 : f32
    %766 = vector.broadcast %cst_296 : f32 to vector<1x64xf32>
    %767 = arith.addf %766, %765 : vector<1x64xf32>
    %cst_297 = arith.constant 5.000000e-01 : f32
    %768 = vector.broadcast %cst_297 : f32 to vector<1x64xf32>
    %769 = arith.mulf %768, %767 : vector<1x64xf32>
    %770 = arith.mulf %757, %769 : vector<1x64xf32>
    %cst_298 = arith.constant dense<0.000000e+00> : vector<1x32xf32>
    %771 = tpu.matmul %770, %13, %cst_298 {dimension_numbers = #tpu.dot_dimension_numbers<[1], [0], [0], [1], [0, 0, 1, 1], [], []>} : vector<1x64xf32>, vector<64x32xf32>, vector<1x32xf32> -> vector<1x32xf32>
    %772 = arith.addf %755, %771 : vector<1x32xf32>
    %773 = arith.addf %772, %37 : vector<1x32xf32>
    %cst_299 = arith.constant dense<0.000000e+00> : vector<1xf32>
    %774 = vector.multi_reduction <add>, %773, %cst_299 [1] : vector<1x32xf32> to vector<1xf32>
    %775 = vector.shape_cast %774 : vector<1xf32> to vector<1x1xf32>
    %cst_300 = arith.constant 3.200000e+01 : f32
    %776 = vector.broadcast %cst_300 : f32 to vector<1x1xf32>
    %777 = arith.divf %775, %776 : vector<1x1xf32>
    %778 = vector.broadcast %777 : vector<1x1xf32> to vector<1x32xf32>
    %779 = arith.subf %773, %778 : vector<1x32xf32>
    %780 = arith.mulf %779, %779 : vector<1x32xf32>
    %cst_301 = arith.constant dense<0.000000e+00> : vector<1xf32>
    %781 = vector.multi_reduction <add>, %780, %cst_301 [1] : vector<1x32xf32> to vector<1xf32>
    %782 = vector.shape_cast %781 : vector<1xf32> to vector<1x1xf32>
    %cst_302 = arith.constant 3.200000e+01 : f32
    %783 = vector.broadcast %cst_302 : f32 to vector<1x1xf32>
    %784 = arith.divf %782, %783 : vector<1x1xf32>
    %785 = vector.broadcast %777 : vector<1x1xf32> to vector<1x32xf32>
    %786 = arith.subf %773, %785 : vector<1x32xf32>
    %cst_303 = arith.constant 9.99999974E-6 : f32
    %787 = vector.broadcast %cst_303 : f32 to vector<1x1xf32>
    %788 = arith.addf %784, %787 : vector<1x1xf32>
    %789 = math.rsqrt %788 : vector<1x1xf32>
    %790 = vector.broadcast %789 : vector<1x1xf32> to vector<1x32xf32>
    %791 = arith.mulf %786, %790 : vector<1x32xf32>
    %792 = arith.mulf %791, %38 : vector<1x32xf32>
    %793 = arith.addf %792, %39 : vector<1x32xf32>
    %cst_304 = arith.constant dense<0.000000e+00> : vector<1x64xf32>
    %794 = tpu.matmul %793, %14, %cst_304 {dimension_numbers = #tpu.dot_dimension_numbers<[1], [0], [0], [1], [0, 0, 1, 1], [], []>} : vector<1x32xf32>, vector<32x64xf32>, vector<1x64xf32> -> vector<1x64xf32>
    %795 = arith.addf %794, %40 : vector<1x64xf32>
    %cst_305 = arith.constant dense<0xFF800000> : vector<1xf32>
    %796 = vector.multi_reduction <maximumf>, %795, %cst_305 [1] : vector<1x64xf32> to vector<1xf32>
    %797 = vector.shape_cast %796 : vector<1xf32> to vector<1x1xf32>
    %798 = vector.broadcast %797 : vector<1x1xf32> to vector<1x64xf32>
    %799 = arith.cmpf oge, %795, %798 : vector<1x64xf32>
    %cst_306 = arith.constant 6.400000e+01 : f32
    %800 = vector.broadcast %cst_306 : f32 to vector<1x64xf32>
    %801 = arith.select %799, %220, %800 : vector<1x64xi1>, vector<1x64xf32>
    %cst_307 = arith.constant dense<0x7F800000> : vector<1xf32>
    %802 = vector.multi_reduction <minimumf>, %801, %cst_307 [1] : vector<1x64xf32> to vector<1xf32>
    %803 = vector.shape_cast %802 : vector<1xf32> to vector<1x1xf32>
    %804 = arith.fptosi %803 : vector<1x1xf32> to vector<1x1xi32>
    %c1_i32_308 = arith.constant 1 : i32
    %805 = vector.broadcast %c1_i32_308 : i32 to vector<1x1xi32>
    %806 = arith.select %603, %805, %804 : vector<1x1xi1>, vector<1x1xi32>
    %c2_i32_309 = arith.constant 2 : i32
    %807 = vector.broadcast %c2_i32_309 : i32 to vector<1x1xi32>
    %808 = arith.cmpi eq, %806, %807 : vector<1x1xi32>
    %809 = arith.ori %603, %808 : vector<1x1xi1>
    %810 = vector.broadcast %806 : vector<1x1xi32> to vector<1x64xi32>
    %811 = arith.cmpi eq, %219, %810 : vector<1x64xi32>
    %812 = arith.extui %811 : vector<1x64xi1> to vector<1x64xi32>
    %813 = arith.sitofp %812 : vector<1x64xi32> to vector<1x64xf32>
    %cst_310 = arith.constant dense<0.000000e+00> : vector<1x32xf32>
    %814 = tpu.matmul %813, %0, %cst_310 {dimension_numbers = #tpu.dot_dimension_numbers<[1], [0], [0], [1], [0, 0, 1, 1], [], []>} : vector<1x64xf32>, vector<64x32xf32>, vector<1x32xf32> -> vector<1x32xf32>
    %815 = arith.addf %814, %218 : vector<1x32xf32>
    %cst_311 = arith.constant dense<0.000000e+00> : vector<1xf32>
    %816 = vector.multi_reduction <add>, %815, %cst_311 [1] : vector<1x32xf32> to vector<1xf32>
    %817 = vector.shape_cast %816 : vector<1xf32> to vector<1x1xf32>
    %cst_312 = arith.constant 3.200000e+01 : f32
    %818 = vector.broadcast %cst_312 : f32 to vector<1x1xf32>
    %819 = arith.divf %817, %818 : vector<1x1xf32>
    %820 = vector.broadcast %819 : vector<1x1xf32> to vector<1x32xf32>
    %821 = arith.subf %815, %820 : vector<1x32xf32>
    %822 = arith.mulf %821, %821 : vector<1x32xf32>
    %cst_313 = arith.constant dense<0.000000e+00> : vector<1xf32>
    %823 = vector.multi_reduction <add>, %822, %cst_313 [1] : vector<1x32xf32> to vector<1xf32>
    %824 = vector.shape_cast %823 : vector<1xf32> to vector<1x1xf32>
    %cst_314 = arith.constant 3.200000e+01 : f32
    %825 = vector.broadcast %cst_314 : f32 to vector<1x1xf32>
    %826 = arith.divf %824, %825 : vector<1x1xf32>
    %827 = vector.broadcast %819 : vector<1x1xf32> to vector<1x32xf32>
    %828 = arith.subf %815, %827 : vector<1x32xf32>
    %cst_315 = arith.constant 9.99999974E-6 : f32
    %829 = vector.broadcast %cst_315 : f32 to vector<1x1xf32>
    %830 = arith.addf %826, %829 : vector<1x1xf32>
    %831 = math.rsqrt %830 : vector<1x1xf32>
    %832 = vector.broadcast %831 : vector<1x1xf32> to vector<1x32xf32>
    %833 = arith.mulf %828, %832 : vector<1x32xf32>
    %834 = arith.mulf %833, %25 : vector<1x32xf32>
    %835 = arith.addf %834, %26 : vector<1x32xf32>
    %cst_316 = arith.constant dense<0.000000e+00> : vector<1x96xf32>
    %836 = tpu.matmul %835, %7, %cst_316 {dimension_numbers = #tpu.dot_dimension_numbers<[1], [0], [0], [1], [0, 0, 1, 1], [], []>} : vector<1x32xf32>, vector<32x96xf32>, vector<1x96xf32> -> vector<1x96xf32>
    %837 = arith.addf %836, %27 : vector<1x96xf32>
    %838 = vector.extract_strided_slice %837 {offsets = [0, 32], sizes = [1, 16], strides = [1, 1]} : vector<1x96xf32> to vector<1x16xf32>
    %839 = vector.extract_strided_slice %837 {offsets = [0, 64], sizes = [1, 16], strides = [1, 1]} : vector<1x96xf32> to vector<1x16xf32>
    %c3_317 = arith.constant 3 : index
    %c0_318 = arith.constant 0 : index
    %840 = vector.load %arg21[%c3_317, %c0_318] : memref<16x16xf32, #tpu.memory_space<vmem>>, vector<1x16xf32>
    tpu.vector_store %arg21[%c3_317, %c0_318], %838 {strides = array<i32>} : memref<16x16xf32, #tpu.memory_space<vmem>>, vector<1x16xf32>,
    %c3_319 = arith.constant 3 : index
    %c0_320 = arith.constant 0 : index
    %841 = vector.load %arg22[%c3_319, %c0_320] : memref<16x16xf32, #tpu.memory_space<vmem>>, vector<1x16xf32>
    tpu.vector_store %arg22[%c3_319, %c0_320], %839 {strides = array<i32>} : memref<16x16xf32, #tpu.memory_space<vmem>>, vector<1x16xf32>,
    %842 = vector.extract_strided_slice %837 {offsets = [0, 0], sizes = [1, 16], strides = [1, 1]} : vector<1x96xf32> to vector<1x16xf32>
    %c0_321 = arith.constant 0 : index
    %c0_322 = arith.constant 0 : index
    %843 = vector.load %arg21[%c0_321, %c0_322] : memref<16x16xf32, #tpu.memory_space<vmem>>, vector<4x16xf32>
    %cst_323 = arith.constant dense<0.000000e+00> : vector<1x4xf32>
    %844 = tpu.matmul %842, %843, %cst_323 {dimension_numbers = #tpu.dot_dimension_numbers<[1], [1], [0], [0], [0, 0, 1, 0], [], []>} : vector<1x16xf32>, vector<4x16xf32>, vector<1x4xf32> -> vector<1x4xf32>
    %cst_324 = arith.constant 2.500000e-01 : f32
    %845 = vector.broadcast %cst_324 : f32 to vector<1x4xf32>
    %846 = arith.mulf %844, %845 : vector<1x4xf32>
    %cst_325 = arith.constant dense<0xFF800000> : vector<1xf32>
    %847 = vector.multi_reduction <maximumf>, %846, %cst_325 [1] : vector<1x4xf32> to vector<1xf32>
    %848 = vector.shape_cast %847 : vector<1xf32> to vector<1x1xf32>
    %849 = vector.broadcast %848 : vector<1x1xf32> to vector<1x4xf32>
    %850 = arith.subf %846, %849 : vector<1x4xf32>
    %851 = math.exp %850 : vector<1x4xf32>
    %cst_326 = arith.constant dense<0.000000e+00> : vector<1xf32>
    %852 = vector.multi_reduction <add>, %851, %cst_326 [1] : vector<1x4xf32> to vector<1xf32>
    %853 = vector.shape_cast %852 : vector<1xf32> to vector<1x1xf32>
    %854 = vector.broadcast %853 : vector<1x1xf32> to vector<1x4xf32>
    %855 = arith.divf %851, %854 : vector<1x4xf32>
    %c0_327 = arith.constant 0 : index
    %c0_328 = arith.constant 0 : index
    %856 = vector.load %arg22[%c0_327, %c0_328] : memref<16x16xf32, #tpu.memory_space<vmem>>, vector<4x16xf32>
    %cst_329 = arith.constant dense<0.000000e+00> : vector<1x16xf32>
    %857 = tpu.matmul %855, %856, %cst_329 {dimension_numbers = #tpu.dot_dimension_numbers<[1], [0], [0], [1], [0, 0, 1, 1], [], []>} : vector<1x4xf32>, vector<4x16xf32>, vector<1x16xf32> -> vector<1x16xf32>
    %858 = vector.extract_strided_slice %837 {offsets = [0, 48], sizes = [1, 16], strides = [1, 1]} : vector<1x96xf32> to vector<1x16xf32>
    %859 = vector.extract_strided_slice %837 {offsets = [0, 80], sizes = [1, 16], strides = [1, 1]} : vector<1x96xf32> to vector<1x16xf32>
    %c11_330 = arith.constant 11 : index
    %c0_331 = arith.constant 0 : index
    %860 = vector.load %arg21[%c11_330, %c0_331] : memref<16x16xf32, #tpu.memory_space<vmem>>, vector<1x16xf32>
    tpu.vector_store %arg21[%c11_330, %c0_331], %858 {strides = array<i32>} : memref<16x16xf32, #tpu.memory_space<vmem>>, vector<1x16xf32>,
    %c11_332 = arith.constant 11 : index
    %c0_333 = arith.constant 0 : index
    %861 = vector.load %arg22[%c11_332, %c0_333] : memref<16x16xf32, #tpu.memory_space<vmem>>, vector<1x16xf32>
    tpu.vector_store %arg22[%c11_332, %c0_333], %859 {strides = array<i32>} : memref<16x16xf32, #tpu.memory_space<vmem>>, vector<1x16xf32>,
    %862 = vector.extract_strided_slice %837 {offsets = [0, 16], sizes = [1, 16], strides = [1, 1]} : vector<1x96xf32> to vector<1x16xf32>
    %c8_334 = arith.constant 8 : index
    %c0_335 = arith.constant 0 : index
    %863 = vector.load %arg21[%c8_334, %c0_335] : memref<16x16xf32, #tpu.memory_space<vmem>>, vector<4x16xf32>
    %cst_336 = arith.constant dense<0.000000e+00> : vector<1x4xf32>
    %864 = tpu.matmul %862, %863, %cst_336 {dimension_numbers = #tpu.dot_dimension_numbers<[1], [1], [0], [0], [0, 0, 1, 0], [], []>} : vector<1x16xf32>, vector<4x16xf32>, vector<1x4xf32> -> vector<1x4xf32>
    %cst_337 = arith.constant 2.500000e-01 : f32
    %865 = vector.broadcast %cst_337 : f32 to vector<1x4xf32>
    %866 = arith.mulf %864, %865 : vector<1x4xf32>
    %cst_338 = arith.constant dense<0xFF800000> : vector<1xf32>
    %867 = vector.multi_reduction <maximumf>, %866, %cst_338 [1] : vector<1x4xf32> to vector<1xf32>
    %868 = vector.shape_cast %867 : vector<1xf32> to vector<1x1xf32>
    %869 = vector.broadcast %868 : vector<1x1xf32> to vector<1x4xf32>
    %870 = arith.subf %866, %869 : vector<1x4xf32>
    %871 = math.exp %870 : vector<1x4xf32>
    %cst_339 = arith.constant dense<0.000000e+00> : vector<1xf32>
    %872 = vector.multi_reduction <add>, %871, %cst_339 [1] : vector<1x4xf32> to vector<1xf32>
    %873 = vector.shape_cast %872 : vector<1xf32> to vector<1x1xf32>
    %874 = vector.broadcast %873 : vector<1x1xf32> to vector<1x4xf32>
    %875 = arith.divf %871, %874 : vector<1x4xf32>
    %c8_340 = arith.constant 8 : index
    %c0_341 = arith.constant 0 : index
    %876 = vector.load %arg22[%c8_340, %c0_341] : memref<16x16xf32, #tpu.memory_space<vmem>>, vector<4x16xf32>
    %cst_342 = arith.constant dense<0.000000e+00> : vector<1x16xf32>
    %877 = tpu.matmul %875, %876, %cst_342 {dimension_numbers = #tpu.dot_dimension_numbers<[1], [0], [0], [1], [0, 0, 1, 1], [], []>} : vector<1x4xf32>, vector<4x16xf32>, vector<1x16xf32> -> vector<1x16xf32>
    %878 = tpu.concatenate %857, %877 in 1 : vector<1x16xf32>, vector<1x16xf32> -> vector<1x32xf32>
    %cst_343 = arith.constant dense<0.000000e+00> : vector<1x32xf32>
    %879 = tpu.matmul %878, %8, %cst_343 {dimension_numbers = #tpu.dot_dimension_numbers<[1], [0], [0], [1], [0, 0, 1, 1], [], []>} : vector<1x32xf32>, vector<32x32xf32>, vector<1x32xf32> -> vector<1x32xf32>
    %880 = arith.addf %835, %879 : vector<1x32xf32>
    %881 = arith.addf %880, %28 : vector<1x32xf32>
    %cst_344 = arith.constant dense<0.000000e+00> : vector<1xf32>
    %882 = vector.multi_reduction <add>, %881, %cst_344 [1] : vector<1x32xf32> to vector<1xf32>
    %883 = vector.shape_cast %882 : vector<1xf32> to vector<1x1xf32>
    %cst_345 = arith.constant 3.200000e+01 : f32
    %884 = vector.broadcast %cst_345 : f32 to vector<1x1xf32>
    %885 = arith.divf %883, %884 : vector<1x1xf32>
    %886 = vector.broadcast %885 : vector<1x1xf32> to vector<1x32xf32>
    %887 = arith.subf %881, %886 : vector<1x32xf32>
    %888 = arith.mulf %887, %887 : vector<1x32xf32>
    %cst_346 = arith.constant dense<0.000000e+00> : vector<1xf32>
    %889 = vector.multi_reduction <add>, %888, %cst_346 [1] : vector<1x32xf32> to vector<1xf32>
    %890 = vector.shape_cast %889 : vector<1xf32> to vector<1x1xf32>
    %cst_347 = arith.constant 3.200000e+01 : f32
    %891 = vector.broadcast %cst_347 : f32 to vector<1x1xf32>
    %892 = arith.divf %890, %891 : vector<1x1xf32>
    %893 = vector.broadcast %885 : vector<1x1xf32> to vector<1x32xf32>
    %894 = arith.subf %881, %893 : vector<1x32xf32>
    %cst_348 = arith.constant 9.99999974E-6 : f32
    %895 = vector.broadcast %cst_348 : f32 to vector<1x1xf32>
    %896 = arith.addf %892, %895 : vector<1x1xf32>
    %897 = math.rsqrt %896 : vector<1x1xf32>
    %898 = vector.broadcast %897 : vector<1x1xf32> to vector<1x32xf32>
    %899 = arith.mulf %894, %898 : vector<1x32xf32>
    %900 = arith.mulf %899, %29 : vector<1x32xf32>
    %901 = arith.addf %900, %30 : vector<1x32xf32>
    %cst_349 = arith.constant dense<0.000000e+00> : vector<1x32xf32>
    %902 = tpu.matmul %901, %9, %cst_349 {dimension_numbers = #tpu.dot_dimension_numbers<[1], [0], [0], [1], [0, 0, 1, 1], [], []>} : vector<1x32xf32>, vector<32x32xf32>, vector<1x32xf32> -> vector<1x32xf32>
    %903 = arith.addf %902, %31 : vector<1x32xf32>
    %904 = vector.extract_strided_slice %903 {offsets = [0, 0], sizes = [1, 16], strides = [1, 1]} : vector<1x32xf32> to vector<1x16xf32>
    %905 = vector.extract_strided_slice %214 {offsets = [0, 0], sizes = [8, 16], strides = [1, 1]} : vector<8x64xf32> to vector<8x16xf32>
    %cst_350 = arith.constant dense<0.000000e+00> : vector<1x8xf32>
    %906 = tpu.matmul %904, %905, %cst_350 {dimension_numbers = #tpu.dot_dimension_numbers<[1], [1], [0], [0], [0, 0, 1, 0], [], []>} : vector<1x16xf32>, vector<8x16xf32>, vector<1x8xf32> -> vector<1x8xf32>
    %cst_351 = arith.constant 2.500000e-01 : f32
    %907 = vector.broadcast %cst_351 : f32 to vector<1x8xf32>
    %908 = arith.mulf %906, %907 : vector<1x8xf32>
    %909 = arith.addf %908, %47 : vector<1x8xf32>
    %cst_352 = arith.constant dense<0xFF800000> : vector<1xf32>
    %910 = vector.multi_reduction <maximumf>, %909, %cst_352 [1] : vector<1x8xf32> to vector<1xf32>
    %911 = vector.shape_cast %910 : vector<1xf32> to vector<1x1xf32>
    %912 = vector.broadcast %911 : vector<1x1xf32> to vector<1x8xf32>
    %913 = arith.subf %909, %912 : vector<1x8xf32>
    %914 = math.exp %913 : vector<1x8xf32>
    %cst_353 = arith.constant dense<0.000000e+00> : vector<1xf32>
    %915 = vector.multi_reduction <add>, %914, %cst_353 [1] : vector<1x8xf32> to vector<1xf32>
    %916 = vector.shape_cast %915 : vector<1xf32> to vector<1x1xf32>
    %917 = vector.broadcast %916 : vector<1x1xf32> to vector<1x8xf32>
    %918 = arith.divf %914, %917 : vector<1x8xf32>
    %919 = vector.extract_strided_slice %214 {offsets = [0, 32], sizes = [8, 16], strides = [1, 1]} : vector<8x64xf32> to vector<8x16xf32>
    %cst_354 = arith.constant dense<0.000000e+00> : vector<1x16xf32>
    %920 = tpu.matmul %918, %919, %cst_354 {dimension_numbers = #tpu.dot_dimension_numbers<[1], [0], [0], [1], [0, 0, 1, 1], [], []>} : vector<1x8xf32>, vector<8x16xf32>, vector<1x16xf32> -> vector<1x16xf32>
    %921 = vector.extract_strided_slice %903 {offsets = [0, 16], sizes = [1, 16], strides = [1, 1]} : vector<1x32xf32> to vector<1x16xf32>
    %922 = vector.extract_strided_slice %214 {offsets = [0, 16], sizes = [8, 16], strides = [1, 1]} : vector<8x64xf32> to vector<8x16xf32>
    %cst_355 = arith.constant dense<0.000000e+00> : vector<1x8xf32>
    %923 = tpu.matmul %921, %922, %cst_355 {dimension_numbers = #tpu.dot_dimension_numbers<[1], [1], [0], [0], [0, 0, 1, 0], [], []>} : vector<1x16xf32>, vector<8x16xf32>, vector<1x8xf32> -> vector<1x8xf32>
    %cst_356 = arith.constant 2.500000e-01 : f32
    %924 = vector.broadcast %cst_356 : f32 to vector<1x8xf32>
    %925 = arith.mulf %923, %924 : vector<1x8xf32>
    %926 = arith.addf %925, %47 : vector<1x8xf32>
    %cst_357 = arith.constant dense<0xFF800000> : vector<1xf32>
    %927 = vector.multi_reduction <maximumf>, %926, %cst_357 [1] : vector<1x8xf32> to vector<1xf32>
    %928 = vector.shape_cast %927 : vector<1xf32> to vector<1x1xf32>
    %929 = vector.broadcast %928 : vector<1x1xf32> to vector<1x8xf32>
    %930 = arith.subf %926, %929 : vector<1x8xf32>
    %931 = math.exp %930 : vector<1x8xf32>
    %cst_358 = arith.constant dense<0.000000e+00> : vector<1xf32>
    %932 = vector.multi_reduction <add>, %931, %cst_358 [1] : vector<1x8xf32> to vector<1xf32>
    %933 = vector.shape_cast %932 : vector<1xf32> to vector<1x1xf32>
    %934 = vector.broadcast %933 : vector<1x1xf32> to vector<1x8xf32>
    %935 = arith.divf %931, %934 : vector<1x8xf32>
    %936 = vector.extract_strided_slice %214 {offsets = [0, 48], sizes = [8, 16], strides = [1, 1]} : vector<8x64xf32> to vector<8x16xf32>
    %cst_359 = arith.constant dense<0.000000e+00> : vector<1x16xf32>
    %937 = tpu.matmul %935, %936, %cst_359 {dimension_numbers = #tpu.dot_dimension_numbers<[1], [0], [0], [1], [0, 0, 1, 1], [], []>} : vector<1x8xf32>, vector<8x16xf32>, vector<1x16xf32> -> vector<1x16xf32>
    %938 = tpu.concatenate %920, %937 in 1 : vector<1x16xf32>, vector<1x16xf32> -> vector<1x32xf32>
    %cst_360 = arith.constant dense<0.000000e+00> : vector<1x32xf32>
    %939 = tpu.matmul %938, %11, %cst_360 {dimension_numbers = #tpu.dot_dimension_numbers<[1], [0], [0], [1], [0, 0, 1, 1], [], []>} : vector<1x32xf32>, vector<32x32xf32>, vector<1x32xf32> -> vector<1x32xf32>
    %940 = arith.addf %901, %939 : vector<1x32xf32>
    %941 = arith.addf %940, %33 : vector<1x32xf32>
    %cst_361 = arith.constant dense<0.000000e+00> : vector<1xf32>
    %942 = vector.multi_reduction <add>, %941, %cst_361 [1] : vector<1x32xf32> to vector<1xf32>
    %943 = vector.shape_cast %942 : vector<1xf32> to vector<1x1xf32>
    %cst_362 = arith.constant 3.200000e+01 : f32
    %944 = vector.broadcast %cst_362 : f32 to vector<1x1xf32>
    %945 = arith.divf %943, %944 : vector<1x1xf32>
    %946 = vector.broadcast %945 : vector<1x1xf32> to vector<1x32xf32>
    %947 = arith.subf %941, %946 : vector<1x32xf32>
    %948 = arith.mulf %947, %947 : vector<1x32xf32>
    %cst_363 = arith.constant dense<0.000000e+00> : vector<1xf32>
    %949 = vector.multi_reduction <add>, %948, %cst_363 [1] : vector<1x32xf32> to vector<1xf32>
    %950 = vector.shape_cast %949 : vector<1xf32> to vector<1x1xf32>
    %cst_364 = arith.constant 3.200000e+01 : f32
    %951 = vector.broadcast %cst_364 : f32 to vector<1x1xf32>
    %952 = arith.divf %950, %951 : vector<1x1xf32>
    %953 = vector.broadcast %945 : vector<1x1xf32> to vector<1x32xf32>
    %954 = arith.subf %941, %953 : vector<1x32xf32>
    %cst_365 = arith.constant 9.99999974E-6 : f32
    %955 = vector.broadcast %cst_365 : f32 to vector<1x1xf32>
    %956 = arith.addf %952, %955 : vector<1x1xf32>
    %957 = math.rsqrt %956 : vector<1x1xf32>
    %958 = vector.broadcast %957 : vector<1x1xf32> to vector<1x32xf32>
    %959 = arith.mulf %954, %958 : vector<1x32xf32>
    %960 = arith.mulf %959, %34 : vector<1x32xf32>
    %961 = arith.addf %960, %35 : vector<1x32xf32>
    %cst_366 = arith.constant dense<0.000000e+00> : vector<1x64xf32>
    %962 = tpu.matmul %961, %12, %cst_366 {dimension_numbers = #tpu.dot_dimension_numbers<[1], [0], [0], [1], [0, 0, 1, 1], [], []>} : vector<1x32xf32>, vector<32x64xf32>, vector<1x64xf32> -> vector<1x64xf32>
    %963 = arith.addf %962, %36 : vector<1x64xf32>
    %964 = arith.mulf %963, %963 : vector<1x64xf32>
    %965 = arith.mulf %963, %964 : vector<1x64xf32>
    %cst_367 = arith.constant 4.471500e-02 : f32
    %966 = vector.broadcast %cst_367 : f32 to vector<1x64xf32>
    %967 = arith.mulf %966, %965 : vector<1x64xf32>
    %968 = arith.addf %963, %967 : vector<1x64xf32>
    %cst_368 = arith.constant 0.797884583 : f32
    %969 = vector.broadcast %cst_368 : f32 to vector<1x64xf32>
    %970 = arith.mulf %969, %968 : vector<1x64xf32>
    %971 = math.tanh %970 : vector<1x64xf32>
    %cst_369 = arith.constant 1.000000e+00 : f32
    %972 = vector.broadcast %cst_369 : f32 to vector<1x64xf32>
    %973 = arith.addf %972, %971 : vector<1x64xf32>
    %cst_370 = arith.constant 5.000000e-01 : f32
    %974 = vector.broadcast %cst_370 : f32 to vector<1x64xf32>
    %975 = arith.mulf %974, %973 : vector<1x64xf32>
    %976 = arith.mulf %963, %975 : vector<1x64xf32>
    %cst_371 = arith.constant dense<0.000000e+00> : vector<1x32xf32>
    %977 = tpu.matmul %976, %13, %cst_371 {dimension_numbers = #tpu.dot_dimension_numbers<[1], [0], [0], [1], [0, 0, 1, 1], [], []>} : vector<1x64xf32>, vector<64x32xf32>, vector<1x32xf32> -> vector<1x32xf32>
    %978 = arith.addf %961, %977 : vector<1x32xf32>
    %979 = arith.addf %978, %37 : vector<1x32xf32>
    %cst_372 = arith.constant dense<0.000000e+00> : vector<1xf32>
    %980 = vector.multi_reduction <add>, %979, %cst_372 [1] : vector<1x32xf32> to vector<1xf32>
    %981 = vector.shape_cast %980 : vector<1xf32> to vector<1x1xf32>
    %cst_373 = arith.constant 3.200000e+01 : f32
    %982 = vector.broadcast %cst_373 : f32 to vector<1x1xf32>
    %983 = arith.divf %981, %982 : vector<1x1xf32>
    %984 = vector.broadcast %983 : vector<1x1xf32> to vector<1x32xf32>
    %985 = arith.subf %979, %984 : vector<1x32xf32>
    %986 = arith.mulf %985, %985 : vector<1x32xf32>
    %cst_374 = arith.constant dense<0.000000e+00> : vector<1xf32>
    %987 = vector.multi_reduction <add>, %986, %cst_374 [1] : vector<1x32xf32> to vector<1xf32>
    %988 = vector.shape_cast %987 : vector<1xf32> to vector<1x1xf32>
    %cst_375 = arith.constant 3.200000e+01 : f32
    %989 = vector.broadcast %cst_375 : f32 to vector<1x1xf32>
    %990 = arith.divf %988, %989 : vector<1x1xf32>
    %991 = vector.broadcast %983 : vector<1x1xf32> to vector<1x32xf32>
    %992 = arith.subf %979, %991 : vector<1x32xf32>
    %cst_376 = arith.constant 9.99999974E-6 : f32
    %993 = vector.broadcast %cst_376 : f32 to vector<1x1xf32>
    %994 = arith.addf %990, %993 : vector<1x1xf32>
    %995 = math.rsqrt %994 : vector<1x1xf32>
    %996 = vector.broadcast %995 : vector<1x1xf32> to vector<1x32xf32>
    %997 = arith.mulf %992, %996 : vector<1x32xf32>
    %998 = arith.mulf %997, %38 : vector<1x32xf32>
    %999 = arith.addf %998, %39 : vector<1x32xf32>
    %cst_377 = arith.constant dense<0.000000e+00> : vector<1x64xf32>
    %1000 = tpu.matmul %999, %14, %cst_377 {dimension_numbers = #tpu.dot_dimension_numbers<[1], [0], [0], [1], [0, 0, 1, 1], [], []>} : vector<1x32xf32>, vector<32x64xf32>, vector<1x64xf32> -> vector<1x64xf32>
    %1001 = arith.addf %1000, %40 : vector<1x64xf32>
    %cst_378 = arith.constant dense<0xFF800000> : vector<1xf32>
    %1002 = vector.multi_reduction <maximumf>, %1001, %cst_378 [1] : vector<1x64xf32> to vector<1xf32>
    %1003 = vector.shape_cast %1002 : vector<1xf32> to vector<1x1xf32>
    %1004 = vector.broadcast %1003 : vector<1x1xf32> to vector<1x64xf32>
    %1005 = arith.cmpf oge, %1001, %1004 : vector<1x64xf32>
    %cst_379 = arith.constant 6.400000e+01 : f32
    %1006 = vector.broadcast %cst_379 : f32 to vector<1x64xf32>
    %1007 = arith.select %1005, %220, %1006 : vector<1x64xi1>, vector<1x64xf32>
    %cst_380 = arith.constant dense<0x7F800000> : vector<1xf32>
    %1008 = vector.multi_reduction <minimumf>, %1007, %cst_380 [1] : vector<1x64xf32> to vector<1xf32>
    %1009 = vector.shape_cast %1008 : vector<1xf32> to vector<1x1xf32>
    %1010 = arith.fptosi %1009 : vector<1x1xf32> to vector<1x1xi32>
    %c1_i32_381 = arith.constant 1 : i32
    %1011 = vector.broadcast %c1_i32_381 : i32 to vector<1x1xi32>
    %1012 = arith.select %809, %1011, %1010 : vector<1x1xi1>, vector<1x1xi32>
    %1013 = tpu.concatenate %223, %394, %600, %806, %1012 in 1 : vector<1x1xi32>, vector<1x1xi32>, vector<1x1xi32>, vector<1x1xi32>, vector<1x1xi32> -> vector<1x5xi32>
    %c0_382 = arith.constant 0 : index
    %c0_383 = arith.constant 0 : index
    %c0_384 = arith.constant 0 : index
    %1014 = vector.load %arg20[%c0_382, %c0_383, %c0_384] : memref<1x1x5xi32, #tpu.memory_space<vmem>>, vector<1x1x5xi32>
    %1015 = vector.shape_cast %1014 : vector<1x1x5xi32> to vector<1x5xi32>
    %1016 = vector.shape_cast %1013 : vector<1x5xi32> to vector<1x1x5xi32>
    tpu.vector_store %arg20[%c0_382, %c0_383, %c0_384], %1016 {strides = array<i32>} : memref<1x1x5xi32, #tpu.memory_space<vmem>>, vector<1x1x5xi32>,
    return
  }
  func.func @transform_0(%arg0: i32, %arg1: memref<2x8xi32, #tpu.memory_space<smem>>, %arg2: memref<2xi32, #tpu.memory_space<smem>>) -> (i32, i32, i32) {
    %c0_i32 = arith.constant 0 : i32
    %c0_i32_0 = arith.constant 0 : i32
    %c0_i32_1 = arith.constant 0 : i32
    return %arg0, %c0_i32, %c0_i32_0 : i32, i32, i32
  }
  func.func @transform_1(%arg0: i32, %arg1: memref<2x8xi32, #tpu.memory_space<smem>>, %arg2: memref<2xi32, #tpu.memory_space<smem>>) -> (i32, i32) {
    %c0_i32 = arith.constant 0 : i32
    %c0_i32_0 = arith.constant 0 : i32
    %c0_i32_1 = arith.constant 0 : i32
    return %c0_i32, %c0_i32_0 : i32, i32
  }
  func.func @transform_2(%arg0: i32, %arg1: memref<2x8xi32, #tpu.memory_space<smem>>, %arg2: memref<2xi32, #tpu.memory_space<smem>>) -> (i32, i32) {
    %c0_i32 = arith.constant 0 : i32
    %c0_i32_0 = arith.constant 0 : i32
    %c0_i32_1 = arith.constant 0 : i32
    return %c0_i32, %c0_i32_0 : i32, i32
  }
  func.func @transform_3(%arg0: i32, %arg1: memref<2x8xi32, #tpu.memory_space<smem>>, %arg2: memref<2xi32, #tpu.memory_space<smem>>) -> (i32, i32) {
    %c0_i32 = arith.constant 0 : i32
    %c0_i32_0 = arith.constant 0 : i32
    %c0_i32_1 = arith.constant 0 : i32
    return %c0_i32, %c0_i32_0 : i32, i32
  }
  func.func @transform_4(%arg0: i32, %arg1: memref<2x8xi32, #tpu.memory_space<smem>>, %arg2: memref<2xi32, #tpu.memory_space<smem>>) -> (i32, i32) {
    %c0_i32 = arith.constant 0 : i32
    %c0_i32_0 = arith.constant 0 : i32
    %c0_i32_1 = arith.constant 0 : i32
    return %c0_i32, %c0_i32_0 : i32, i32
  }
  func.func @transform_5(%arg0: i32, %arg1: memref<2x8xi32, #tpu.memory_space<smem>>, %arg2: memref<2xi32, #tpu.memory_space<smem>>) -> (i32, i32) {
    %c0_i32 = arith.constant 0 : i32
    %c0_i32_0 = arith.constant 0 : i32
    %c0_i32_1 = arith.constant 0 : i32
    return %c0_i32, %c0_i32_0 : i32, i32
  }
  func.func @transform_6(%arg0: i32, %arg1: memref<2x8xi32, #tpu.memory_space<smem>>, %arg2: memref<2xi32, #tpu.memory_space<smem>>) -> (i32, i32) {
    %c0_i32 = arith.constant 0 : i32
    %c0_i32_0 = arith.constant 0 : i32
    %c0_i32_1 = arith.constant 0 : i32
    return %c0_i32, %c0_i32_0 : i32, i32
  }
  func.func @transform_7(%arg0: i32, %arg1: memref<2x8xi32, #tpu.memory_space<smem>>, %arg2: memref<2xi32, #tpu.memory_space<smem>>) -> (i32, i32) {
    %c0_i32 = arith.constant 0 : i32
    %c0_i32_0 = arith.constant 0 : i32
    %c0_i32_1 = arith.constant 0 : i32
    return %c0_i32, %c0_i32_0 : i32, i32
  }
  func.func @transform_8(%arg0: i32, %arg1: memref<2x8xi32, #tpu.memory_space<smem>>, %arg2: memref<2xi32, #tpu.memory_space<smem>>) -> (i32, i32) {
    %c0_i32 = arith.constant 0 : i32
    %c0_i32_0 = arith.constant 0 : i32
    %c0_i32_1 = arith.constant 0 : i32
    return %c0_i32, %c0_i32_0 : i32, i32
  }
  func.func @transform_9(%arg0: i32, %arg1: memref<2x8xi32, #tpu.memory_space<smem>>, %arg2: memref<2xi32, #tpu.memory_space<smem>>) -> (i32, i32) {
    %c0_i32 = arith.constant 0 : i32
    %c0_i32_0 = arith.constant 0 : i32
    %c0_i32_1 = arith.constant 0 : i32
    return %c0_i32, %c0_i32_0 : i32, i32
  }
  func.func @transform_10(%arg0: i32, %arg1: memref<2x8xi32, #tpu.memory_space<smem>>, %arg2: memref<2xi32, #tpu.memory_space<smem>>) -> (i32, i32) {
    %c0_i32 = arith.constant 0 : i32
    %c0_i32_0 = arith.constant 0 : i32
    %c0_i32_1 = arith.constant 0 : i32
    return %c0_i32, %c0_i32_0 : i32, i32
  }
  func.func @transform_11(%arg0: i32, %arg1: memref<2x8xi32, #tpu.memory_space<smem>>, %arg2: memref<2xi32, #tpu.memory_space<smem>>) -> (i32, i32) {
    %c0_i32 = arith.constant 0 : i32
    %c0_i32_0 = arith.constant 0 : i32
    %c0_i32_1 = arith.constant 0 : i32
    return %c0_i32, %c0_i32_0 : i32, i32
  }
  func.func @transform_12(%arg0: i32, %arg1: memref<2x8xi32, #tpu.memory_space<smem>>, %arg2: memref<2xi32, #tpu.memory_space<smem>>) -> (i32, i32) {
    %c0_i32 = arith.constant 0 : i32
    %c0_i32_0 = arith.constant 0 : i32
    %c0_i32_1 = arith.constant 0 : i32
    return %c0_i32, %c0_i32_0 : i32, i32
  }
  func.func @transform_13(%arg0: i32, %arg1: memref<2x8xi32, #tpu.memory_space<smem>>, %arg2: memref<2xi32, #tpu.memory_space<smem>>) -> (i32, i32) {
    %c0_i32 = arith.constant 0 : i32
    %c0_i32_0 = arith.constant 0 : i32
    %c0_i32_1 = arith.constant 0 : i32
    return %c0_i32, %c0_i32_0 : i32, i32
  }
  func.func @transform_14(%arg0: i32, %arg1: memref<2x8xi32, #tpu.memory_space<smem>>, %arg2: memref<2xi32, #tpu.memory_space<smem>>) -> (i32, i32) {
    %c0_i32 = arith.constant 0 : i32
    %c0_i32_0 = arith.constant 0 : i32
    %c0_i32_1 = arith.constant 0 : i32
    return %c0_i32, %c0_i32_0 : i32, i32
  }
  func.func @transform_15(%arg0: i32, %arg1: memref<2x8xi32, #tpu.memory_space<smem>>, %arg2: memref<2xi32, #tpu.memory_space<smem>>) -> (i32, i32) {
    %c0_i32 = arith.constant 0 : i32
    %c0_i32_0 = arith.constant 0 : i32
    %c0_i32_1 = arith.constant 0 : i32
    return %c0_i32, %c0_i32_0 : i32, i32
  }
  func.func @transform_16(%arg0: i32, %arg1: memref<2x8xi32, #tpu.memory_space<smem>>, %arg2: memref<2xi32, #tpu.memory_space<smem>>) -> (i32, i32) {
    %c0_i32 = arith.constant 0 : i32
    %c0_i32_0 = arith.constant 0 : i32
    %c0_i32_1 = arith.constant 0 : i32
    return %c0_i32, %c0_i32_0 : i32, i32
  }
  func.func @transform_17(%arg0: i32, %arg1: memref<2x8xi32, #tpu.memory_space<smem>>, %arg2: memref<2xi32, #tpu.memory_space<smem>>) -> (i32, i32, i32) {
    %c0_i32 = arith.constant 0 : i32
    %c0_i32_0 = arith.constant 0 : i32
    %c0_i32_1 = arith.constant 0 : i32
    return %arg0, %c0_i32, %c0_i32_0 : i32, i32, i32
  }
}

</mosaic_0001>

<bundles_post_ra>
// kernel: bart_generator_test_forward.1
= control target key start
LH: loop header
LB: loop body
LE: loop exit
PB: predicated region body
PF: predicated region fallthrough
CT: control target
= control target key end

     0   :  { %s9597_s0 = inlined_call_operand.vmem [shape: s32[2,8], index: 0, kind: input, shape index: {}, may-alias: {0,2}]   ;;  %s9598_s2 = inlined_call_operand.vmem [shape: s32[2,1,8], index: 2, kind: input, shape index: {}, may-alias: {0,2}]   ;;  %s9599_s3 = inlined_call_operand.vmem [shape: f32[32,128], index: 3, kind: input, shape index: {}]   ;;  %s9600_s4 = inlined_call_operand.vmem [shape: f32[64,32], index: 4, kind: input, shape index: {}]   ;;  %s9601_s5 = inlined_call_operand.vmem [shape: f32[8,32], index: 5, kind: input, shape index: {}]   ;;  %s9602_s6 = inlined_call_operand.vmem [shape: f32[4,32], index: 6, kind: input, shape index: {}]   ;;  %s9603_s7 = inlined_call_operand.vmem [shape: f32[32,96], index: 7, kind: input, shape index: {}]   ;;  %s9604_s8 = inlined_call_operand.vmem [shape: f32[32,32], index: 8, kind: input, shape index: {}]   ;;  %s9605_s9 = inlined_call_operand.vmem [shape: f32[32,64], index: 9, kind: input, shape index: {}]   ;;  %s9606_s10 = inlined_call_operand.vmem [shape: f32[64,32], index: 10, kind: input, shape index: {}]   ;;  %s9607_s11 = inlined_call_operand.vmem [shape: f32[32,96], index: 11, kind: input, shape index: {}]   ;;  %s9608_s12 = inlined_call_operand.vmem [shape: f32[32,32], index: 12, kind: input, shape index: {}]   ;;  %s9609_s13 = inlined_call_operand.vmem [shape: f32[32,32], index: 13, kind: input, shape index: {}]   ;;  %s9610_s14 = inlined_call_operand.vmem [shape: f32[32,64], index: 14, kind: input, shape index: {}]   ;;  %s9611_s15 = inlined_call_operand.vmem [shape: f32[32,32], index: 15, kind: input, shape index: {}]   ;;  %s9612_s16 = inlined_call_operand.vmem [shape: f32[32,64], index: 16, kind: input, shape index: {}]   ;;  %s9613_s17 = inlined_call_operand.vmem [shape: f32[64,32], index: 17, kind: input, shape index: {}]   ;;  %s9614_s18 = inlined_call_operand.vmem [shape: f32[32,64], index: 18, kind: input, shape index: {}]   ;;  %s9615_s19 = inlined_call_operand.vmem [shape: s32[2,1,5], index: 19, kind: output, shape index: {}]   ;;  %s9616_s1 = inlined_call_operand.vmem [shape: s32[2], index: 1, kind: input, shape index: {}]  }
   0x1   :  { %9644 = sst [smem:[#allocation17_spill]] %s9597_s0  ;;  %s28_s22 = sshll.u32 %s9616_s1, 4  ;;  %s29_s22 = int_to_ptr.vmem [resolvable:$true] %s28_s22 }
   0x2   :  { %9645 = sst [smem:[#allocation18_spill]] %s9598_s2 }
   0x3   :  { %9646 = sst [smem:[#allocation19_spill]] %s9599_s3 }
   0x4   :  { %9647 = sst [smem:[#allocation20_spill]] %s9600_s4 }
   0x5   :  { %9648 = sst [smem:[#allocation21_spill]] %s9607_s11 }
   0x6   :  { %9649 = sst [smem:[#allocation22_spill]] %s9608_s12 }
   0x7   :  { %9650 = sst [smem:[#allocation23_spill]] %s9609_s13 }
   0x8   :  { %9651 = sst [smem:[#allocation24_spill]] %s9611_s15 }
   0x9   :  { %9652 = sst [smem:[#allocation25_spill]] %s9612_s16 }
   0xa   :  { %9653 = sst [smem:[#allocation26_spill]] %s9613_s17 }
   0xb   :  { %9654 = sst [smem:[#allocation27_spill]] %s9614_s18 }
   0xc   :  { %9655 = sst [smem:[#allocation28_spill]] %s9615_s19 }
   0xd   :  { %s9656_s20 = sld [smem:[#allocation17_spill]] }
  0x13   :  { %s24_s13 = sshll.u32 %s9656_s20, 4  ;;  %s25_s13 = int_to_ptr.vmem [resolvable:$true] %s24_s13 }
  0x14   :  { %s7821_s3 = scalar_lea.vmem %s25_s13, 32  ;;  %p7826_p1 = scmp.lt.s32.totalorder %s25_s13, %s25_s13 }
  0x15   :  { %p7822_p0 = scmp.ne.s32.totalorder %s25_s13, %s7821_s3  ;;  %p7827_p2 = scmp.lt.s32.totalorder %s7821_s3, %s7821_s3 }
  0x17   :  { %p7828_p3 = por %p7827_p2, %p7826_p1 }
  0x19   :  { %p7829_p4 = pnand %p7828_p3, %p7822_p0 }
  0x1b   :  { %7832 = shalt.err (!%p7829_p4)  }
  0x1c   :  { %s7855_s23 = smov [#allocation5]   ;;  %s7833_s24 = scalar_lea.vmem %s29_s22, 16 }
  0x1d   :  { %27 = dma.vmem_to_smem %s25_s13, 32, %s7855_s23, [#allocation4] }
  0x1e   :  { %p7834_p5 = scmp.ne.s32.totalorder %s29_s22, %s7833_s24  ;;  %p7838_p6 = scmp.lt.s32.totalorder %s29_s22, %s29_s22 }
  0x1f   :  { %p7839_p7 = scmp.lt.s32.totalorder %s7833_s24, %s7833_s24 }
  0x21   :  { %p7840_p8 = por %p7839_p7, %p7838_p6 }
  0x23   :  { %p7841_p9 = pnand %p7840_p8, %p7834_p5 }
  0x25   :  { %7844 = shalt.err (!%p7841_p9)  }
  0x26   :  { %s7856_s25 = smov [#allocation6]  }
  0x27   :  { %31 = dma.vmem_to_smem %s29_s22, 16, %s7856_s25, [#allocation4] }
  0x28   :  { %7849 = dma.done.wait [#allocation4], 48 }
  0x29   :  { %7850 = vsyncadd [#allocation4], 4294967248 }
  0x2a   :  { %33 = sfence }
  0x2b   :  { %s7971_s1 = smov 0  }
  0x2c LB: > { %9657 = sst [smem:[#allocation8_spill]] %s7853_s1  ;;  %s7977_s13 = sadd.s32 4294967295, %s7853_s1   ;;  %s7853_s1 = sphi %s7971_s1, %s39_s1  }
  0x2d   : > { %p6623_p10 = scmp.ge.s32.totalorder %s7853_s1, 1  ;;  %p497_p11 = scmp.lt.s32.totalorder %s7853_s1, 3 }
  0x2f   : > { %p498_p12 = pnand %p6623_p10, %p497_p11 }
  0x31   : > { %501 = sbr.rel (%p498_p12) target bundleno = 21912 (0x5598), region = 88 }
  0x36   : > { %s6624_s4 = sshll.u32 %s7977_s13, 7  ;;  %s9658_s19 = sld [smem:[#allocation20_spill]]  ;;  %vm699_vm0 = vcmask 1040384   ;;  %vm701_vm1 = vcmask 1041408   ;;  %vm703_vm2 = vcmask 1042432   ;;  %vm9640_vm3 = vcmask 1043456  }
  0x37   : > { %s647_s26 = sld [smem:[#allocation5 + %s6624_s4]]  ;;  %s650_s27 = sadd.s32 1, %s6624_s4  ;;  %vm707_vm4 = vcmask 1044480   ;;  %vm709_vm5 = vcmask 1045504   ;;  %vm711_vm6 = vcmask 1046528   ;;  %v559_v19 = vld [vmem:[%s9601_s5] sm:$0xff]  ;;  %v896_v50 = vlaneseq }
  0x38   : > { %s651_s28 = sld [smem:[#allocation5 + %s650_s27]]  ;;  %s654_s29 = sadd.s32 2, %s6624_s4  ;;  %vm714_vm7 = vcmask 261120   ;;  %v564_v30 = vld [vmem:[%s9603_s7 + $0x18] sm:$0xff]  ;;  %v9638_v31 = vmov 0.0   ;;  %v563_v32 = vld [vmem:[%s9603_s7 + $0x10] sm:$0xff] }
  0x39   : > { %s655_s0 = sld [smem:[#allocation5 + %s654_s29]]  ;;  %s658_s30 = sadd.s32 3, %s6624_s4  ;;  %7007 = vmatprep.subr.mxu0 %v9638_v31  ;;  %vm7858_vm8 = vmmov 0   ;;  %7018 = vmatprep.subr.mxu1 %v9638_v31  ;;  %v562_v33 = vld [vmem:[%s9603_s7 + $0x8] sm:$0xff]  ;;  %v561_v34 = vld [vmem:[%s9603_s7] sm:$0xff]  ;;  %vm819_vm9 = vcmask 130048  }
  0x3a   : > { %s659_s20 = sld [smem:[#allocation5 + %s658_s30]]  ;;  %s662_s21 = sadd.s32 4, %s6624_s4  ;;  %7015 = vmatprep.mubr.msk.f32.mxu0 %vm7858_vm8, %v9638_v31  ;;  %7008 = vmatpush3.msra.mxu0 %v564_v30  ;;  %v897_v52 = vshrl.u32 %v896_v50, 7  ;;  %vm902_vm11 = vcmask 64512   ;;  %vm1350_vm12 = vcmask 523264   ;;  %vm1538_vm13 = vcmask 253952  }
  0x3b   : > { %s663_s2 = sld [smem:[#allocation5 + %s662_s21]]  ;;  %s666_s22 = sadd.s32 5, %s6624_s4  ;;  %7009 = vmatprep.subr.mxu0 %v9638_v31  ;;  %7020 = vmatprep.mubr.msk.f32.mxu1 %vm7858_vm8, %v9638_v31  ;;  %vm1631_vm14 = vcmask 122880   ;;  %vm1886_vm15 = vcmask 57344  }
  0x3c   : > { %s667_s3 = sld [smem:[#allocation5 + %s666_s22]]  ;;  %s670_s23 = sadd.s32 6, %s6624_s4  ;;  %7010 = vmatpush3.msra.mxu0 %v563_v32  ;;  %v898_v53 = vsub.s32 0, %v897_v52 }
  0x3d   : > { %s648_s1 = scalar_lea.vmem %s9658_s19, %s647_s26  ;;  %s671_s18 = sld [smem:[#allocation5 + %s670_s23]]  ;;  %7011 = vmatprep.subr.mxu0 %v9638_v31 }
  0x3e   : > { %s652_s15 = scalar_lea.vmem %s9658_s19, %s651_s28  ;;  %s674_s12 = sadd.s32 7, %s6624_s4  ;;  %v649_v0 = vld [vmem:[%s648_s1] sm:$0x1]  ;;  %7012 = vmatpush3.msra.mxu0 %v562_v33 }
  0x3f   : > { %v653_v1 = vld [vmem:[%s652_s15] sm:$0x1]  ;;  %s656_s30 = scalar_lea.vmem %s9658_s19, %s655_s0  ;;  %s675_s21 = sld [smem:[#allocation5 + %s674_s12]]  ;;  %7013 = vmatprep.subr.mxu0 %v9638_v31 }
  0x40   : > { %v657_v2 = vld [vmem:[%s656_s30] sm:$0x1]  ;;  %s660_s24 = scalar_lea.vmem %s9658_s19, %s659_s20  ;;  %v679_v3 = vrot.slane %v653_v1, 7  ;;  %7014 = vmatpush3.msra.mxu0 %v561_v34  ;;  %s7859_s4 = smov 64  }
  0x41   : > { %v661_v4 = vld [vmem:[%s660_s24] sm:$0x1]  ;;  %s664_s17 = scalar_lea.vmem %s9658_s19, %s663_s2  ;;  %v682_v5 = vrot.slane %v657_v2, 6  ;;  %7038 = vmatprep.subr.mxu0 %v9638_v31  ;;  %p545_p13 = scmp.lt.s32.totalorder %s7977_s13, 1 }
  0x42   : > { %v665_v6 = vld [vmem:[%s664_s17] sm:$0x1]  ;;  %s668_s12 = scalar_lea.vmem %s9658_s19, %s667_s3  ;;  %v685_v7 = vrot.slane %v661_v4, 5  ;;  %v700_v8 = vsel %vm699_vm0, %v649_v0, %v679_v3  ;;  %s9659_s17 = sld [smem:[#allocation19_spill]]  ;;  %vm2481_vm0 = vcmask 516096  }
  0x43   : > { %v669_v9 = vld [vmem:[%s668_s12] sm:$0x1]  ;;  %s672_s28 = scalar_lea.vmem %s9658_s19, %s671_s18  ;;  %v688_v10 = vrot.slane %v665_v6, 4  ;;  %v702_v11 = vsel %vm701_vm1, %v700_v8, %v682_v5  ;;  %s9660_s18 = sld [smem:[#allocation18_spill]] }
  0x44   : > { %v673_v12 = vld [vmem:[%s672_s28] sm:$0x1]  ;;  %v691_v13 = vrot.slane %v669_v9, 3  ;;  %v704_v14 = vsel %vm703_vm2, %v702_v11, %v685_v7  ;;  %s7860_s28 = smov 96   ;;  %s7861_s23 = smov 80  }
  0x45   : > { %s676_s2 = scalar_lea.vmem %s9658_s19, %s675_s21  ;;  %v694_v15 = vrot.slane %v673_v12, 2  ;;  %v706_v16 = vsel %vm9640_vm3, %v704_v14, %v688_v10  ;;  %s7862_s25 = smov 112  }
  0x46   : > { %v677_v17 = vld [vmem:[%s676_s2] sm:$0x1]  ;;  %v708_v18 = vsel %vm707_vm4, %v706_v16, %v691_v13  ;;  %s8066_s0 = scalar_select %p545_p13, %s7977_s13, 1 }
  0x47   : > { %v697_v20 = vrot.slane %v677_v17, 1  ;;  %v710_v21 = vsel %vm709_vm5, %v708_v18, %v694_v15  ;;  %s7863_s27 = smov 48   ;;  %s7864_s1 = smov 16  }
  0x48   : > { %v6625_v39 = vld [vmem:[%s9659_s17] ss:$0 sm:$0xff]  ;;  %v6626_v41 = vld [vmem:[%s9659_s17 + $0x1] ss:$0 sm:$0xff]  ;;  %v6627_v44 = vld [vmem:[%s9659_s17 + $0x2] ss:$0 sm:$0xff] }
  0x49   : > { %v712_v22 = vsel %vm711_vm6, %v710_v21, %v697_v20  ;;  %s547_s3 = scalar_lea.vmem %s9660_s18, %s8066_s0  ;;  %v6636_v33 = vld [vmem:[%s9659_s17 + $0x3] ss:$0 sm:$0xff]  ;;  %v6637_v52 = vld [vmem:[%s9659_s17 + $0x4] ss:$0 sm:$0xff]  ;;  %s8190_s18 = sld [smem:[#allocation6 + %s7977_s13]]  ;;  %vm2745_vm6 = vcmask 8192  }
  0x4a   : > { %v713_v23 = vadd.f32 %v712_v22, %v559_v19  ;;  %v643_v51 = vld [vmem:[%s547_s3] sm:$0x1]  ;;  %s9661_s13 = sld [smem:[#allocation21_spill]] }
  0x4b   : > { %vm644_vm10 = vcmp.eq.s32.totalorder %v643_v51, 1  ;;  %s9662_s26 = sld [smem:[#allocation22_spill]] }
  0x4c   : > { %v715_v24 = vsel %vm714_vm7, %v713_v23, 0.0  ;;  %v8074_v54 = vsel %vm644_vm10, -1e+09, %v9638_v31  ;;  %s9663_s12 = sld [smem:[#allocation23_spill]]  ;;  %vm2758_vm10 = vcmask 15360  }
  0x4d   : > { %716 = vadd.xlane.f32.xlu0 %v715_v24  ;;  %v899_v55 = vrot.slane %v8074_v54, %v898_v53  ;;  %v567_v24 = vld [vmem:[%s9604_s8 + $0x10] sm:$0xff]  ;;  %s9664_s3 = sld [smem:[#allocation24_spill]] }
  0x4e   : > { %s9665_s29 = sld [smem:[#allocation25_spill]] }
  0x4f   : > { %s1535_s30 = scalar_lea.vmem %s9658_s19, %s8190_s18  ;;  %s9666_s24 = sld [smem:[#allocation26_spill]] }
  0x50   : > { %s9667_s2 = sld [smem:[#allocation27_spill]] }
  0xd6   : > { %v717_v25 = vpop.xlane.xlu0 %716 }
  0xd7   : > { %v719_v26 = vmul.f32 0.03125, %v717_v25  ;;  %v566_v25 = vld [vmem:[%s9604_s8 + $0x8] sm:$0xff] }
  0xd9   : > { %v720_v27 = vsub.f32 %v713_v23, %v719_v26  ;;  %v568_v23 = vld [vmem:[%s9604_s8 + $0x18] sm:$0xff]  ;;  %v565_v26 = vld [vmem:[%s9604_s8] sm:$0xff] }
  0xdb   : > { %v721_v28 = vmul.f32 %v720_v27, %v720_v27 }
  0xdd   : > { %v722_v29 = vsel %vm714_vm7, %v721_v28, 0.0 }
  0xde   : > { %723 = vadd.xlane.f32.xlu0 %v722_v29 }
 0x167   : > { %v724_v35 = vpop.xlane.xlu0 %723 }
 0x168   : > { %v725_v36 = vmul.f32 0.03125, %v724_v35 }
 0x16a   : > { %v726_v37 = vadd.f32 1e-05, %v725_v36 }
 0x16c   : > { %7653 = vrsqrt.f32 %v726_v37 }
 0x179   : > { %v7654_v38 = vpop.eup %7653 }
 0x17a   : > { %v728_v40 = vmul.f32 %v7654_v38, %v720_v27 }
 0x17c   : > { %v733_v42 = vmul.f32 %v6625_v39, %v728_v40 }
 0x17e   : > { %v8042_v43 = vadd.f32 %v6626_v41, %v733_v42 }
 0x180   : > { %7016 = vmatmul.mubr.msk.f32.vlgmr.msra.gmra.mxu0 %vm714_vm7, %v8042_v43 }
 0x181   : > { %7046 = vmatprep.mubr.msk.f32.mxu0 %vm7858_vm8, %v9638_v31  ;;  %7039 = vmatpush3.msra.mxu0 %v568_v23 }
 0x182   : > { %7040 = vmatprep.subr.mxu0 %v9638_v31 }
 0x183   : > { %7041 = vmatpush3.msra.mxu0 %v567_v24 }
 0x184   : > { %7042 = vmatprep.subr.mxu0 %v9638_v31 }
 0x185   : > { %7043 = vmatpush3.msra.mxu0 %v566_v25 }
 0x186   : > { %7044 = vmatprep.subr.mxu0 %v9638_v31 }
 0x187   : > { %7045 = vmatpush3.msra.mxu0 %v565_v26 }
 0x188   : > { %7060 = vmatprep.subr.mxu0 %v9638_v31 }
 0x240   : > { %v812_v45 = vpop.f32.mrf.mxu0 }
 0x241   : > { %v8051_v46 = vadd.f32 %v6627_v44, %v812_v45  ;;  %v572_v44 = vld [vmem:[%s9605_s9 + $0x18] sm:$0xff]  ;;  %v570_v45 = vld [vmem:[%s9605_s9 + $0x8] sm:$0xff] }
 0x242   : > { %v7017_v47 = vpop.f32.mrf.mxu0 }
 0x243   : > { %914 = vrot.lane.b32.xlu0 %v8051_v46, %s7859_s4  ;;  %817 = vrot.lane.b32.xlu1 %v8051_v46, %s7860_s28 }
 0x2b5   : > { %v818_v48 = vpop.permute.xlu1 %817  ;;  %v915_v49 = vpop.permute.xlu0 %914 }
 0x2b6   : > { %7019 = vmatpush3.xpose.msk.msra.mxu1 %vm819_vm9, %v818_v48 }
 0x2b7   : > { %7023 = vmatprep.subr.mxu1 %v9638_v31 }
 0x2b9   : > { %7021 = vmatmul.mubr.msk.f32.vlgmr.msra.gmra.mxu1 %vm819_vm9, %v8051_v46 }
 0x2ba   : > { %7024 = vmatpush3.msra.mxu1 %v915_v49  ;;  %7025 = vmatprep.mubr.msk.f32.mxu1 %vm7858_vm8, %v9638_v31 }
 0x2bb   : > { %7028 = vmatprep.subr.mxu1 %v9638_v31 }
 0x379   : > { %v890_v56 = vpop.f32.mrf.mxu1 }
 0x37a   : > { %v894_v57 = vmul.f32 0.25, %v890_v56 }
 0x37b   : > { %v7022_v58 = vpop.f32.mrf.mxu1 }
 0x37c   : > { %v901_v59 = vadd.f32 %v899_v55, %v894_v57  ;;  %v580_v58 = vld [vmem:[%s9606_s10 + $0x38] sm:$0xff] }
 0x37e   : > { %v903_v60 = vsel %vm902_vm11, %v901_v59, -inf }
 0x37f   : > { %904 = vmax.xlane.f32.xlu1 %v903_v60  ;;  %v578_v60 = vld [vmem:[%s9606_s10 + $0x28] sm:$0xff] }
 0x408   : > { %v905_v61 = vpop.xlane.xlu1 %904 }
 0x409   : > { %v906_v62 = vsub.f32 %v901_v59, %v905_v61  ;;  %v579_v59 = vld [vmem:[%s9606_s10 + $0x30] sm:$0xff]  ;;  %v577_v61 = vld [vmem:[%s9606_s10 + $0x20] sm:$0xff] }
 0x40b   : > { %v907_v63 = vmul.f32 1.442695, %v906_v62  ;;  %v576_v62 = vld [vmem:[%s9606_s10 + $0x18] sm:$0xff] }
 0x40d   : > { %7655 = vpow2.f32 %v907_v63  ;;  %v575_v63 = vld [vmem:[%s9606_s10 + $0x10] sm:$0xff] }
 0x41a   : > { %v7656_v0 = vpop.eup %7655 }
 0x41b   : > { %v909_v1 = vsel %vm902_vm11, %v7656_v0, 0.0 }
 0x41c   : > { %910 = vadd.xlane.f32.xlu0 %v909_v1  ;;  %v573_v1 = vld [vmem:[%s9606_s10] sm:$0xff] }
 0x432   : > { %992 = vrot.lane.b32.xlu0 %v8051_v46, %s7861_s23 }
 0x436   : > { %990 = vrot.lane.b32.xlu0 %v8051_v46, %s7862_s25 }
 0x4a5   : > { %v911_v2 = vpop.xlane.xlu0 %910 }
 0x4a6   : > { %7657 = vrcp.f32 %v911_v2  ;;  %v6639_v2 = vld [vmem:[%s9659_s17 + $0x6] ss:$0 sm:$0xff] }
 0x4a9   : > { %v993_v4 = vpop.permute.xlu0 %992 }
 0x4ad   : > { %v991_v6 = vpop.permute.xlu0 %990 }
 0x4b3   : > { %v7658_v3 = vpop.eup %7657 }
 0x4b4   : > { %v913_v5 = vmul.f32 %v7658_v3, %v7656_v0  ;;  %v574_v0 = vld [vmem:[%s9606_s10 + $0x8] sm:$0xff] }
 0x4b6   : > { %7026 = vmatmul.mubr.msk.f32.vlgmr.msra.gmra.mxu1 %vm902_vm11, %v913_v5 }
 0x4b7   : > { %7029 = vmatpush3.xpose.msk.msra.mxu1 %vm819_vm9, %v993_v4  ;;  %7030 = vmatprep.mubr.msk.f32.mxu1 %vm7858_vm8, %v9638_v31 }
 0x4b8   : > { %7033 = vmatprep.subr.mxu1 %v9638_v31 }
 0x4ba   : > { %7031 = vmatmul.mubr.msk.f32.vlgmr.msra.gmra.mxu1 %vm819_vm9, %v991_v6 }
 0x4bb   : > { %7035 = vmatprep.mubr.msk.f32.mxu1 %vm7858_vm8, %v9638_v31 }
 0x576   : > { %v986_v7 = vpop.f32.mrf.mxu1 }
 0x578   : > { %v7027_v8 = vpop.f32.mrf.mxu1 }
 0x57a   : > { %v1064_v9 = vpop.f32.mrf.mxu1 }
 0x57b   : > { %v1068_v10 = vmul.f32 0.25, %v1064_v9 }
 0x57c   : > { %v7032_v11 = vpop.f32.mrf.mxu1 }
 0x57d   : > { %v1069_v12 = vadd.f32 %v1068_v10, %v899_v55  ;;  %v6638_v55 = vld [vmem:[%s9659_s17 + $0x5] ss:$0 sm:$0xff] }
 0x57f   : > { %v1070_v13 = vsel %vm902_vm11, %v1069_v12, -inf }
 0x580   : > { %1071 = vmax.xlane.f32.xlu1 %v1070_v13 }
 0x591   : > { %1081 = vrot.lane.b32.xlu1 %v8051_v46, %s7863_s27  ;;  %v569_v46 = vld [vmem:[%s9605_s9] sm:$0xff] }
 0x609   : > { %v1072_v14 = vpop.xlane.xlu1 %1071 }
 0x60a   : > { %v1073_v15 = vsub.f32 %v1069_v12, %v1072_v14 }
 0x60c   : > { %v1074_v16 = vmul.f32 1.442695, %v1073_v15 }
 0x60d   : > { %v1082_v17 = vpop.permute.xlu1 %1081 }
 0x60e   : > { %7659 = vpow2.f32 %v1074_v16  ;;  %7034 = vmatpush3.msra.mxu1 %v1082_v17  ;;  %v6642_v16 = vld [vmem:[%s9659_s17 + $0x7] ss:$0 sm:$0xff]  ;;  %v8202_v17 = vld [vmem:[%s9602_s6] sm:$0xf] }
 0x60f   : > { %7049 = vmatprep.subr.mxu1 %v9638_v31 }
 0x61b   : > { %v7660_v18 = vpop.eup %7659 }
 0x61c   : > { %v1076_v19 = vsel %vm902_vm11, %v7660_v18, 0.0 }
 0x61d   : > { %1077 = vadd.xlane.f32.xlu0 %v1076_v19 }
 0x6a6   : > { %v1078_v20 = vpop.xlane.xlu0 %1077 }
 0x6a7   : > { %7661 = vrcp.f32 %v1078_v20 }
 0x6b4   : > { %v7662_v21 = vpop.eup %7661 }
 0x6b5   : > { %v1080_v22 = vmul.f32 %v7662_v21, %v7660_v18  ;;  %v1536_v18 = vld [vmem:[%s1535_s30] sm:$0x1] }
 0x6b7   : > { %7036 = vmatmul.mubr.msk.f32.vlgmr.msra.gmra.mxu1 %vm902_vm11, %v1080_v22  ;;  %v1537_v22 = vadd.f32 %v1536_v18, %v8202_v17 }
 0x6b8   : > { %7057 = vmatprep.mubr.msk.f32.mxu1 %vm7858_vm8, %v9638_v31  ;;  %7050 = vmatpush3.msra.mxu1 %v572_v44 }
 0x6b9   : > { %7051 = vmatprep.subr.mxu1 %v9638_v31  ;;  %v1539_v24 = vsel %vm1538_vm13, %v1537_v22, 0.0 }
 0x777   : > { %v1153_v27 = vpop.f32.mrf.mxu1 }
 0x778   : > { %1158 = vrot.lane.b32.xlu1 %v1153_v27, %s7864_s1 }
 0x779   : > { %v7037_v28 = vpop.f32.mrf.mxu1 }
 0x7ea   : > { %v1159_v29 = vpop.permute.xlu1 %1158 }
 0x7eb   : > { %v1161_v30 = vsel %vm819_vm9, %v986_v7, %v1159_v29 }
 0x7ec   : > { %7047 = vmatmul.mubr.msk.f32.vlgmr.msra.gmra.mxu0 %vm714_vm7, %v1161_v30 }
 0x7ed   : > { %7076 = vmatprep.mubr.msk.f32.mxu0 %vm7858_vm8, %v9638_v31  ;;  %7061 = vmatpush3.msra.mxu0 %v580_v58  ;;  %v8245_v58 = vld [vmem:[%s9661_s13 + $0x10] sm:$0xff] }
 0x7ee   : > { %7062 = vmatprep.subr.mxu0 %v9638_v31 }
 0x7ef   : > { %7063 = vmatpush3.msra.mxu0 %v579_v59  ;;  %v8254_v59 = vld [vmem:[%s9661_s13 + $0x8] sm:$0xff] }
 0x7f0   : > { %7064 = vmatprep.subr.mxu0 %v9638_v31 }
 0x7f1   : > { %7065 = vmatpush3.msra.mxu0 %v578_v60 }
 0x7f2   : > { %7066 = vmatprep.subr.mxu0 %v9638_v31 }
 0x7f3   : > { %7067 = vmatpush3.msra.mxu0 %v577_v61  ;;  %v8261_v61 = vld [vmem:[%s9659_s17 + $0xb] sm:$0x1] }
 0x7f4   : > { %7068 = vmatprep.subr.mxu0 %v9638_v31 }
 0x7f5   : > { %7069 = vmatpush3.msra.mxu0 %v576_v62  ;;  %v8267_v62 = vld [vmem:[%s9661_s13] sm:$0xff] }
 0x7f6   : > { %7070 = vmatprep.subr.mxu0 %v9638_v31 }
 0x7f7   : > { %7071 = vmatpush3.msra.mxu0 %v575_v63 }
 0x7f8   : > { %7072 = vmatprep.subr.mxu0 %v9638_v31 }
 0x7f9   : > { %7073 = vmatpush3.msra.mxu0 %v574_v0  ;;  %v8280_v0 = vld [vmem:[%s9662_s26 + $0x18] sm:$0xff] }
 0x7fa   : > { %7074 = vmatprep.subr.mxu0 %v9638_v31 }
 0x7fb   : > { %7075 = vmatpush3.msra.mxu0 %v573_v1  ;;  %v8285_v1 = vld [vmem:[%s9662_s26 + $0x10] sm:$0xff] }
 0x7fc   : > { %7101 = vmatprep.subr.mxu0 %v9638_v31 }
 0x8ac   : > { %v1231_v32 = vpop.f32.mrf.mxu0 }
 0x8ad   : > { %v1235_v34 = vadd.f32 %v1231_v32, %v8042_v43  ;;  %v571_v43 = vld [vmem:[%s9605_s9 + $0x10] sm:$0xff] }
 0x8ae   : > { %v7048_v35 = vpop.f32.mrf.mxu0  ;;  %7052 = vmatpush3.msra.mxu1 %v571_v43 }
 0x8af   : > { %v1240_v36 = vadd.f32 %v6636_v33, %v1235_v34  ;;  %7053 = vmatprep.subr.mxu1 %v9638_v31 }
 0x8b0   : > { %7054 = vmatpush3.msra.mxu1 %v570_v45 }
 0x8b1   : > { %v1241_v37 = vsel %vm714_vm7, %v1240_v36, 0.0  ;;  %7055 = vmatprep.subr.mxu1 %v9638_v31 }
 0x8b2   : > { %1242 = vadd.xlane.f32.xlu1 %v1241_v37  ;;  %7056 = vmatpush3.msra.mxu1 %v569_v46  ;;  %v595_v37 = vld [vmem:[%s9610_s14 + $0x10] sm:$0xff] }
 0x8b3   : > { %7079 = vmatprep.subr.mxu1 %v9638_v31 }
 0x93b   : > { %v1243_v38 = vpop.xlane.xlu1 %1242 }
 0x93c   : > { %v1244_v39 = vmul.f32 0.03125, %v1243_v38  ;;  %v594_v38 = vld [vmem:[%s9610_s14 + $0x8] sm:$0xff] }
 0x93e   : > { %v1245_v40 = vsub.f32 %v1240_v36, %v1244_v39  ;;  %v596_v36 = vld [vmem:[%s9610_s14 + $0x18] sm:$0xff]  ;;  %v593_v39 = vld [vmem:[%s9610_s14] sm:$0xff] }
 0x940   : > { %v1246_v41 = vmul.f32 %v1245_v40, %v1245_v40 }
 0x942   : > { %v1247_v42 = vsel %vm714_vm7, %v1246_v41, 0.0 }
 0x943   : > { %1248 = vadd.xlane.f32.xlu0 %v1247_v42 }
 0x9cc   : > { %v1249_v47 = vpop.xlane.xlu0 %1248 }
 0x9cd   : > { %v1250_v48 = vmul.f32 0.03125, %v1249_v47  ;;  %v6643_v47 = vld [vmem:[%s9659_s17 + $0x8] ss:$0 sm:$0xff] }
 0x9cf   : > { %v1251_v49 = vadd.f32 1e-05, %v1250_v48 }
 0x9d1   : > { %7663 = vrsqrt.f32 %v1251_v49  ;;  %v6644_v49 = vld [vmem:[%s9659_s17 + $0x9] ss:$0 sm:$0xff] }
 0x9de   : > { %v7664_v51 = vpop.eup %7663 }
 0x9df   : > { %v1253_v53 = vmul.f32 %v7664_v51, %v1245_v40 }
 0x9e1   : > { %v1258_v56 = vmul.f32 %v6637_v52, %v1253_v53 }
 0x9e3   : > { %v1263_v57 = vadd.f32 %v6638_v55, %v1258_v56  ;;  %v8234_v55 = vld [vmem:[%s9661_s13 + $0x18] sm:$0xff] }
 0x9e5   : > { %7058 = vmatmul.mubr.msk.f32.vlgmr.msra.gmra.mxu1 %vm714_vm7, %v1263_v57 }
 0x9e6   : > { %7087 = vmatprep.mubr.msk.f32.mxu1 %vm7858_vm8, %v9638_v31  ;;  %7080 = vmatpush3.msra.mxu1 %v596_v36  ;;  %v8373_v36 = vld [vmem:[%s9659_s17 + $0xf] sm:$0x1] }
 0x9e7   : > { %7081 = vmatprep.subr.mxu1 %v9638_v31 }
 0x9e8   : > { %7082 = vmatpush3.msra.mxu1 %v595_v37 }
 0x9e9   : > { %7083 = vmatprep.subr.mxu1 %v9638_v31 }
 0x9ea   : > { %7084 = vmatpush3.msra.mxu1 %v594_v38 }
 0x9eb   : > { %7085 = vmatprep.subr.mxu1 %v9638_v31 }
 0x9ec   : > { %7086 = vmatpush3.msra.mxu1 %v593_v39  ;;  %v8386_v39 = vld [vmem:[%s9659_s17 + $0x10] sm:$0x1] }
 0x9ed   : > { %7090 = vmatprep.subr.mxu1 %v9638_v31 }
 0xaa5   : > { %v1337_v3 = vpop.f32.mrf.mxu1 }
 0xaa6   : > { %v1338_v4 = vadd.f32 %v6639_v2, %v1337_v3  ;;  %v8292_v2 = vld [vmem:[%s9662_s26 + $0x8] sm:$0xff]  ;;  %v8299_v3 = vld [vmem:[%s9662_s26] sm:$0xff] }
 0xaa7   : > { %v7059_v5 = vpop.f32.mrf.mxu1 }
 0xaa8   : > { %v1341_v6 = vmul.f32 %v1338_v4, %v1338_v4 }
 0xaaa   : > { %v1342_v7 = vmul.f32 %v1341_v6, %v1338_v4  ;;  %v8308_v6 = vld [vmem:[%s9659_s17 + $0xc] sm:$0x1] }
 0xaac   : > { %v1343_v8 = vmul.f32 0.044715, %v1342_v7 }
 0xaae   : > { %v1344_v9 = vadd.f32 %v1343_v8, %v1338_v4 }
 0xab0   : > { %v1345_v10 = vmul.f32 0.7978846, %v1344_v9 }
 0xab2   : > { %7665 = vtanh.f32 %v1345_v10  ;;  %v6645_v10 = vld [vmem:[%s9659_s17 + $0x11] ss:$0 sm:$0xff] }
 0xabf   : > { %v7666_v11 = vpop.eup %7665 }
 0xac0   : > { %v1347_v12 = vadd.f32 1.0, %v7666_v11 }
 0xac2   : > { %v1348_v13 = vmul.f32 0.5, %v1347_v12 }
 0xac4   : > { %v1349_v14 = vmul.f32 %v1348_v13, %v1338_v4 }
 0xac6   : > { %7077 = vmatmul.mubr.msk.f32.vlgmr.msra.gmra.mxu0 %vm1350_vm12, %v1349_v14  ;;  %v8330_v14 = vld [vmem:[%s9659_s17 + $0xd] sm:$0x1] }
 0xac7   : > { %7109 = vmatprep.mubr.msk.f32.mxu0 %vm7858_vm8, %v9638_v31  ;;  %7102 = vmatpush3.msra.mxu0 %v8280_v0 }
 0xac8   : > { %7103 = vmatprep.subr.mxu0 %v9638_v31 }
 0xac9   : > { %7104 = vmatpush3.msra.mxu0 %v8285_v1 }
 0xaca   : > { %7105 = vmatprep.subr.mxu0 %v9638_v31 }
 0xacb   : > { %7106 = vmatpush3.msra.mxu0 %v8292_v2 }
 0xacc   : > { %7107 = vmatprep.subr.mxu0 %v9638_v31 }
 0xacd   : > { %7108 = vmatpush3.msra.mxu0 %v8299_v3 }
 0xace   : > { %7123 = vmatprep.subr.mxu0 %v9638_v31 }
 0xb86   : > { %v1420_v15 = vpop.f32.mrf.mxu0 }
 0xb87   : > { %v1424_v19 = vadd.f32 %v1420_v15, %v1263_v57  ;;  %v8239_v57 = vld [vmem:[%s9659_s17 + $0xa] sm:$0x1] }
 0xb88   : > { %v7078_v20 = vpop.f32.mrf.mxu0 }
 0xb89   : > { %v1429_v21 = vadd.f32 %v6642_v16, %v1424_v19 }
 0xb8b   : > { %v1430_v23 = vsel %vm714_vm7, %v1429_v21, 0.0 }
 0xb8c   : > { %1431 = vadd.xlane.f32.xlu0 %v1430_v23 }
 0xb90   : > { %1540 = vadd.xlane.f32.xlu0 %v1539_v24 }
 0xc15   : > { %v1432_v25 = vpop.xlane.xlu0 %1431 }
 0xc16   : > { %v1433_v26 = vmul.f32 0.03125, %v1432_v25  ;;  %v8340_v25 = vld [vmem:[%s9663_s12 + $0x18] sm:$0xff] }
 0xc18   : > { %v1434_v27 = vsub.f32 %v1429_v21, %v1433_v26  ;;  %v8346_v26 = vld [vmem:[%s9663_s12 + $0x10] sm:$0xff] }
 0xc19   : > { %v1541_v28 = vpop.xlane.xlu0 %1540 }
 0xc1a   : > { %v1542_v29 = vmul.f32 0.03125, %v1541_v28  ;;  %v1435_v30 = vmul.f32 %v1434_v27, %v1434_v27  ;;  %v8359_v28 = vld [vmem:[%s9663_s12] sm:$0xff] }
 0xc1c   : > { %v1543_v32 = vsub.f32 %v1537_v22, %v1542_v29  ;;  %v1436_v33 = vsel %vm714_vm7, %v1435_v30, 0.0 }
 0xc1d   : > { %1437 = vadd.xlane.f32.xlu0 %v1436_v33 }
 0xc1e   : > { %v1544_v34 = vmul.f32 %v1543_v32, %v1543_v32 }
 0xc20   : > { %v1545_v35 = vsel %vm1538_vm13, %v1544_v34, 0.0  ;;  %v8368_v34 = vld [vmem:[%s9659_s17 + $0xe] sm:$0x1] }
 0xc21   : > { %1546 = vadd.xlane.f32.xlu0 %v1545_v35 }
 0xca6   : > { %v1438_v40 = vpop.xlane.xlu0 %1437 }
 0xca7   : > { %v1439_v41 = vmul.f32 0.03125, %v1438_v40 }
 0xca9   : > { %v1440_v42 = vadd.f32 1e-05, %v1439_v41 }
 0xcaa   : > { %v1547_v44 = vpop.xlane.xlu0 %1546 }
 0xcab   : > { %7667 = vrsqrt.f32 %v1440_v42  ;;  %v1548_v43 = vmul.f32 0.03125, %v1547_v44 }
 0xcad   : > { %v1549_v45 = vadd.f32 1e-05, %v1548_v43 }
 0xcaf   : > { %7669 = vrsqrt.f32 %v1549_v45 }
 0xcb8   : > { %v7668_v46 = vpop.eup %7667 }
 0xcb9   : > { %v1442_v48 = vmul.f32 %v7668_v46, %v1434_v27  ;;  %v8352_v27 = vld [vmem:[%s9663_s12 + $0x8] sm:$0xff] }
 0xcbb   : > { %v1447_v51 = vmul.f32 %v6643_v47, %v1442_v48 }
 0xcbc   : > { %v7670_v52 = vpop.eup %7669 }
 0xcbd   : > { %v1452_v53 = vadd.f32 %v6644_v49, %v1447_v51  ;;  %v1551_v56 = vmul.f32 %v7670_v52, %v1543_v32 }
 0xcbf   : > { %7088 = vmatmul.mubr.msk.f32.vlgmr.msra.gmra.mxu1 %vm714_vm7, %v1452_v53  ;;  %v1552_v60 = vmul.f32 %v1551_v56, %v8239_v57 }
 0xcc0   : > { %7091 = vmatpush3.msra.mxu1 %v8234_v55  ;;  %7098 = vmatprep.mubr.msk.f32.mxu1 %vm7858_vm8, %v9638_v31 }
 0xcc1   : > { %7092 = vmatprep.subr.mxu1 %v9638_v31  ;;  %v1553_v63 = vadd.f32 %v1552_v60, %v8261_v61 }
 0xcc2   : > { %7093 = vmatpush3.msra.mxu1 %v8245_v58 }
 0xcc3   : > { %7094 = vmatprep.subr.mxu1 %v9638_v31 }
 0xcc4   : > { %7095 = vmatpush3.msra.mxu1 %v8254_v59 }
 0xcc5   : > { %7096 = vmatprep.subr.mxu1 %v9638_v31 }
 0xcc6   : > { %7097 = vmatpush3.msra.mxu1 %v8267_v62 }
 0xcc7   : > { %7099 = vmatmul.mubr.msk.f32.vlgmr.msra.gmra.mxu1 %vm714_vm7, %v1553_v63  ;;  %7112 = vmatprep.subr.mxu1 %v9638_v31 }
 0xcc8   : > { %7120 = vmatprep.mubr.msk.f32.mxu1 %vm7858_vm8, %v9638_v31  ;;  %7113 = vmatpush3.msra.mxu1 %v8340_v25 }
 0xcc9   : > { %7114 = vmatprep.subr.mxu1 %v9638_v31 }
 0xcca   : > { %7115 = vmatpush3.msra.mxu1 %v8346_v26 }
 0xccb   : > { %7116 = vmatprep.subr.mxu1 %v9638_v31 }
 0xccc   : > { %7117 = vmatpush3.msra.mxu1 %v8352_v27 }
 0xccd   : > { %7118 = vmatprep.subr.mxu1 %v9638_v31 }
 0xcce   : > { %7119 = vmatpush3.msra.mxu1 %v8359_v28 }
 0xccf   : > { %7128 = vmatprep.subr.mxu1 %v9638_v31 }
 0xd7f   : > { %v1526_v4 = vpop.f32.mrf.mxu1 }
 0xd80   : > { %v8318_v11 = vadd.f32 %v6645_v10, %v1526_v4 }
 0xd81   : > { %v7089_v5 = vpop.f32.mrf.mxu1 }
 0xd87   : > { %v1623_v7 = vpop.f32.mrf.mxu1 }
 0xd88   : > { %v8311_v8 = vadd.f32 %v1623_v7, %v8308_v6 }
 0xd89   : > { %v7100_v9 = vpop.f32.mrf.mxu1 }
 0xd8a   : > { %1633 = vrot.lane.b32.xlu0 %v8311_v8, %s7859_s4 }
 0xdfc   : > { %v1634_v12 = vpop.permute.xlu0 %1633 }
 0xdfd   : > { %1636 = vst.msk [vmem:[#allocation3] sm:$0x1] %vm1631_vm14, %v1634_v12  ;;  %7110 = vmatmul.mubr.msk.f32.vlgmr.msra.gmra.mxu0 %vm714_vm7, %v1634_v12 }
 0xdfe   : > { %7124 = vmatpush3.xpose.msk.msra.mxu0 %vm819_vm9, %v8318_v11  ;;  %7125 = vmatprep.mubr.msk.f32.mxu0 %vm7858_vm8, %v9638_v31 }
 0xdff   : > { %7133 = vmatprep.subr.mxu0 %v9638_v31 }
 0xebd   : > { %v1714_v13 = vpop.f32.mrf.mxu0 }
 0xebe   : > { %v1718_v15 = vadd.f32 %v1714_v13, %v1553_v63 }
 0xebf   : > { %v7111_v16 = vpop.f32.mrf.mxu0 }
 0xec0   : > { %v1719_v18 = vadd.f32 %v1718_v15, %v8330_v14 }
 0xec2   : > { %v1720_v19 = vsel %vm1538_vm13, %v1719_v18, 0.0 }
 0xec3   : > { %1721 = vadd.xlane.f32.xlu1 %v1720_v19 }
 0xf4c   : > { %v1722_v20 = vpop.xlane.xlu1 %1721 }
 0xf4d   : > { %v1723_v21 = vmul.f32 0.03125, %v1722_v20 }
 0xf4f   : > { %v1724_v22 = vsub.f32 %v1719_v18, %v1723_v21 }
 0xf51   : > { %v1725_v23 = vmul.f32 %v1724_v22, %v1724_v22 }
 0xf53   : > { %v1726_v24 = vsel %vm1538_vm13, %v1725_v23, 0.0 }
 0xf54   : > { %1727 = vadd.xlane.f32.xlu1 %v1726_v24 }
 0xf65   : > { %1976 = vrot.lane.b32.xlu1 %v8318_v11, %s7862_s25 }
 0xfdd   : > { %v1728_v29 = vpop.xlane.xlu1 %1727 }
 0xfde   : > { %v1729_v30 = vmul.f32 0.03125, %v1728_v29 }
 0xfe0   : > { %v1730_v32 = vadd.f32 1e-05, %v1729_v30  ;;  %v8428_v30 = vld [vmem:[%s9664_s3 + $0x18] sm:$0xff] }
 0xfe1   : > { %v8389_v44 = vpop.permute.xlu1 %1976 }
 0xfe2   : > { %7671 = vrsqrt.f32 %v1730_v32  ;;  %v8433_v32 = vld [vmem:[%s9664_s3 + $0x10] sm:$0xff] }
 0xfef   : > { %v7672_v33 = vpop.eup %7671 }
 0xff0   : > { %v1732_v35 = vmul.f32 %v7672_v33, %v1724_v22  ;;  %v8440_v33 = vld [vmem:[%s9664_s3 + $0x8] sm:$0xff] }
 0xff2   : > { %v1733_v37 = vmul.f32 %v1732_v35, %v8368_v34  ;;  %v8449_v35 = vld [vmem:[%s9664_s3] sm:$0xff] }
 0xff4   : > { %v8377_v38 = vadd.f32 %v1733_v37, %v8373_v36 }
 0xff6   : > { %7121 = vmatmul.mubr.msk.f32.vlgmr.msra.gmra.mxu1 %vm714_vm7, %v8377_v38 }
 0xff7   : > { %7130 = vmatprep.mubr.msk.f32.mxu1 %vm7858_vm8, %v9638_v31 }
0x10b6   : > { %v1804_v40 = vpop.f32.mrf.mxu1 }
0x10b7   : > { %v1805_v41 = vadd.f32 %v1804_v40, %v8386_v39 }
0x10b8   : > { %v7122_v42 = vpop.f32.mrf.mxu1 }
0x10b9   : > { %1974 = vrot.lane.b32.xlu0 %v1805_v41, %s7862_s25  ;;  %7126 = vmatmul.mubr.msk.f32.vlgmr.msra.gmra.mxu0 %vm819_vm9, %v1805_v41 }
0x10ba   : > { %7134 = vmatpush3.xpose.msk.msra.mxu0 %vm819_vm9, %v8389_v44  ;;  %7135 = vmatprep.mubr.msk.f32.mxu0 %vm7858_vm8, %v9638_v31 }
0x10bb   : > { %7143 = vmatprep.subr.mxu0 %v9638_v31 }
0x112b   : > { %v1975_v43 = vpop.permute.xlu0 %1974 }
0x112c   : > { %7136 = vmatmul.mubr.msk.f32.vlgmr.msra.gmra.mxu0 %vm819_vm9, %v1975_v43 }
0x112d   : > { %7151 = vmatprep.mubr.msk.f32.mxu0 %vm7858_vm8, %v9638_v31  ;;  %7144 = vmatpush3.msra.mxu0 %v8428_v30 }
0x112e   : > { %7145 = vmatprep.subr.mxu0 %v9638_v31 }
0x112f   : > { %7146 = vmatpush3.msra.mxu0 %v8433_v32 }
0x1130   : > { %7147 = vmatprep.subr.mxu0 %v9638_v31 }
0x1131   : > { %7148 = vmatpush3.msra.mxu0 %v8440_v33 }
0x1132   : > { %7149 = vmatprep.subr.mxu0 %v9638_v31 }
0x1133   : > { %7150 = vmatpush3.msra.mxu0 %v8449_v35 }
0x1134   : > { %7165 = vmatprep.subr.mxu0 %v9638_v31 }
0x1179   : > { %v1880_v45 = vpop.f32.mrf.mxu0 }
0x117a   : > { %v1884_v46 = vmul.f32 0.25, %v1880_v45 }
0x117b   : > { %v7127_v47 = vpop.f32.mrf.mxu0 }
0x117c   : > { %v1885_v48 = vadd.f32 %v1884_v46, %v8074_v54  ;;  %v8461_v47 = vld [vmem:[%s9659_s17 + $0x12] sm:$0x1] }
0x117e   : > { %v1887_v49 = vsel %vm1886_vm15, %v1885_v48, -inf }
0x117f   : > { %1888 = vmax.xlane.f32.xlu0 %v1887_v49 }
0x11ec   : > { %v2048_v51 = vpop.f32.mrf.mxu0 }
0x11ed   : > { %v2052_v52 = vmul.f32 0.25, %v2048_v51 }
0x11ee   : > { %v7137_v53 = vpop.f32.mrf.mxu0 }
0x11ef   : > { %v2053_v56 = vadd.f32 %v2052_v52, %v8074_v54 }
0x11f1   : > { %v2054_v60 = vsel %vm1886_vm15, %v2053_v56, -inf }
0x11f2   : > { %2055 = vmax.xlane.f32.xlu1 %v2054_v60 }
0x1203   : > { %2065 = vrot.lane.b32.xlu1 %v8318_v11, %s7861_s23 }
0x1208   : > { %v1889_v63 = vpop.xlane.xlu0 %1888 }
0x1209   : > { %v1890_v4 = vsub.f32 %v1885_v48, %v1889_v63 }
0x120b   : > { %v1891_v5 = vmul.f32 1.442695, %v1890_v4 }
0x120d   : > { %7673 = vpow2.f32 %v1891_v5  ;;  %v8470_v5 = vld [vmem:[%s9665_s29 + $0x18] sm:$0xff] }
0x121a   : > { %v7674_v7 = vpop.eup %7673 }
0x121b   : > { %v1893_v9 = vsel %vm1886_vm15, %v7674_v7, 0.0 }
0x121c   : > { %1894 = vadd.xlane.f32.xlu0 %v1893_v9  ;;  %v8489_v9 = vld [vmem:[%s9665_s29] sm:$0xff] }
0x127b   : > { %v2056_v10 = vpop.xlane.xlu1 %2055 }
0x127c   : > { %v2057_v12 = vsub.f32 %v2053_v56, %v2056_v10 }
0x127e   : > { %v2058_v13 = vmul.f32 1.442695, %v2057_v12 }
0x127f   : > { %v8414_v23 = vpop.permute.xlu1 %2065 }
0x1280   : > { %7675 = vpow2.f32 %v2058_v13 }
0x128d   : > { %v7676_v15 = vpop.eup %7675 }
0x128e   : > { %v2060_v16 = vsel %vm1886_vm15, %v7676_v15, 0.0 }
0x128f   : > { %2061 = vadd.xlane.f32.xlu0 %v2060_v16  ;;  %v8498_v16 = vld [vmem:[%s9659_s17 + $0x13] sm:$0x1] }
0x12a5   : > { %1898 = vrot.lane.b32.xlu0 %v8318_v11, %s7860_s28  ;;  %v1895_v18 = vpop.xlane.xlu0 %1894 }
0x12a6   : > { %7677 = vrcp.f32 %v1895_v18 }
0x12b3   : > { %v7678_v20 = vpop.eup %7677 }
0x12b4   : > { %v1897_v22 = vmul.f32 %v7678_v20, %v7674_v7  ;;  %v8482_v7 = vld [vmem:[%s9665_s29 + $0x8] sm:$0xff] }
0x1318   : > { %v2062_v19 = vpop.xlane.xlu0 %2061 }
0x1319   : > { %7679 = vrcp.f32 %v2062_v19  ;;  %v8503_v19 = vld [vmem:[%s9659_s17 + $0x14] sm:$0x1] }
0x131c   : > { %v8411_v21 = vpop.permute.xlu0 %1898 }
0x131d   : > { %7129 = vmatpush3.msra.mxu1 %v8411_v21 }
0x131e   : > { %7131 = vmatmul.mubr.msk.f32.vlgmr.msra.gmra.mxu1 %vm902_vm11, %v1897_v22  ;;  %7138 = vmatprep.subr.mxu1 %v9638_v31 }
0x131f   : > { %7139 = vmatpush3.msra.mxu1 %v8414_v23  ;;  %7140 = vmatprep.mubr.msk.f32.mxu1 %vm7858_vm8, %v9638_v31 }
0x1320   : > { %7154 = vmatprep.subr.mxu1 %v9638_v31 }
0x1326   : > { %v7680_v24 = vpop.eup %7679 }
0x1327   : > { %v2064_v29 = vmul.f32 %v7680_v24, %v7676_v15  ;;  %v8513_v24 = vld [vmem:[%s9666_s24 + $0x38] sm:$0xff] }
0x1329   : > { %7141 = vmatmul.mubr.msk.f32.vlgmr.msra.gmra.mxu1 %vm902_vm11, %v2064_v29  ;;  %v8520_v29 = vld [vmem:[%s9666_s24 + $0x30] sm:$0xff] }
0x132a   : > { %7162 = vmatprep.mubr.msk.f32.mxu1 %vm7858_vm8, %v9638_v31  ;;  %7155 = vmatpush3.msra.mxu1 %v8470_v5 }
0x132b   : > { %7156 = vmatprep.subr.mxu1 %v9638_v31 }
0x13de   : > { %v1970_v37 = vpop.f32.mrf.mxu1 }
0x13e0   : > { %v7132_v40 = vpop.f32.mrf.mxu1 }
0x13e1   : > { %v8534_v40 = vld [vmem:[%s9666_s24 + $0x20] sm:$0xff] }
0x13e9   : > { %v2137_v41 = vpop.f32.mrf.mxu1 }
0x13ea   : > { %2142 = vrot.lane.b32.xlu1 %v2137_v41, %s7864_s1  ;;  %v8541_v41 = vld [vmem:[%s9666_s24 + $0x18] sm:$0xff] }
0x13eb   : > { %v7142_v42 = vpop.f32.mrf.mxu1 }
0x13ec   : > { %v8548_v42 = vld [vmem:[%s9666_s24 + $0x10] sm:$0xff] }
0x145c   : > { %v2143_v43 = vpop.permute.xlu1 %2142 }
0x145d   : > { %v2145_v45 = vsel %vm819_vm9, %v1970_v37, %v2143_v43  ;;  %v8527_v37 = vld [vmem:[%s9666_s24 + $0x28] sm:$0xff] }
0x145e   : > { %7152 = vmatmul.mubr.msk.f32.vlgmr.msra.gmra.mxu0 %vm714_vm7, %v2145_v45  ;;  %v8555_v43 = vld [vmem:[%s9666_s24 + $0x8] sm:$0xff]  ;;  %v8561_v45 = vld [vmem:[%s9666_s24] sm:$0xff] }
0x145f   : > { %7181 = vmatprep.mubr.msk.f32.mxu0 %vm7858_vm8, %v9638_v31  ;;  %7166 = vmatpush3.msra.mxu0 %v8513_v24 }
0x1460   : > { %7167 = vmatprep.subr.mxu0 %v9638_v31 }
0x1461   : > { %7168 = vmatpush3.msra.mxu0 %v8520_v29 }
0x1462   : > { %7169 = vmatprep.subr.mxu0 %v9638_v31 }
0x1463   : > { %7170 = vmatpush3.msra.mxu0 %v8527_v37 }
0x1464   : > { %7171 = vmatprep.subr.mxu0 %v9638_v31 }
0x1465   : > { %7172 = vmatpush3.msra.mxu0 %v8534_v40 }
0x1466   : > { %7173 = vmatprep.subr.mxu0 %v9638_v31 }
0x1467   : > { %7174 = vmatpush3.msra.mxu0 %v8541_v41 }
0x1468   : > { %7175 = vmatprep.subr.mxu0 %v9638_v31 }
0x1469   : > { %7176 = vmatpush3.msra.mxu0 %v8548_v42 }
0x146a   : > { %7177 = vmatprep.subr.mxu0 %v9638_v31 }
0x146b   : > { %7178 = vmatpush3.msra.mxu0 %v8555_v43 }
0x146c   : > { %7179 = vmatprep.subr.mxu0 %v9638_v31 }
0x146d   : > { %7180 = vmatpush3.msra.mxu0 %v8561_v45 }
0x146e   : > { %7214 = vmatprep.subr.mxu0 %v9638_v31 }
0x151e   : > { %v2215_v46 = vpop.f32.mrf.mxu0 }
0x151f   : > { %v2219_v48 = vadd.f32 %v2215_v46, %v8377_v38  ;;  %v8476_v38 = vld [vmem:[%s9665_s29 + $0x10] sm:$0xff] }
0x1520   : > { %v7153_v49 = vpop.f32.mrf.mxu0  ;;  %7157 = vmatpush3.msra.mxu1 %v8476_v38  ;;  %v8569_v46 = vld [vmem:[%s9659_s17 + $0x15] sm:$0x1] }
0x1521   : > { %v2220_v51 = vadd.f32 %v2219_v48, %v8461_v47  ;;  %7158 = vmatprep.subr.mxu1 %v9638_v31 }
0x1522   : > { %7159 = vmatpush3.msra.mxu1 %v8482_v7 }
0x1523   : > { %v2221_v52 = vsel %vm1538_vm13, %v2220_v51, 0.0  ;;  %7160 = vmatprep.subr.mxu1 %v9638_v31 }
0x1524   : > { %2222 = vadd.xlane.f32.xlu0 %v2221_v52  ;;  %7161 = vmatpush3.msra.mxu1 %v8489_v9 }
0x1525   : > { %7184 = vmatprep.subr.mxu1 %v9638_v31 }
0x15ad   : > { %v2223_v53 = vpop.xlane.xlu0 %2222 }
0x15ae   : > { %v2224_v56 = vmul.f32 0.03125, %v2223_v53 }
0x15b0   : > { %v2225_v60 = vsub.f32 %v2220_v51, %v2224_v56 }
0x15b2   : > { %v2226_v63 = vmul.f32 %v2225_v60, %v2225_v60 }
0x15b4   : > { %v2227_v4 = vsel %vm1538_vm13, %v2226_v63, 0.0 }
0x15b5   : > { %2228 = vadd.xlane.f32.xlu1 %v2227_v4 }
0x163e   : > { %v2229_v10 = vpop.xlane.xlu1 %2228 }
0x163f   : > { %v2230_v12 = vmul.f32 0.03125, %v2229_v10 }
0x1641   : > { %v2231_v13 = vadd.f32 1e-05, %v2230_v12 }
0x1643   : > { %7681 = vrsqrt.f32 %v2231_v13 }
0x1650   : > { %v7682_v15 = vpop.eup %7681 }
0x1651   : > { %v2233_v18 = vmul.f32 %v7682_v15, %v2225_v60 }
0x1653   : > { %v2234_v20 = vmul.f32 %v2233_v18, %v8498_v16 }
0x1655   : > { %v2235_v22 = vadd.f32 %v2234_v20, %v8503_v19 }
0x1657   : > { %7163 = vmatmul.mubr.msk.f32.vlgmr.msra.gmra.mxu1 %vm714_vm7, %v2235_v22 }
0x1658   : > { %7192 = vmatprep.mubr.msk.f32.mxu1 %vm7858_vm8, %v9638_v31 }
0x1717   : > { %v2305_v48 = vpop.f32.mrf.mxu1 }
0x1718   : > { %v2306_v49 = vadd.f32 %v2305_v48, %v8569_v46 }
0x1719   : > { %v7164_v51 = vpop.f32.mrf.mxu1 }
0x171a   : > { %v2309_v52 = vmul.f32 %v2306_v49, %v2306_v49 }
0x171c   : > { %v2310_v53 = vmul.f32 %v2309_v52, %v2306_v49 }
0x171e   : > { %v2311_v56 = vmul.f32 0.044715, %v2310_v53  ;;  %v8594_v53 = vld [vmem:[%s9667_s2 + $0x18] sm:$0xff] }
0x171f   : > { %7185 = vmatpush3.msra.mxu1 %v8594_v53 }
0x1720   : > { %v2312_v60 = vadd.f32 %v2311_v56, %v2306_v49  ;;  %7186 = vmatprep.subr.mxu1 %v9638_v31  ;;  %v8606_v56 = vld [vmem:[%s9667_s2 + $0x8] sm:$0xff] }
0x1722   : > { %v2313_v63 = vmul.f32 0.7978846, %v2312_v60  ;;  %v8613_v60 = vld [vmem:[%s9667_s2] sm:$0xff] }
0x1724   : > { %7683 = vtanh.f32 %v2313_v63 }
0x1731   : > { %v7684_v4 = vpop.eup %7683 }
0x1732   : > { %v2315_v10 = vadd.f32 1.0, %v7684_v4 }
0x1734   : > { %v2316_v12 = vmul.f32 0.5, %v2315_v10 }
0x1736   : > { %v2317_v13 = vmul.f32 %v2316_v12, %v2306_v49 }
0x1738   : > { %7182 = vmatmul.mubr.msk.f32.vlgmr.msra.gmra.mxu0 %vm1350_vm12, %v2317_v13  ;;  %v8622_v13 = vld [vmem:[%s9659_s17 + $0x17] sm:$0x1] }
0x1739   : > { %7215 = vmatpush3.msra.mxu0 %v8234_v55  ;;  %7222 = vmatprep.mubr.msk.f32.mxu0 %vm7858_vm8, %v9638_v31  ;;  %v8586_v55 = vld [vmem:[%s9659_s17 + $0x16] sm:$0x1] }
0x173a   : > { %7216 = vmatprep.subr.mxu0 %v9638_v31 }
0x173b   : > { %7217 = vmatpush3.msra.mxu0 %v8245_v58 }
0x173c   : > { %7218 = vmatprep.subr.mxu0 %v9638_v31 }
0x173d   : > { %7219 = vmatpush3.msra.mxu0 %v8254_v59 }
0x173e   : > { %7220 = vmatprep.subr.mxu0 %v9638_v31 }
0x173f   : > { %7221 = vmatpush3.msra.mxu0 %v8267_v62 }
0x1740   : > { %7225 = vmatprep.subr.mxu0 %v9638_v31 }
0x17f8   : > { %v2387_v15 = vpop.f32.mrf.mxu0 }
0x17f9   : > { %v2391_v18 = vadd.f32 %v2387_v15, %v2235_v22  ;;  %v8600_v22 = vld [vmem:[%s9667_s2 + $0x10] sm:$0xff] }
0x17fa   : > { %v7183_v20 = vpop.f32.mrf.mxu0  ;;  %7187 = vmatpush3.msra.mxu1 %v8600_v22 }
0x17fb   : > { %v2392_v58 = vadd.f32 %v2391_v18, %v8586_v55  ;;  %7188 = vmatprep.subr.mxu1 %v9638_v31  ;;  %v8627_v18 = vld [vmem:[%s9659_s17 + $0x18] sm:$0x1] }
0x17fc   : > { %7189 = vmatpush3.msra.mxu1 %v8606_v56 }
0x17fd   : > { %v2393_v48 = vsel %vm1538_vm13, %v2392_v58, 0.0  ;;  %7190 = vmatprep.subr.mxu1 %v9638_v31 }
0x17fe   : > { %2394 = vadd.xlane.f32.xlu0 %v2393_v48  ;;  %7191 = vmatpush3.msra.mxu1 %v8613_v60  ;;  %v8637_v48 = vld [vmem:[%s9659_s17 + $0x19] sm:$0x1] }
0x17ff   : > { %7195 = vmatprep.subr.mxu1 %v9638_v31  ;;  %9668 = vst [vmem:[#allocation9_spill] sm:$0xff] %v8637_v48 }
0x1887   : > { %v2395_v59 = vpop.xlane.xlu0 %2394 }
0x1888   : > { %v2396_v49 = vmul.f32 0.03125, %v2395_v59 }
0x188a   : > { %v2397_v51 = vsub.f32 %v2392_v58, %v2396_v49 }
0x188c   : > { %v2398_v52 = vmul.f32 %v2397_v51, %v2397_v51 }
0x188e   : > { %v2399_v62 = vsel %vm1538_vm13, %v2398_v52, 0.0 }
0x188f   : > { %2400 = vadd.xlane.f32.xlu0 %v2399_v62  ;;  %v8644_v62 = vld [vmem:[%s9658_s19 + $0x38] sm:$0xff] }
0x1918   : > { %v2401_v63 = vpop.xlane.xlu0 %2400 }
0x1919   : > { %v2402_v4 = vmul.f32 0.03125, %v2401_v63  ;;  %v8649_v63 = vld [vmem:[%s9658_s19 + $0x30] sm:$0xff] }
0x191b   : > { %v2403_v10 = vadd.f32 1e-05, %v2402_v4  ;;  %v8656_v4 = vld [vmem:[%s9658_s19 + $0x28] sm:$0xff] }
0x191d   : > { %7685 = vrsqrt.f32 %v2403_v10  ;;  %v8663_v10 = vld [vmem:[%s9658_s19 + $0x20] sm:$0xff] }
0x192a   : > { %v7686_v12 = vpop.eup %7685 }
0x192b   : > { %v2405_v15 = vmul.f32 %v7686_v12, %v2397_v51  ;;  %v8670_v12 = vld [vmem:[%s9658_s19 + $0x18] sm:$0xff] }
0x192c   : > { %9669 = vst [vmem:[#allocation10_spill] sm:$0xff] %v8670_v12 }
0x192d   : > { %v2406_v20 = vmul.f32 %v2405_v15, %v8622_v13  ;;  %v8677_v15 = vand.u32 127, %v896_v50  ;;  %v8694_v50 = vld [vmem:[%s9658_s19 + $0x8] sm:$0xff] }
0x192e   : > { %9673 = vst [vmem:[#allocation14_spill] sm:$0xff] %v8694_v50 }
0x192f   : > { %v2407_v58 = vadd.f32 %v2406_v20, %v8627_v18  ;;  %9670 = vst [vmem:[#allocation11_spill] sm:$0xff] %v8677_v15  ;;  %v8680_v20 = vcvt.s32.f32 %v8677_v15 }
0x1931   : > { %7193 = vmatmul.mubr.msk.f32.vlgmr.msra.gmra.mxu1 %vm714_vm7, %v2407_v58  ;;  %9671 = vst [vmem:[#allocation12_spill] sm:$0xff] %v8680_v20 }
0x1932   : > { %7211 = vmatprep.mubr.msk.f32.mxu1 %vm7858_vm8, %v9638_v31  ;;  %7196 = vmatpush3.msra.mxu1 %v8644_v62 }
0x1933   : > { %7197 = vmatprep.subr.mxu1 %v9638_v31 }
0x1934   : > { %7198 = vmatpush3.msra.mxu1 %v8649_v63 }
0x1935   : > { %7199 = vmatprep.subr.mxu1 %v9638_v31 }
0x1936   : > { %7200 = vmatpush3.msra.mxu1 %v8656_v4 }
0x1937   : > { %7201 = vmatprep.subr.mxu1 %v9638_v31 }
0x1938   : > { %7202 = vmatpush3.msra.mxu1 %v8663_v10 }
0x1939   : > { %7203 = vmatprep.subr.mxu1 %v9638_v31 }
0x193a   : > { %7204 = vmatpush3.msra.mxu1 %v8670_v12 }
0x193b   : > { %7205 = vmatprep.subr.mxu1 %v9638_v31 }
0x19f1   : > { %v2477_v59 = vpop.f32.mrf.mxu1 }
0x19f2   : > { %v2478_v49 = vadd.f32 %v2477_v59, %v8637_v48  ;;  %v2496_v48 = vrot.slane %v8202_v17, 1 }
0x19f3   : > { %v7194_v51 = vpop.f32.mrf.mxu1 }
0x19f4   : > { %v2482_v52 = vsel %vm2481_vm0, %v2478_v49, -inf }
0x19f5   : > { %2483 = vmax.xlane.f32.xlu0 %v2482_v52  ;;  %v8687_v52 = vld [vmem:[%s9658_s19 + $0x10] sm:$0xff] }
0x19f6   : > { %9672 = vst [vmem:[#allocation13_spill] sm:$0xff] %v8687_v52  ;;  %7206 = vmatpush3.msra.mxu1 %v8687_v52 }
0x19f7   : > { %7207 = vmatprep.subr.mxu1 %v9638_v31 }
0x19f8   : > { %7208 = vmatpush3.msra.mxu1 %v8694_v50 }
0x19f9   : > { %7209 = vmatprep.subr.mxu1 %v9638_v31 }
0x1a7e   : > { %v2484_v58 = vpop.xlane.xlu0 %2483 }
0x1a7f   : > { %vm2485_vm4 = vcmp.ge.f32.partialorder %v2478_v49, %v2484_v58  ;;  %v8700_v49 = vld [vmem:[%s9658_s19] sm:$0xff] }
0x1a80   : > { %v2486_v59 = vsel %vm2485_vm4, %v8680_v20, 64.0  ;;  %9674 = vst [vmem:[#allocation15_spill] sm:$0xff] %v8700_v49  ;;  %7210 = vmatpush3.msra.mxu1 %v8700_v49  ;;  %vm6559_vm4 = vcmask 7168  }
0x1a81   : > { %v2487_v51 = vsel %vm2481_vm0, %v2486_v59, inf  ;;  %7230 = vmatprep.subr.mxu1 %v9638_v31 }
0x1a82   : > { %2488 = vmin.xlane.f32.xlu1 %v2487_v51 }
0x1b0b   : > { %v2489_v58 = vpop.xlane.xlu1 %2488 }
0x1b0c   : > { %v7627_v59 = vtrunc.f32 %v2489_v58 }
0x1b0e   : > { %v8705_v51 = vcvt.f32.s32 %v7627_v59 }
0x1b10   : > { %9675 = vst [vmem:[#allocation16_spill] sm:$0xff] %v8705_v51  ;;  %vm2492_vm5 = vcmp.eq.s32.totalorder %v8677_v15, %v8705_v51 }
0x1b11   : > { %v6660_v20 = vsel %vm2492_vm5, 1.0, %v9638_v31 }
0x1b12   : > { %7212 = vmatmul.mubr.msk.f32.vlgmr.msra.gmra.mxu1 %vm1350_vm12, %v6660_v20 }
0x1b13   : > { %7232 = vmatprep.mubr.msk.f32.mxu1 %vm7858_vm8, %v9638_v31 }
0x1bd2   : > { %v2567_v50 = vpop.f32.mrf.mxu1 }
0x1bd3   : > { %v2568_v49 = vadd.f32 %v2567_v50, %v2496_v48 }
0x1bd4   : > { %v7213_v52 = vpop.f32.mrf.mxu1 }
0x1bd5   : > { %v2571_v12 = vsel %vm1538_vm13, %v2568_v49, 0.0 }
0x1bd6   : > { %2572 = vadd.xlane.f32.xlu0 %v2571_v12 }
0x1bec   : > { %1628 = vrot.lane.b32.xlu0 %v8311_v8, %s7860_s28 }
0x1c5f   : > { %v2573_v58 = vpop.xlane.xlu0 %2572 }
0x1c60   : > { %v2574_v59 = vmul.f32 0.03125, %v2573_v58 }
0x1c62   : > { %v2575_v15 = vsub.f32 %v2568_v49, %v2574_v59 }
0x1c63   : > { %v1629_v51 = vpop.permute.xlu0 %1628 }
0x1c64   : > { %1632 = vst.msk [vmem:[#allocation2] sm:$0x1] %vm1631_vm14, %v1629_v51  ;;  %v2576_v20 = vmul.f32 %v2575_v15, %v2575_v15 }
0x1c66   : > { %v2577_v31 = vsel %vm1538_vm13, %v2576_v20, 0.0 }
0x1c67   : > { %2578 = vadd.xlane.f32.xlu1 %v2577_v31  ;;  %v9676_v31 = vmov 0.0  }
0x1c78   : > { %1637 = vrot.lane.b32.xlu1 %v8311_v8, %s7861_s23 }
0x1cf0   : > { %v2579_v17 = vpop.xlane.xlu1 %2578 }
0x1cf1   : > { %v2580_v48 = vmul.f32 0.03125, %v2579_v17 }
0x1cf3   : > { %v2581_v52 = vadd.f32 1e-05, %v2580_v48 }
0x1cf4   : > { %v1638_v12 = vpop.permute.xlu1 %1637 }
0x1cf5   : > { %7687 = vrsqrt.f32 %v2581_v52  ;;  %1640 = vst.msk [vmem:[#allocation2 + $0x8] sm:$0x1] %vm1631_vm14, %v1638_v12 }
0x1d02   : > { %v7688_v50 = vpop.eup %7687 }
0x1d03   : > { %v2583_v58 = vmul.f32 %v7688_v50, %v2575_v15 }
0x1d05   : > { %v2584_v49 = vmul.f32 %v2583_v58, %v8239_v57 }
0x1d07   : > { %v8724_v51 = vadd.f32 %v2584_v49, %v8261_v61 }
0x1d09   : > { %7223 = vmatmul.mubr.msk.f32.vlgmr.msra.gmra.mxu0 %vm714_vm7, %v8724_v51 }
0x1d0a   : > { %7227 = vmatprep.mubr.msk.f32.mxu0 %vm7858_vm8, %v9676_v31 }
0x1dc9   : > { %v2655_v59 = vpop.f32.mrf.mxu0 }
0x1dca   : > { %v2656_v20 = vadd.f32 %v2655_v59, %v8308_v6 }
0x1dcb   : > { %v7224_v17 = vpop.f32.mrf.mxu0 }
0x1dcc   : > { %2844 = vrot.lane.b32.xlu0 %v2656_v20, %s7862_s25  ;;  %2660 = vrot.lane.b32.xlu1 %v2656_v20, %s7860_s28 }
0x1dd0   : > { %2835 = vrot.lane.b32.xlu1 %v2656_v20, %s7861_s23 }
0x1e3e   : > { %v2661_v57 = vpop.permute.xlu1 %2660  ;;  %v2845_v48 = vpop.permute.xlu0 %2844 }
0x1e3f   : > { %2663 = vst.msk [vmem:[#allocation2 + $0x1] sm:$0x1] %vm1631_vm14, %v2661_v57 }
0x1e42   : > { %v2836_v61 = vpop.permute.xlu1 %2835 }
0x1e43   : > { %2838 = vst.msk [vmem:[#allocation2 + $0x9] sm:$0x1] %vm1631_vm14, %v2836_v61 }
0x1e46   : > { %v2668_v15 = vld [vmem:[#allocation2] sm:$0x3] }
0x1e47   : > { %7226 = vmatpush3.xpose.msk.msra.mxu0 %vm819_vm9, %v2668_v15 }
0x1e48   : > { %7235 = vmatprep.subr.mxu0 %v9676_v31 }
0x1e4a   : > { %7228 = vmatmul.mubr.msk.f32.vlgmr.msra.gmra.mxu0 %vm819_vm9, %v2656_v20  ;;  %v2843_v6 = vld [vmem:[#allocation2 + $0x8] sm:$0x3] }
0x1e4b   : > { %7236 = vmatpush3.xpose.msk.msra.mxu0 %vm819_vm9, %v2843_v6  ;;  %7237 = vmatprep.mubr.msk.f32.mxu0 %vm7858_vm8, %v9676_v31 }
0x1e4c   : > { %7245 = vmatprep.subr.mxu0 %v9676_v31 }
0x1e4e   : > { %7238 = vmatmul.mubr.msk.f32.vlgmr.msra.gmra.mxu0 %vm819_vm9, %v2845_v48 }
0x1e4f   : > { %7246 = vmatpush3.msra.mxu0 %v8280_v0  ;;  %7253 = vmatprep.mubr.msk.f32.mxu0 %vm7858_vm8, %v9676_v31 }
0x1e50   : > { %7247 = vmatprep.subr.mxu0 %v9676_v31 }
0x1e51   : > { %7248 = vmatpush3.msra.mxu0 %v8285_v1 }
0x1e52   : > { %7249 = vmatprep.subr.mxu0 %v9676_v31 }
0x1e53   : > { %7250 = vmatpush3.msra.mxu0 %v8292_v2 }
0x1e54   : > { %7251 = vmatprep.subr.mxu0 %v9676_v31 }
0x1e55   : > { %7252 = vmatpush3.msra.mxu0 %v8299_v3 }
0x1e56   : > { %7267 = vmatprep.subr.mxu0 %v9676_v31 }
0x1f0a   : > { %v2740_v52 = vpop.f32.mrf.mxu0 }
0x1f0b   : > { %v2744_v0 = vmul.f32 0.25, %v2740_v52 }
0x1f0c   : > { %v7229_v12 = vpop.f32.mrf.mxu0 }
0x1f0d   : > { %v2746_v50 = vsel %vm2745_vm6, %v2744_v0, -inf }
0x1f0e   : > { %2747 = vmax.xlane.f32.xlu1 %v2746_v50  ;;  %v2917_v58 = vpop.f32.mrf.mxu0 }
0x1f0f   : > { %v2921_v49 = vmul.f32 0.25, %v2917_v58 }
0x1f10   : > { %v7239_v1 = vpop.f32.mrf.mxu0 }
0x1f11   : > { %v2922_v59 = vsel %vm2745_vm6, %v2921_v49, -inf }
0x1f12   : > { %2923 = vmax.xlane.f32.xlu0 %v2922_v59 }
0x1f1f   : > { %2664 = vrot.lane.b32.xlu1 %v2656_v20, %s7859_s4 }
0x1f23   : > { %2839 = vrot.lane.b32.xlu1 %v2656_v20, %s7863_s27 }
0x1f97   : > { %v2748_v2 = vpop.xlane.xlu1 %2747 }
0x1f98   : > { %v2749_v3 = vsub.f32 %v2744_v0, %v2748_v2 }
0x1f9a   : > { %v2750_v17 = vmul.f32 1.442695, %v2749_v3 }
0x1f9b   : > { %v2665_v57 = vpop.permute.xlu1 %2664  ;;  %v2924_v61 = vpop.xlane.xlu0 %2923 }
0x1f9c   : > { %7689 = vpow2.f32 %v2750_v17  ;;  %2667 = vst.msk [vmem:[#allocation3 + $0x1] sm:$0x1] %vm1631_vm14, %v2665_v57  ;;  %v2925_v15 = vsub.f32 %v2921_v49, %v2924_v61 }
0x1f9e   : > { %v2926_v6 = vmul.f32 1.442695, %v2925_v15 }
0x1f9f   : > { %v2840_v48 = vpop.permute.xlu1 %2839 }
0x1fa0   : > { %7691 = vpow2.f32 %v2926_v6  ;;  %2842 = vst.msk [vmem:[#allocation3 + $0x9] sm:$0x1] %vm1631_vm14, %v2840_v48 }
0x1fa3   : > { %v2757_v52 = vld [vmem:[#allocation3] sm:$0x3] }
0x1fa4   : > { %7231 = vmatpush3.msk.msra.mxu1 %vm701_vm1, %v2757_v52 }
0x1fa5   : > { %7240 = vmatprep.subr.mxu1 %v9676_v31 }
0x1fa9   : > { %v7690_v20 = vpop.eup %7689 }
0x1faa   : > { %v2752_v0 = vsel %vm2745_vm6, %v7690_v20, 0.0 }
0x1fab   : > { %2753 = vadd.xlane.f32.xlu0 %v2752_v0 }
0x1fad   : > { %v7692_v12 = vpop.eup %7691 }
0x1fae   : > { %v2928_v50 = vsel %vm2745_vm6, %v7692_v12, 0.0 }
0x1faf   : > { %2929 = vadd.xlane.f32.xlu0 %v2928_v50 }
0x1fc5   : > { %1641 = vrot.lane.b32.xlu0 %v8311_v8, %s7863_s27 }
0x2034   : > { %v2754_v58 = vpop.xlane.xlu0 %2753 }
0x2035   : > { %7693 = vrcp.f32 %v2754_v58 }
0x2038   : > { %v2930_v49 = vpop.xlane.xlu0 %2929 }
0x2039   : > { %7695 = vrcp.f32 %v2930_v49 }
0x203c   : > { %v1642_v1 = vpop.permute.xlu0 %1641 }
0x203d   : > { %1644 = vst.msk [vmem:[#allocation3 + $0x8] sm:$0x1] %vm1631_vm14, %v1642_v1 }
0x2042   : > { %v7694_v59 = vpop.eup %7693 }
0x2043   : > { %v2756_v2 = vmul.f32 %v7694_v59, %v7690_v20 }
0x2044   : > { %v2933_v3 = vld [vmem:[#allocation3 + $0x8] sm:$0x3] }
0x2045   : > { %7233 = vmatmul.mubr.msk.f32.vlgmr.msra.gmra.mxu1 %vm2758_vm10, %v2756_v2 }
0x2046   : > { %v7696_v17 = vpop.eup %7695  ;;  %7241 = vmatpush3.msk.msra.mxu1 %vm701_vm1, %v2933_v3  ;;  %7242 = vmatprep.mubr.msk.f32.mxu1 %vm7858_vm8, %v9676_v31 }
0x2047   : > { %v2932_v8 = vmul.f32 %v7696_v17, %v7692_v12  ;;  %7256 = vmatprep.subr.mxu1 %v9676_v31 }
0x2049   : > { %7243 = vmatmul.mubr.msk.f32.vlgmr.msra.gmra.mxu1 %vm2758_vm10, %v2932_v8 }
0x204a   : > { %7257 = vmatpush3.msra.mxu1 %v8340_v25  ;;  %7264 = vmatprep.mubr.msk.f32.mxu1 %vm7858_vm8, %v9676_v31 }
0x204b   : > { %7258 = vmatprep.subr.mxu1 %v9676_v31 }
0x204c   : > { %7259 = vmatpush3.msra.mxu1 %v8346_v26 }
0x204d   : > { %7260 = vmatprep.subr.mxu1 %v9676_v31 }
0x204e   : > { %7261 = vmatpush3.msra.mxu1 %v8352_v27 }
0x204f   : > { %7262 = vmatprep.subr.mxu1 %v9676_v31 }
0x2050   : > { %7263 = vmatpush3.msra.mxu1 %v8359_v28 }
0x2051   : > { %7272 = vmatprep.subr.mxu1 %v9676_v31 }
0x2105   : > { %v2831_v57 = vpop.f32.mrf.mxu1 }
0x2107   : > { %v7234_v61 = vpop.f32.mrf.mxu1 }
0x2109   : > { %v3006_v25 = vpop.f32.mrf.mxu1 }
0x210a   : > { %3011 = vrot.lane.b32.xlu1 %v3006_v25, %s7864_s1 }
0x210b   : > { %v7244_v15 = vpop.f32.mrf.mxu1 }
0x217c   : > { %v3012_v6 = vpop.permute.xlu1 %3011 }
0x217d   : > { %v3014_v48 = vsel %vm819_vm9, %v2831_v57, %v3012_v6 }
0x217e   : > { %7254 = vmatmul.mubr.msk.f32.vlgmr.msra.gmra.mxu0 %vm714_vm7, %v3014_v48 }
0x217f   : > { %7268 = vmatpush3.xpose.msk.msra.mxu0 %vm819_vm9, %v8318_v11  ;;  %7269 = vmatprep.mubr.msk.f32.mxu0 %vm7858_vm8, %v9676_v31 }
0x2180   : > { %7277 = vmatprep.subr.mxu0 %v9676_v31 }
0x223e   : > { %v3084_v26 = vpop.f32.mrf.mxu0 }
0x223f   : > { %v3088_v27 = vadd.f32 %v3084_v26, %v8724_v51 }
0x2240   : > { %v7255_v28 = vpop.f32.mrf.mxu0 }
0x2241   : > { %v3089_v52 = vadd.f32 %v3088_v27, %v8330_v14 }
0x2243   : > { %v3090_v20 = vsel %vm1538_vm13, %v3089_v52, 0.0 }
0x2244   : > { %3091 = vadd.xlane.f32.xlu1 %v3090_v20 }
0x22cd   : > { %v3092_v0 = vpop.xlane.xlu1 %3091 }
0x22ce   : > { %v3093_v12 = vmul.f32 0.03125, %v3092_v0 }
0x22d0   : > { %v3094_v50 = vsub.f32 %v3089_v52, %v3093_v12 }
0x22d2   : > { %v3095_v58 = vmul.f32 %v3094_v50, %v3094_v50 }
0x22d4   : > { %v3096_v49 = vsel %vm1538_vm13, %v3095_v58, 0.0 }
0x22d5   : > { %3097 = vadd.xlane.f32.xlu0 %v3096_v49 }
0x235e   : > { %v3098_v1 = vpop.xlane.xlu0 %3097 }
0x235f   : > { %v3099_v59 = vmul.f32 0.03125, %v3098_v1 }
0x2361   : > { %v3100_v2 = vadd.f32 1e-05, %v3099_v59 }
0x2363   : > { %7697 = vrsqrt.f32 %v3100_v2 }
0x2370   : > { %v7698_v3 = vpop.eup %7697 }
0x2371   : > { %v3102_v17 = vmul.f32 %v7698_v3, %v3094_v50 }
0x2373   : > { %v3103_v51 = vmul.f32 %v3102_v17, %v8368_v34 }
0x2375   : > { %v8797_v14 = vadd.f32 %v3103_v51, %v8373_v36 }
0x2377   : > { %7265 = vmatmul.mubr.msk.f32.vlgmr.msra.gmra.mxu1 %vm714_vm7, %v8797_v14 }
0x2378   : > { %7273 = vmatpush3.msra.mxu1 %v8411_v21  ;;  %7274 = vmatprep.mubr.msk.f32.mxu1 %vm7858_vm8, %v9676_v31 }
0x2379   : > { %7282 = vmatprep.subr.mxu1 %v9676_v31 }
0x2437   : > { %v3174_v8 = vpop.f32.mrf.mxu1 }
0x2438   : > { %v3175_v57 = vadd.f32 %v3174_v8, %v8386_v39 }
0x2439   : > { %v7266_v61 = vpop.f32.mrf.mxu1 }
0x243a   : > { %3337 = vrot.lane.b32.xlu0 %v3175_v57, %s7862_s25  ;;  %7270 = vmatmul.mubr.msk.f32.vlgmr.msra.gmra.mxu0 %vm819_vm9, %v3175_v57 }
0x243b   : > { %7278 = vmatpush3.xpose.msk.msra.mxu0 %vm819_vm9, %v8389_v44  ;;  %7279 = vmatprep.mubr.msk.f32.mxu0 %vm7858_vm8, %v9676_v31 }
0x243c   : > { %7287 = vmatprep.subr.mxu0 %v9676_v31 }
0x24ac   : > { %v3338_v34 = vpop.permute.xlu0 %3337 }
0x24ad   : > { %7280 = vmatmul.mubr.msk.f32.vlgmr.msra.gmra.mxu0 %vm819_vm9, %v3338_v34 }
0x24ae   : > { %7288 = vmatpush3.msra.mxu0 %v8428_v30  ;;  %7295 = vmatprep.mubr.msk.f32.mxu0 %vm7858_vm8, %v9676_v31 }
0x24af   : > { %7289 = vmatprep.subr.mxu0 %v9676_v31 }
0x24b0   : > { %7290 = vmatpush3.msra.mxu0 %v8433_v32 }
0x24b1   : > { %7291 = vmatprep.subr.mxu0 %v9676_v31 }
0x24b2   : > { %7292 = vmatpush3.msra.mxu0 %v8440_v33 }
0x24b3   : > { %7293 = vmatprep.subr.mxu0 %v9676_v31 }
0x24b4   : > { %7294 = vmatpush3.msra.mxu0 %v8449_v35 }
0x24b5   : > { %7309 = vmatprep.subr.mxu0 %v9676_v31 }
0x24fa   : > { %v3247_v36 = vpop.f32.mrf.mxu0 }
0x24fb   : > { %v3251_v39 = vmul.f32 0.25, %v3247_v36 }
0x24fc   : > { %v7271_v30 = vpop.f32.mrf.mxu0 }
0x24fd   : > { %v3252_v25 = vadd.f32 %v3251_v39, %v8074_v54 }
0x24ff   : > { %v3253_v15 = vsel %vm1886_vm15, %v3252_v25, -inf }
0x2500   : > { %3254 = vmax.xlane.f32.xlu1 %v3253_v15 }
0x256d   : > { %v3407_v6 = vpop.f32.mrf.mxu0 }
0x256e   : > { %v3411_v32 = vmul.f32 0.25, %v3407_v6 }
0x256f   : > { %v7281_v48 = vpop.f32.mrf.mxu0 }
0x2570   : > { %v3412_v26 = vadd.f32 %v3411_v32, %v8074_v54 }
0x2572   : > { %v3413_v33 = vsel %vm1886_vm15, %v3412_v26, -inf }
0x2573   : > { %3414 = vmax.xlane.f32.xlu1 %v3413_v33 }
0x2589   : > { %v3255_v27 = vpop.xlane.xlu1 %3254 }
0x258a   : > { %v3256_v35 = vsub.f32 %v3252_v25, %v3255_v27 }
0x258c   : > { %v3257_v28 = vmul.f32 1.442695, %v3256_v35 }
0x258e   : > { %7699 = vpow2.f32 %v3257_v28  ;;  %v8905_v28 = vld [vmem:[%s9661_s13 + $0x8] sm:$0xff] }
0x259b   : > { %v7700_v52 = vpop.eup %7699 }
0x259c   : > { %v3259_v20 = vsel %vm1886_vm15, %v7700_v52, 0.0 }
0x259d   : > { %3260 = vadd.xlane.f32.xlu1 %v3259_v20 }
0x25fc   : > { %v3415_v0 = vpop.xlane.xlu1 %3414 }
0x25fd   : > { %v3416_v12 = vsub.f32 %v3412_v26, %v3415_v0 }
0x25ff   : > { %v3417_v50 = vmul.f32 1.442695, %v3416_v12 }
0x2601   : > { %7701 = vpow2.f32 %v3417_v50 }
0x260e   : > { %v7702_v58 = vpop.eup %7701 }
0x260f   : > { %v3419_v49 = vsel %vm1886_vm15, %v7702_v58, 0.0 }
0x2610   : > { %3420 = vadd.xlane.f32.xlu1 %v3419_v49 }
0x2626   : > { %v3261_v1 = vpop.xlane.xlu1 %3260 }
0x2627   : > { %7703 = vrcp.f32 %v3261_v1 }
0x2634   : > { %v7704_v59 = vpop.eup %7703 }
0x2635   : > { %v3263_v2 = vmul.f32 %v7704_v59, %v7700_v52  ;;  %v8912_v52 = vld [vmem:[%s9661_s13] sm:$0xff] }
0x2637   : > { %7275 = vmatmul.mubr.msk.f32.vlgmr.msra.gmra.mxu1 %vm902_vm11, %v3263_v2 }
0x2638   : > { %7283 = vmatpush3.msra.mxu1 %v8414_v23  ;;  %7284 = vmatprep.mubr.msk.f32.mxu1 %vm7858_vm8, %v9676_v31 }
0x2639   : > { %7298 = vmatprep.subr.mxu1 %v9676_v31 }
0x2699   : > { %v3421_v3 = vpop.xlane.xlu1 %3420 }
0x269a   : > { %7705 = vrcp.f32 %v3421_v3 }
0x26a7   : > { %v7706_v17 = vpop.eup %7705 }
0x26a8   : > { %v3423_v51 = vmul.f32 %v7706_v17, %v7702_v58 }
0x26aa   : > { %7285 = vmatmul.mubr.msk.f32.vlgmr.msra.gmra.mxu1 %vm902_vm11, %v3423_v51 }
0x26ab   : > { %7299 = vmatpush3.msra.mxu1 %v8470_v5  ;;  %7306 = vmatprep.mubr.msk.f32.mxu1 %vm7858_vm8, %v9676_v31 }
0x26ac   : > { %7300 = vmatprep.subr.mxu1 %v9676_v31 }
0x26ad   : > { %7301 = vmatpush3.msra.mxu1 %v8476_v38 }
0x26ae   : > { %7302 = vmatprep.subr.mxu1 %v9676_v31 }
0x26af   : > { %7303 = vmatpush3.msra.mxu1 %v8482_v7 }
0x26b0   : > { %7304 = vmatprep.subr.mxu1 %v9676_v31 }
0x26b1   : > { %7305 = vmatpush3.msra.mxu1 %v8489_v9 }
0x26b2   : > { %7328 = vmatprep.subr.mxu1 %v9676_v31 }
0x26f7   : > { %v3333_v8 = vpop.f32.mrf.mxu1 }
0x26f9   : > { %v7276_v57 = vpop.f32.mrf.mxu1 }
0x276a   : > { %v3493_v5 = vpop.f32.mrf.mxu1 }
0x276b   : > { %3498 = vrot.lane.b32.xlu1 %v3493_v5, %s7864_s1 }
0x276c   : > { %v7286_v61 = vpop.f32.mrf.mxu1 }
0x27dd   : > { %v3499_v34 = vpop.permute.xlu1 %3498 }
0x27de   : > { %v3501_v36 = vsel %vm819_vm9, %v3333_v8, %v3499_v34 }
0x27df   : > { %7296 = vmatmul.mubr.msk.f32.vlgmr.msra.gmra.mxu0 %vm714_vm7, %v3501_v36 }
0x27e0   : > { %7310 = vmatpush3.msra.mxu0 %v8513_v24  ;;  %7325 = vmatprep.mubr.msk.f32.mxu0 %vm7858_vm8, %v9676_v31 }
0x27e1   : > { %7311 = vmatprep.subr.mxu0 %v9676_v31 }
0x27e2   : > { %7312 = vmatpush3.msra.mxu0 %v8520_v29 }
0x27e3   : > { %7313 = vmatprep.subr.mxu0 %v9676_v31 }
0x27e4   : > { %7314 = vmatpush3.msra.mxu0 %v8527_v37 }
0x27e5   : > { %7315 = vmatprep.subr.mxu0 %v9676_v31 }
0x27e6   : > { %7316 = vmatpush3.msra.mxu0 %v8534_v40 }
0x27e7   : > { %7317 = vmatprep.subr.mxu0 %v9676_v31 }
0x27e8   : > { %7318 = vmatpush3.msra.mxu0 %v8541_v41 }
0x27e9   : > { %7319 = vmatprep.subr.mxu0 %v9676_v31 }
0x27ea   : > { %7320 = vmatpush3.msra.mxu0 %v8548_v42 }
0x27eb   : > { %7321 = vmatprep.subr.mxu0 %v9676_v31 }
0x27ec   : > { %7322 = vmatpush3.msra.mxu0 %v8555_v43 }
0x27ed   : > { %7323 = vmatprep.subr.mxu0 %v9676_v31 }
0x27ee   : > { %7324 = vmatpush3.msra.mxu0 %v8561_v45 }
0x27ef   : > { %7358 = vmatprep.subr.mxu0 %v9676_v31 }
0x289f   : > { %v3571_v38 = vpop.f32.mrf.mxu0 }
0x28a0   : > { %v3575_v7 = vadd.f32 %v3571_v38, %v8797_v14 }
0x28a1   : > { %v7297_v9 = vpop.f32.mrf.mxu0 }
0x28a2   : > { %v3576_v24 = vadd.f32 %v3575_v7, %v8461_v47  ;;  %v9682_v9 = vld [vmem:[#allocation12_spill] sm:$0xff] }
0x28a4   : > { %v3577_v29 = vsel %vm1538_vm13, %v3576_v24, 0.0 }
0x28a5   : > { %3578 = vadd.xlane.f32.xlu0 %v3577_v29 }
0x292e   : > { %v3579_v37 = vpop.xlane.xlu0 %3578 }
0x292f   : > { %v3580_v40 = vmul.f32 0.03125, %v3579_v37 }
0x2931   : > { %v3581_v41 = vsub.f32 %v3576_v24, %v3580_v40 }
0x2933   : > { %v3582_v42 = vmul.f32 %v3581_v41, %v3581_v41 }
0x2935   : > { %v3583_v43 = vsel %vm1538_vm13, %v3582_v42, 0.0 }
0x2936   : > { %3584 = vadd.xlane.f32.xlu1 %v3583_v43  ;;  %v9683_v43 = vld [vmem:[#allocation16_spill] sm:$0xff] }
0x2937   : > { %vm2491_vm5 = vcmp.eq.s32.totalorder %v9683_v43, 2 }
0x29bf   : > { %v3585_v39 = vpop.xlane.xlu1 %3584 }
0x29c0   : > { %v3586_v45 = vmul.f32 0.03125, %v3585_v39 }
0x29c2   : > { %v3587_v30 = vadd.f32 1e-05, %v3586_v45 }
0x29c4   : > { %7707 = vrsqrt.f32 %v3587_v30  ;;  %v9684_v30 = vld [vmem:[#allocation11_spill] sm:$0xff] }
0x29d1   : > { %v7708_v25 = vpop.eup %7707 }
0x29d2   : > { %v3589_v15 = vmul.f32 %v7708_v25, %v3581_v41  ;;  %v1534_v41 = vstv %s8190_s18 }
0x29d3   : > { %v6560_v39 = vsel %vm6559_vm4, %v1534_v41, %v9683_v43 }
0x29d4   : > { %v3590_v14 = vmul.f32 %v3589_v15, %v8498_v16 }
0x29d6   : > { %v3591_v47 = vadd.f32 %v3590_v14, %v8503_v19 }
0x29d8   : > { %7307 = vmatmul.mubr.msk.f32.vlgmr.msra.gmra.mxu1 %vm714_vm7, %v3591_v47 }
0x29d9   : > { %7329 = vmatpush3.msra.mxu1 %v8594_v53  ;;  %7336 = vmatprep.mubr.msk.f32.mxu1 %vm7858_vm8, %v9676_v31 }
0x29da   : > { %7330 = vmatprep.subr.mxu1 %v9676_v31 }
0x29db   : > { %7331 = vmatpush3.msra.mxu1 %v8600_v22 }
0x29dc   : > { %7332 = vmatprep.subr.mxu1 %v9676_v31 }
0x29dd   : > { %7333 = vmatpush3.msra.mxu1 %v8606_v56 }
0x29de   : > { %7334 = vmatprep.subr.mxu1 %v9676_v31 }
0x29df   : > { %7335 = vmatpush3.msra.mxu1 %v8613_v60  ;;  %v8889_v60 = vld [vmem:[%s9661_s13 + $0x18] sm:$0xff] }
0x29e0   : > { %7339 = vmatprep.subr.mxu1 %v9676_v31 }
0x2a98   : > { %v3661_v16 = vpop.f32.mrf.mxu1 }
0x2a99   : > { %v3662_v19 = vadd.f32 %v3661_v16, %v8569_v46  ;;  %v8898_v46 = vld [vmem:[%s9661_s13 + $0x10] sm:$0xff] }
0x2a9a   : > { %v7308_v53 = vpop.f32.mrf.mxu1 }
0x2a9b   : > { %v3665_v6 = vmul.f32 %v3662_v19, %v3662_v19 }
0x2a9d   : > { %v3666_v32 = vmul.f32 %v3665_v6, %v3662_v19 }
0x2a9f   : > { %v3667_v48 = vmul.f32 0.044715, %v3666_v32 }
0x2aa1   : > { %v3668_v26 = vadd.f32 %v3667_v48, %v3662_v19 }
0x2aa3   : > { %v3669_v33 = vmul.f32 0.7978846, %v3668_v26 }
0x2aa5   : > { %7709 = vtanh.f32 %v3669_v33 }
0x2ab2   : > { %v7710_v22 = vpop.eup %7709 }
0x2ab3   : > { %v3671_v27 = vadd.f32 1.0, %v7710_v22 }
0x2ab5   : > { %v3672_v35 = vmul.f32 0.5, %v3671_v27 }
0x2ab7   : > { %v3673_v56 = vmul.f32 %v3672_v35, %v3662_v19 }
0x2ab9   : > { %7326 = vmatmul.mubr.msk.f32.vlgmr.msra.gmra.mxu0 %vm1350_vm12, %v3673_v56 }
0x2aba   : > { %7359 = vmatpush3.msra.mxu0 %v8889_v60  ;;  %7366 = vmatprep.mubr.msk.f32.mxu0 %vm7858_vm8, %v9676_v31 }
0x2abb   : > { %7360 = vmatprep.subr.mxu0 %v9676_v31 }
0x2abc   : > { %7361 = vmatpush3.msra.mxu0 %v8898_v46 }
0x2abd   : > { %7362 = vmatprep.subr.mxu0 %v9676_v31 }
0x2abe   : > { %7363 = vmatpush3.msra.mxu0 %v8905_v28 }
0x2abf   : > { %7364 = vmatprep.subr.mxu0 %v9676_v31 }
0x2ac0   : > { %7365 = vmatpush3.msra.mxu0 %v8912_v52 }
0x2ac1   : > { %7369 = vmatprep.subr.mxu0 %v9676_v31 }
0x2b79   : > { %v3743_v20 = vpop.f32.mrf.mxu0 }
0x2b7a   : > { %v3747_v0 = vadd.f32 %v3743_v20, %v3591_v47  ;;  %v8962_v47 = vld [vmem:[%s9602_s6] sm:$0xf] }
0x2b7b   : > { %v7327_v12 = vpop.f32.mrf.mxu0  ;;  %v3852_v16 = vrot.slane %v8962_v47, 2 }
0x2b7c   : > { %v3748_v50 = vadd.f32 %v3747_v0, %v8586_v55 }
0x2b7e   : > { %v3749_v58 = vsel %vm1538_vm13, %v3748_v50, 0.0 }
0x2b7f   : > { %3750 = vadd.xlane.f32.xlu0 %v3749_v58 }
0x2c08   : > { %v3751_v49 = vpop.xlane.xlu0 %3750 }
0x2c09   : > { %v3752_v1 = vmul.f32 0.03125, %v3751_v49  ;;  %v8976_v49 = vld [vmem:[%s9659_s17 + $0xb] sm:$0x1] }
0x2c0b   : > { %v3753_v59 = vsub.f32 %v3748_v50, %v3752_v1  ;;  %v8970_v50 = vld [vmem:[%s9659_s17 + $0xa] sm:$0x1] }
0x2c0d   : > { %v3754_v2 = vmul.f32 %v3753_v59, %v3753_v59 }
0x2c0f   : > { %v3755_v3 = vsel %vm1538_vm13, %v3754_v2, 0.0  ;;  %v8988_v2 = vld [vmem:[%s9659_s17 + $0xc] sm:$0x1] }
0x2c10   : > { %3756 = vadd.xlane.f32.xlu0 %v3755_v3 }
0x2c99   : > { %v3757_v17 = vpop.xlane.xlu0 %3756 }
0x2c9a   : > { %v3758_v51 = vmul.f32 0.03125, %v3757_v17 }
0x2c9c   : > { %v3759_v8 = vadd.f32 1e-05, %v3758_v51 }
0x2c9e   : > { %7711 = vrsqrt.f32 %v3759_v8 }
0x2cab   : > { %v7712_v57 = vpop.eup %7711 }
0x2cac   : > { %v3761_v5 = vmul.f32 %v7712_v57, %v3753_v59 }
0x2cae   : > { %v3762_v61 = vmul.f32 %v3761_v5, %v8622_v13  ;;  %v9677_v13 = vld [vmem:[#allocation10_spill] sm:$0xff] }
0x2cb0   : > { %v3763_v55 = vadd.f32 %v3762_v61, %v8627_v18  ;;  %v9678_v18 = vld [vmem:[#allocation13_spill] sm:$0xff] }
0x2cb2   : > { %7337 = vmatmul.mubr.msk.f32.vlgmr.msra.gmra.mxu1 %vm714_vm7, %v3763_v55  ;;  %v9007_v55 = vld [vmem:[%s9662_s26 + $0x18] sm:$0xff] }
0x2cb3   : > { %7340 = vmatpush3.msra.mxu1 %v8644_v62  ;;  %7355 = vmatprep.mubr.msk.f32.mxu1 %vm7858_vm8, %v9676_v31  ;;  %v9679_v62 = vld [vmem:[#allocation14_spill] sm:$0xff] }
0x2cb4   : > { %7341 = vmatprep.subr.mxu1 %v9676_v31 }
0x2cb5   : > { %7342 = vmatpush3.msra.mxu1 %v8649_v63  ;;  %v9680_v63 = vld [vmem:[#allocation15_spill] sm:$0xff] }
0x2cb6   : > { %7343 = vmatprep.subr.mxu1 %v9676_v31 }
0x2cb7   : > { %7344 = vmatpush3.msra.mxu1 %v8656_v4 }
0x2cb8   : > { %7345 = vmatprep.subr.mxu1 %v9676_v31 }
0x2cb9   : > { %7346 = vmatpush3.msra.mxu1 %v8663_v10  ;;  %v9681_v10 = vld [vmem:[#allocation9_spill] sm:$0xff] }
0x2cba   : > { %7347 = vmatprep.subr.mxu1 %v9676_v31 }
0x2cbb   : > { %7348 = vmatpush3.msra.mxu1 %v9677_v13  ;;  %v9016_v13 = vld [vmem:[%s9662_s26 + $0x10] sm:$0xff] }
0x2cbc   : > { %7349 = vmatprep.subr.mxu1 %v9676_v31 }
0x2cbd   : > { %7350 = vmatpush3.msra.mxu1 %v9678_v18  ;;  %v9023_v18 = vld [vmem:[%s9662_s26 + $0x8] sm:$0xff] }
0x2cbe   : > { %7351 = vmatprep.subr.mxu1 %v9676_v31 }
0x2cbf   : > { %7352 = vmatpush3.msra.mxu1 %v9679_v62  ;;  %v9030_v62 = vld [vmem:[%s9662_s26] sm:$0xff] }
0x2cc0   : > { %7353 = vmatprep.subr.mxu1 %v9676_v31 }
0x2cc1   : > { %7354 = vmatpush3.msra.mxu1 %v9680_v63 }
0x2cc2   : > { %7374 = vmatprep.subr.mxu1 %v9676_v31 }
0x2d72   : > { %v3833_v4 = vpop.f32.mrf.mxu1 }
0x2d73   : > { %v3834_v34 = vadd.f32 %v3833_v4, %v9681_v10 }
0x2d74   : > { %v7338_v36 = vpop.f32.mrf.mxu1 }
0x2d75   : > { %v3837_v38 = vsel %vm2481_vm0, %v3834_v34, -inf }
0x2d76   : > { %3838 = vmax.xlane.f32.xlu0 %v3837_v38 }
0x2dff   : > { %v3839_v7 = vpop.xlane.xlu0 %3838 }
0x2e00   : > { %vm3840_vm1 = vcmp.ge.f32.partialorder %v3834_v34, %v3839_v7 }
0x2e01   : > { %v3841_v24 = vsel %vm3840_vm1, %v9682_v9, 64.0 }
0x2e02   : > { %v3842_v29 = vsel %vm2481_vm0, %v3841_v24, inf }
0x2e03   : > { %3843 = vmin.xlane.f32.xlu0 %v3842_v29 }
0x2e8c   : > { %v3844_v37 = vpop.xlane.xlu0 %3843 }
0x2e8d   : > { %v7629_v40 = vtrunc.f32 %v3844_v37 }
0x2e8f   : > { %v7630_v42 = vcvt.f32.s32 %v7629_v40 }
0x2e91   : > { %v3846_v45 = vsel %vm2491_vm5, 1, %v7630_v42 }
0x2e92   : > { %vm3849_vm6 = vcmp.eq.s32.totalorder %v9684_v30, %v3846_v45  ;;  %v8949_v25 = vsel %vm2758_vm10, %v6560_v39, %v3846_v45  ;;  %vm3847_vm3 = vcmp.eq.s32.totalorder %v3846_v45, 2  ;;  %vm4114_vm10 = vcmask 23552  }
0x2e93   : > { %v6683_v15 = vsel %vm3849_vm6, 1.0, %v9676_v31  ;;  %vm8952_vm1 = vmor %vm2491_vm5, %vm3847_vm3  ;;  %vm4101_vm3 = vcmask 16384  }
0x2e94   : > { %7356 = vmatmul.mubr.msk.f32.vlgmr.msra.gmra.mxu1 %vm1350_vm12, %v6683_v15 }
0x2e95   : > { %7376 = vmatprep.mubr.msk.f32.mxu1 %vm7858_vm8, %v9676_v31 }
0x2f54   : > { %v3923_v19 = vpop.f32.mrf.mxu1 }
0x2f55   : > { %v3924_v53 = vadd.f32 %v3923_v19, %v3852_v16 }
0x2f56   : > { %v7357_v6 = vpop.f32.mrf.mxu1 }
0x2f57   : > { %v3927_v32 = vsel %vm1538_vm13, %v3924_v53, 0.0 }
0x2f58   : > { %3928 = vadd.xlane.f32.xlu0 %v3927_v32 }
0x2fe1   : > { %v3929_v48 = vpop.xlane.xlu0 %3928 }
0x2fe2   : > { %v3930_v26 = vmul.f32 0.03125, %v3929_v48 }
0x2fe4   : > { %v3931_v33 = vsub.f32 %v3924_v53, %v3930_v26 }
0x2fe6   : > { %v3932_v22 = vmul.f32 %v3931_v33, %v3931_v33 }
0x2fe8   : > { %v3933_v27 = vsel %vm1538_vm13, %v3932_v22, 0.0 }
0x2fe9   : > { %3934 = vadd.xlane.f32.xlu0 %v3933_v27 }
0x3072   : > { %v3935_v35 = vpop.xlane.xlu0 %3934 }
0x3073   : > { %v3936_v56 = vmul.f32 0.03125, %v3935_v35 }
0x3075   : > { %v3937_v20 = vadd.f32 1e-05, %v3936_v56  ;;  %v9053_v56 = vld [vmem:[%s9663_s12 + $0x18] sm:$0xff] }
0x3077   : > { %7713 = vrsqrt.f32 %v3937_v20  ;;  %v9062_v20 = vld [vmem:[%s9663_s12 + $0x10] sm:$0xff] }
0x3084   : > { %v7714_v0 = vpop.eup %7713 }
0x3085   : > { %v3939_v12 = vmul.f32 %v7714_v0, %v3931_v33  ;;  %v9069_v0 = vld [vmem:[%s9663_s12 + $0x8] sm:$0xff] }
0x3087   : > { %v3940_v58 = vmul.f32 %v8970_v50, %v3939_v12  ;;  %v9076_v12 = vld [vmem:[%s9663_s12] sm:$0xff] }
0x3089   : > { %v8979_v1 = vadd.f32 %v8976_v49, %v3940_v58 }
0x308b   : > { %7367 = vmatmul.mubr.msk.f32.vlgmr.msra.gmra.mxu0 %vm714_vm7, %v8979_v1 }
0x308c   : > { %7371 = vmatprep.mubr.msk.f32.mxu0 %vm7858_vm8, %v9676_v31 }
0x314b   : > { %v4011_v59 = vpop.f32.mrf.mxu0 }
0x314c   : > { %v4012_v3 = vadd.f32 %v8988_v2, %v4011_v59 }
0x314d   : > { %v7368_v17 = vpop.f32.mrf.mxu0 }
0x314e   : > { %4191 = vrot.lane.b32.xlu0 %v4012_v3, %s7861_s23  ;;  %4016 = vrot.lane.b32.xlu1 %v4012_v3, %s7860_s28 }
0x3152   : > { %4200 = vrot.lane.b32.xlu1 %v4012_v3, %s7862_s25 }
0x31c0   : > { %v4192_v51 = vpop.permute.xlu0 %4191  ;;  %v4017_v8 = vpop.permute.xlu1 %4016 }
0x31c1   : > { %4194 = vst.msk [vmem:[#allocation2 + $0xa] sm:$0x1] %vm1631_vm14, %v4192_v51  ;;  %4019 = vst.msk [vmem:[#allocation2 + $0x2] sm:$0x1] %vm1631_vm14, %v4017_v8 }
0x31c4   : > { %v4201_v61 = vpop.permute.xlu1 %4200 }
0x31c8   : > { %v4024_v57 = vld [vmem:[#allocation2] sm:$0x7]  ;;  %v4199_v5 = vld [vmem:[#allocation2 + $0x8] sm:$0x7] }
0x31c9   : > { %7370 = vmatpush3.xpose.msk.msra.mxu0 %vm819_vm9, %v4024_v57 }
0x31ca   : > { %7379 = vmatprep.subr.mxu0 %v9676_v31 }
0x31cc   : > { %7372 = vmatmul.mubr.msk.f32.vlgmr.msra.gmra.mxu0 %vm819_vm9, %v4012_v3 }
0x31cd   : > { %7380 = vmatpush3.xpose.msk.msra.mxu0 %vm819_vm9, %v4199_v5  ;;  %7381 = vmatprep.mubr.msk.f32.mxu0 %vm7858_vm8, %v9676_v31 }
0x31ce   : > { %7389 = vmatprep.subr.mxu0 %v9676_v31 }
0x31d0   : > { %7382 = vmatmul.mubr.msk.f32.vlgmr.msra.gmra.mxu0 %vm819_vm9, %v4201_v61 }
0x31d1   : > { %7390 = vmatpush3.msra.mxu0 %v9007_v55  ;;  %7397 = vmatprep.mubr.msk.f32.mxu0 %vm7858_vm8, %v9676_v31 }
0x31d2   : > { %7391 = vmatprep.subr.mxu0 %v9676_v31 }
0x31d3   : > { %7392 = vmatpush3.msra.mxu0 %v9016_v13 }
0x31d4   : > { %7393 = vmatprep.subr.mxu0 %v9676_v31 }
0x31d5   : > { %7394 = vmatpush3.msra.mxu0 %v9023_v18 }
0x31d6   : > { %7395 = vmatprep.subr.mxu0 %v9676_v31 }
0x31d7   : > { %7396 = vmatpush3.msra.mxu0 %v9030_v62 }
0x31d8   : > { %7411 = vmatprep.subr.mxu0 %v9676_v31 }
0x328c   : > { %v4096_v63 = vpop.f32.mrf.mxu0 }
0x328d   : > { %v4100_v4 = vmul.f32 0.25, %v4096_v63  ;;  %v9092_v63 = vld [vmem:[%s9659_s17 + $0xd] sm:$0x1] }
0x328e   : > { %v7373_v10 = vpop.f32.mrf.mxu0 }
0x328f   : > { %v4102_v34 = vsel %vm4101_vm3, %v4100_v4, -inf }
0x3290   : > { %4103 = vmax.xlane.f32.xlu1 %v4102_v34  ;;  %v4273_v36 = vpop.f32.mrf.mxu0 }
0x3291   : > { %v4277_v38 = vmul.f32 0.25, %v4273_v36 }
0x3292   : > { %v7383_v7 = vpop.f32.mrf.mxu0 }
0x3293   : > { %v4278_v24 = vsel %vm4101_vm3, %v4277_v38, -inf }
0x3294   : > { %4279 = vmax.xlane.f32.xlu0 %v4278_v24 }
0x3319   : > { %v4104_v29 = vpop.xlane.xlu1 %4103 }
0x331a   : > { %v4105_v37 = vsub.f32 %v4100_v4, %v4104_v29 }
0x331c   : > { %v4106_v40 = vmul.f32 1.442695, %v4105_v37 }
0x331d   : > { %v4280_v41 = vpop.xlane.xlu0 %4279 }
0x331e   : > { %7715 = vpow2.f32 %v4106_v40  ;;  %v4281_v42 = vsub.f32 %v4277_v38, %v4280_v41 }
0x3320   : > { %v4282_v43 = vmul.f32 1.442695, %v4281_v42  ;;  %v9100_v42 = vld [vmem:[%s9659_s17 + $0xe] sm:$0x1] }
0x3322   : > { %7717 = vpow2.f32 %v4282_v43 }
0x332b   : > { %v7716_v39 = vpop.eup %7715 }
0x332c   : > { %v4108_v45 = vsel %vm4101_vm3, %v7716_v39, 0.0 }
0x332d   : > { %4109 = vadd.xlane.f32.xlu0 %v4108_v45 }
0x332f   : > { %v7718_v15 = vpop.eup %7717 }
0x3330   : > { %v4284_v16 = vsel %vm4101_vm3, %v7718_v15, 0.0  ;;  %vm9693_vm3 = vcmask 1043456  }
0x3331   : > { %4285 = vadd.xlane.f32.xlu1 %v4284_v16  ;;  %v9120_v16 = vld [vmem:[%s9659_s17 + $0x10] sm:$0x1] }
0x3342   : > { %4195 = vrot.lane.b32.xlu1 %v4012_v3, %s7863_s27 }
0x3343   : > { %4020 = vrot.lane.b32.xlu0 %v4012_v3, %s7859_s4 }
0x33b6   : > { %v4110_v19 = vpop.xlane.xlu0 %4109 }
0x33b7   : > { %7719 = vrcp.f32 %v4110_v19 }
0x33ba   : > { %v4286_v53 = vpop.xlane.xlu1 %4285  ;;  %v4021_v6 = vpop.permute.xlu0 %4020 }
0x33bb   : > { %7721 = vrcp.f32 %v4286_v53  ;;  %4023 = vst.msk [vmem:[#allocation3 + $0x2] sm:$0x1] %vm1631_vm14, %v4021_v6 }
0x33be   : > { %v4196_v32 = vpop.permute.xlu1 %4195 }
0x33bf   : > { %4198 = vst.msk [vmem:[#allocation3 + $0xa] sm:$0x1] %vm1631_vm14, %v4196_v32  ;;  %v9134_v32 = vld [vmem:[%s9664_s3 + $0x18] sm:$0xff] }
0x33c2   : > { %v4113_v48 = vld [vmem:[#allocation3] sm:$0x7] }
0x33c3   : > { %7375 = vmatpush3.msk.msra.mxu1 %vm703_vm2, %v4113_v48  ;;  %v9143_v48 = vld [vmem:[%s9664_s3 + $0x10] sm:$0xff] }
0x33c4   : > { %v7720_v26 = vpop.eup %7719  ;;  %7384 = vmatprep.subr.mxu1 %v9676_v31 }
0x33c5   : > { %v4112_v33 = vmul.f32 %v7720_v26, %v7716_v39  ;;  %v9106_v39 = vld [vmem:[%s9659_s17 + $0xf] sm:$0x1] }
0x33c6   : > { %v4289_v22 = vld [vmem:[#allocation3 + $0x8] sm:$0x7]  ;;  %v9150_v26 = vld [vmem:[%s9664_s3 + $0x8] sm:$0xff] }
0x33c7   : > { %7377 = vmatmul.mubr.msk.f32.vlgmr.msra.gmra.mxu1 %vm4114_vm10, %v4112_v33  ;;  %v9157_v33 = vld [vmem:[%s9664_s3] sm:$0xff] }
0x33c8   : > { %v7722_v27 = vpop.eup %7721  ;;  %7385 = vmatpush3.msk.msra.mxu1 %vm703_vm2, %v4289_v22  ;;  %7386 = vmatprep.mubr.msk.f32.mxu1 %vm7858_vm8, %v9676_v31 }
0x33c9   : > { %v4288_v35 = vmul.f32 %v7722_v27, %v7718_v15  ;;  %7400 = vmatprep.subr.mxu1 %v9676_v31 }
0x33cb   : > { %7387 = vmatmul.mubr.msk.f32.vlgmr.msra.gmra.mxu1 %vm4114_vm10, %v4288_v35 }
0x33cc   : > { %7401 = vmatpush3.msra.mxu1 %v9053_v56  ;;  %7408 = vmatprep.mubr.msk.f32.mxu1 %vm7858_vm8, %v9676_v31 }
0x33cd   : > { %7402 = vmatprep.subr.mxu1 %v9676_v31 }
0x33ce   : > { %7403 = vmatpush3.msra.mxu1 %v9062_v20 }
0x33cf   : > { %7404 = vmatprep.subr.mxu1 %v9676_v31 }
0x33d0   : > { %7405 = vmatpush3.msra.mxu1 %v9069_v0 }
0x33d1   : > { %7406 = vmatprep.subr.mxu1 %v9676_v31 }
0x33d2   : > { %7407 = vmatpush3.msra.mxu1 %v9076_v12 }
0x33d3   : > { %7416 = vmatprep.subr.mxu1 %v9676_v31 }
0x3487   : > { %v4187_v58 = vpop.f32.mrf.mxu1 }
0x3489   : > { %v7378_v59 = vpop.f32.mrf.mxu1 }
0x348b   : > { %v4362_v3 = vpop.f32.mrf.mxu1 }
0x348c   : > { %4367 = vrot.lane.b32.xlu1 %v4362_v3, %s7864_s1 }
0x348d   : > { %v7388_v17 = vpop.f32.mrf.mxu1 }
0x34fe   : > { %v4368_v51 = vpop.permute.xlu1 %4367 }
0x34ff   : > { %v4370_v8 = vsel %vm819_vm9, %v4187_v58, %v4368_v51 }
0x3500   : > { %7398 = vmatmul.mubr.msk.f32.vlgmr.msra.gmra.mxu0 %vm714_vm7, %v4370_v8 }
0x3501   : > { %7412 = vmatpush3.xpose.msk.msra.mxu0 %vm819_vm9, %v8318_v11  ;;  %7413 = vmatprep.mubr.msk.f32.mxu0 %vm7858_vm8, %v9676_v31 }
0x3502   : > { %7421 = vmatprep.subr.mxu0 %v9676_v31 }
0x35c0   : > { %v4440_v57 = vpop.f32.mrf.mxu0 }
0x35c1   : > { %v4444_v5 = vadd.f32 %v4440_v57, %v8979_v1 }
0x35c2   : > { %v7399_v61 = vpop.f32.mrf.mxu0 }
0x35c3   : > { %v4445_v4 = vadd.f32 %v9092_v63, %v4444_v5 }
0x35c5   : > { %v4446_v10 = vsel %vm1538_vm13, %v4445_v4, 0.0 }
0x35c6   : > { %4447 = vadd.xlane.f32.xlu1 %v4446_v10 }
0x364f   : > { %v4448_v34 = vpop.xlane.xlu1 %4447 }
0x3650   : > { %v4449_v36 = vmul.f32 0.03125, %v4448_v34 }
0x3652   : > { %v4450_v38 = vsub.f32 %v4445_v4, %v4449_v36 }
0x3654   : > { %v4451_v7 = vmul.f32 %v4450_v38, %v4450_v38 }
0x3656   : > { %v4452_v24 = vsel %vm1538_vm13, %v4451_v7, 0.0 }
0x3657   : > { %4453 = vadd.xlane.f32.xlu0 %v4452_v24 }
0x36e0   : > { %v4454_v29 = vpop.xlane.xlu0 %4453 }
0x36e1   : > { %v4455_v1 = vmul.f32 0.03125, %v4454_v29 }
0x36e3   : > { %v4456_v37 = vadd.f32 1e-05, %v4455_v1 }
0x36e5   : > { %7723 = vrsqrt.f32 %v4456_v37 }
0x36f2   : > { %v7724_v40 = vpop.eup %7723 }
0x36f3   : > { %v4458_v41 = vmul.f32 %v7724_v40, %v4450_v38 }
0x36f5   : > { %v4459_v43 = vmul.f32 %v9100_v42, %v4458_v41 }
0x36f7   : > { %v9109_v45 = vadd.f32 %v9106_v39, %v4459_v43 }
0x36f9   : > { %7409 = vmatmul.mubr.msk.f32.vlgmr.msra.gmra.mxu1 %vm714_vm7, %v9109_v45 }
0x36fa   : > { %7417 = vmatpush3.msra.mxu1 %v8411_v21  ;;  %7418 = vmatprep.mubr.msk.f32.mxu1 %vm7858_vm8, %v9676_v31 }
0x36fb   : > { %7426 = vmatprep.subr.mxu1 %v9676_v31 }
0x37b9   : > { %v4530_v15 = vpop.f32.mrf.mxu1 }
0x37ba   : > { %v4531_v19 = vadd.f32 %v9120_v16, %v4530_v15 }
0x37bb   : > { %v7410_v53 = vpop.f32.mrf.mxu1 }
0x37bc   : > { %4693 = vrot.lane.b32.xlu0 %v4531_v19, %s7862_s25  ;;  %7414 = vmatmul.mubr.msk.f32.vlgmr.msra.gmra.mxu0 %vm819_vm9, %v4531_v19  ;;  %v9176_v19 = vld [vmem:[%s9665_s29 + $0x18] sm:$0xff]  ;;  %v9185_v53 = vld [vmem:[%s9665_s29 + $0x10] sm:$0xff] }
0x37bd   : > { %7422 = vmatpush3.xpose.msk.msra.mxu0 %vm819_vm9, %v8389_v44  ;;  %7423 = vmatprep.mubr.msk.f32.mxu0 %vm7858_vm8, %v9676_v31 }
0x37be   : > { %7431 = vmatprep.subr.mxu0 %v9676_v31 }
0x382e   : > { %v4694_v6 = vpop.permute.xlu0 %4693 }
0x382f   : > { %7424 = vmatmul.mubr.msk.f32.vlgmr.msra.gmra.mxu0 %vm819_vm9, %v4694_v6  ;;  %v9192_v6 = vld [vmem:[%s9665_s29 + $0x8] sm:$0xff] }
0x3830   : > { %7432 = vmatpush3.msra.mxu0 %v9134_v32  ;;  %7439 = vmatprep.mubr.msk.f32.mxu0 %vm7858_vm8, %v9676_v31 }
0x3831   : > { %7433 = vmatprep.subr.mxu0 %v9676_v31 }
0x3832   : > { %7434 = vmatpush3.msra.mxu0 %v9143_v48 }
0x3833   : > { %7435 = vmatprep.subr.mxu0 %v9676_v31 }
0x3834   : > { %7436 = vmatpush3.msra.mxu0 %v9150_v26 }
0x3835   : > { %7437 = vmatprep.subr.mxu0 %v9676_v31 }
0x3836   : > { %7438 = vmatpush3.msra.mxu0 %v9157_v33 }
0x3837   : > { %7453 = vmatprep.subr.mxu0 %v9676_v31 }
0x387c   : > { %v4603_v22 = vpop.f32.mrf.mxu0 }
0x387d   : > { %v4607_v27 = vmul.f32 0.25, %v4603_v22  ;;  %v9199_v22 = vld [vmem:[%s9665_s29] sm:$0xff] }
0x387e   : > { %v7415_v35 = vpop.f32.mrf.mxu0 }
0x387f   : > { %v4608_v58 = vadd.f32 %v4607_v27, %v8074_v54 }
0x3881   : > { %v4609_v59 = vsel %vm1886_vm15, %v4608_v58, -inf }
0x3882   : > { %4610 = vmax.xlane.f32.xlu1 %v4609_v59 }
0x38ef   : > { %v4763_v3 = vpop.f32.mrf.mxu0 }
0x38f0   : > { %v4767_v17 = vmul.f32 0.25, %v4763_v3 }
0x38f1   : > { %v7425_v51 = vpop.f32.mrf.mxu0 }
0x38f2   : > { %v4768_v8 = vadd.f32 %v4767_v17, %v8074_v54  ;;  %v9209_v51 = vld [vmem:[%s9666_s24 + $0x38] sm:$0xff] }
0x38f4   : > { %v4769_v57 = vsel %vm1886_vm15, %v4768_v8, -inf }
0x38f5   : > { %4770 = vmax.xlane.f32.xlu1 %v4769_v57  ;;  %v9225_v57 = vld [vmem:[%s9666_s24 + $0x28] sm:$0xff] }
0x390b   : > { %v4611_v5 = vpop.xlane.xlu1 %4610 }
0x390c   : > { %v4612_v61 = vsub.f32 %v4608_v58, %v4611_v5  ;;  %v9232_v5 = vld [vmem:[%s9666_s24 + $0x20] sm:$0xff] }
0x390e   : > { %v4613_v4 = vmul.f32 1.442695, %v4612_v61  ;;  %v9239_v61 = vld [vmem:[%s9666_s24 + $0x18] sm:$0xff] }
0x3910   : > { %7725 = vpow2.f32 %v4613_v4  ;;  %v9246_v4 = vld [vmem:[%s9666_s24 + $0x10] sm:$0xff] }
0x391d   : > { %v7726_v10 = vpop.eup %7725 }
0x391e   : > { %v4615_v34 = vsel %vm1886_vm15, %v7726_v10, 0.0 }
0x391f   : > { %4616 = vadd.xlane.f32.xlu1 %v4615_v34  ;;  %v9260_v34 = vld [vmem:[%s9666_s24] sm:$0xff] }
0x397e   : > { %v4771_v36 = vpop.xlane.xlu1 %4770 }
0x397f   : > { %v4772_v38 = vsub.f32 %v4768_v8, %v4771_v36  ;;  %v9218_v8 = vld [vmem:[%s9666_s24 + $0x30] sm:$0xff] }
0x3981   : > { %v4773_v7 = vmul.f32 1.442695, %v4772_v38 }
0x3983   : > { %7727 = vpow2.f32 %v4773_v7 }
0x3990   : > { %v7728_v24 = vpop.eup %7727 }
0x3991   : > { %v4775_v29 = vsel %vm1886_vm15, %v7728_v24, 0.0 }
0x3992   : > { %4776 = vadd.xlane.f32.xlu1 %v4775_v29 }
0x39a8   : > { %v4617_v1 = vpop.xlane.xlu1 %4616 }
0x39a9   : > { %7729 = vrcp.f32 %v4617_v1 }
0x39b6   : > { %v7730_v37 = vpop.eup %7729 }
0x39b7   : > { %v4619_v40 = vmul.f32 %v7730_v37, %v7726_v10  ;;  %v9253_v10 = vld [vmem:[%s9666_s24 + $0x8] sm:$0xff] }
0x39b9   : > { %7419 = vmatmul.mubr.msk.f32.vlgmr.msra.gmra.mxu1 %vm902_vm11, %v4619_v40 }
0x39ba   : > { %7427 = vmatpush3.msra.mxu1 %v8414_v23  ;;  %7428 = vmatprep.mubr.msk.f32.mxu1 %vm7858_vm8, %v9676_v31 }
0x39bb   : > { %7442 = vmatprep.subr.mxu1 %v9676_v31 }
0x3a1b   : > { %v4777_v41 = vpop.xlane.xlu1 %4776 }
0x3a1c   : > { %7731 = vrcp.f32 %v4777_v41 }
0x3a29   : > { %v7732_v43 = vpop.eup %7731 }
0x3a2a   : > { %v4779_v15 = vmul.f32 %v7732_v43, %v7728_v24  ;;  %v9268_v24 = vld [vmem:[%s9659_s17 + $0x12] sm:$0x1] }
0x3a2c   : > { %7429 = vmatmul.mubr.msk.f32.vlgmr.msra.gmra.mxu1 %vm902_vm11, %v4779_v15 }
0x3a2d   : > { %7443 = vmatpush3.msra.mxu1 %v9176_v19  ;;  %7450 = vmatprep.mubr.msk.f32.mxu1 %vm7858_vm8, %v9676_v31 }
0x3a2e   : > { %7444 = vmatprep.subr.mxu1 %v9676_v31 }
0x3a2f   : > { %7445 = vmatpush3.msra.mxu1 %v9185_v53 }
0x3a30   : > { %7446 = vmatprep.subr.mxu1 %v9676_v31 }
0x3a31   : > { %7447 = vmatpush3.msra.mxu1 %v9192_v6 }
0x3a32   : > { %7448 = vmatprep.subr.mxu1 %v9676_v31 }
0x3a33   : > { %7449 = vmatpush3.msra.mxu1 %v9199_v22 }
0x3a34   : > { %7472 = vmatprep.subr.mxu1 %v9676_v31 }
0x3a79   : > { %v4689_v27 = vpop.f32.mrf.mxu1 }
0x3a7b   : > { %v7420_v35 = vpop.f32.mrf.mxu1 }
0x3aec   : > { %v4849_v58 = vpop.f32.mrf.mxu1 }
0x3aed   : > { %4854 = vrot.lane.b32.xlu1 %v4849_v58, %s7864_s1 }
0x3aee   : > { %v7430_v59 = vpop.f32.mrf.mxu1 }
0x3b5f   : > { %v4855_v3 = vpop.permute.xlu1 %4854 }
0x3b60   : > { %v4857_v17 = vsel %vm819_vm9, %v4689_v27, %v4855_v3  ;;  %v9276_v3 = vld [vmem:[%s9659_s17 + $0x13] sm:$0x1] }
0x3b61   : > { %7440 = vmatmul.mubr.msk.f32.vlgmr.msra.gmra.mxu0 %vm714_vm7, %v4857_v17 }
0x3b62   : > { %7454 = vmatpush3.msra.mxu0 %v9209_v51  ;;  %7469 = vmatprep.mubr.msk.f32.mxu0 %vm7858_vm8, %v9676_v31 }
0x3b63   : > { %7455 = vmatprep.subr.mxu0 %v9676_v31 }
0x3b64   : > { %7456 = vmatpush3.msra.mxu0 %v9218_v8 }
0x3b65   : > { %7457 = vmatprep.subr.mxu0 %v9676_v31 }
0x3b66   : > { %7458 = vmatpush3.msra.mxu0 %v9225_v57 }
0x3b67   : > { %7459 = vmatprep.subr.mxu0 %v9676_v31 }
0x3b68   : > { %7460 = vmatpush3.msra.mxu0 %v9232_v5 }
0x3b69   : > { %7461 = vmatprep.subr.mxu0 %v9676_v31 }
0x3b6a   : > { %7462 = vmatpush3.msra.mxu0 %v9239_v61 }
0x3b6b   : > { %7463 = vmatprep.subr.mxu0 %v9676_v31 }
0x3b6c   : > { %7464 = vmatpush3.msra.mxu0 %v9246_v4 }
0x3b6d   : > { %7465 = vmatprep.subr.mxu0 %v9676_v31 }
0x3b6e   : > { %7466 = vmatpush3.msra.mxu0 %v9253_v10 }
0x3b6f   : > { %7467 = vmatprep.subr.mxu0 %v9676_v31 }
0x3b70   : > { %7468 = vmatpush3.msra.mxu0 %v9260_v34 }
0x3b71   : > { %7502 = vmatprep.subr.mxu0 %v9676_v31 }
0x3c21   : > { %v4927_v36 = vpop.f32.mrf.mxu0 }
0x3c22   : > { %v4931_v38 = vadd.f32 %v4927_v36, %v9109_v45  ;;  %v9282_v36 = vld [vmem:[%s9659_s17 + $0x14] sm:$0x1] }
0x3c23   : > { %v7441_v7 = vpop.f32.mrf.mxu0 }
0x3c24   : > { %v4932_v29 = vadd.f32 %v9268_v24, %v4931_v38  ;;  %v9289_v7 = vld [vmem:[%s9667_s2 + $0x18] sm:$0xff] }
0x3c26   : > { %v4933_v1 = vsel %vm1538_vm13, %v4932_v29, 0.0 }
0x3c27   : > { %4934 = vadd.xlane.f32.xlu0 %v4933_v1  ;;  %v9305_v1 = vld [vmem:[%s9667_s2 + $0x8] sm:$0xff] }
0x3c28   : > { %9688 = vst [vmem:[#allocation13_spill] sm:$0xff] %v9305_v1 }
0x3cb0   : > { %v4935_v37 = vpop.xlane.xlu0 %4934 }
0x3cb1   : > { %v4936_v40 = vmul.f32 0.03125, %v4935_v37  ;;  %v9312_v37 = vld [vmem:[%s9667_s2] sm:$0xff] }
0x3cb2   : > { %9689 = vst [vmem:[#allocation14_spill] sm:$0xff] %v9312_v37 }
0x3cb3   : > { %v4937_v41 = vsub.f32 %v4932_v29, %v4936_v40  ;;  %v9298_v29 = vld [vmem:[%s9667_s2 + $0x10] sm:$0xff] }
0x3cb4   : > { %9687 = vst [vmem:[#allocation10_spill] sm:$0xff] %v9298_v29 }
0x3cb5   : > { %v4938_v43 = vmul.f32 %v4937_v41, %v4937_v41 }
0x3cb7   : > { %v4939_v15 = vsel %vm1538_vm13, %v4938_v43, 0.0 }
0x3cb8   : > { %4940 = vadd.xlane.f32.xlu1 %v4939_v15 }
0x3d41   : > { %v4941_v27 = vpop.xlane.xlu1 %4940 }
0x3d42   : > { %v4942_v45 = vmul.f32 0.03125, %v4941_v27 }
0x3d44   : > { %v4943_v35 = vadd.f32 1e-05, %v4942_v45 }
0x3d46   : > { %7733 = vrsqrt.f32 %v4943_v35 }
0x3d53   : > { %v7734_v58 = vpop.eup %7733 }
0x3d54   : > { %v4945_v59 = vmul.f32 %v7734_v58, %v4937_v41  ;;  %v9319_v41 = vld [vmem:[%s9659_s17 + $0x15] sm:$0x1] }
0x3d56   : > { %v4946_v17 = vmul.f32 %v9276_v3, %v4945_v59 }
0x3d58   : > { %v4947_v38 = vadd.f32 %v9282_v36, %v4946_v17 }
0x3d5a   : > { %7451 = vmatmul.mubr.msk.f32.vlgmr.msra.gmra.mxu1 %vm714_vm7, %v4947_v38 }
0x3d5b   : > { %7473 = vmatpush3.msra.mxu1 %v9289_v7  ;;  %7480 = vmatprep.mubr.msk.f32.mxu1 %vm7858_vm8, %v9676_v31 }
0x3d5c   : > { %7474 = vmatprep.subr.mxu1 %v9676_v31 }
0x3d5d   : > { %7475 = vmatpush3.msra.mxu1 %v9298_v29 }
0x3d5e   : > { %7476 = vmatprep.subr.mxu1 %v9676_v31 }
0x3d5f   : > { %7477 = vmatpush3.msra.mxu1 %v9305_v1 }
0x3d60   : > { %7478 = vmatprep.subr.mxu1 %v9676_v31 }
0x3d61   : > { %7479 = vmatpush3.msra.mxu1 %v9312_v37 }
0x3d62   : > { %7483 = vmatprep.subr.mxu1 %v9676_v31 }
0x3e1a   : > { %v5017_v40 = vpop.f32.mrf.mxu1 }
0x3e1b   : > { %v5018_v43 = vadd.f32 %v9319_v41, %v5017_v40 }
0x3e1c   : > { %v7452_v15 = vpop.f32.mrf.mxu1 }
0x3e1d   : > { %v5021_v27 = vmul.f32 %v5018_v43, %v5018_v43 }
0x3e1f   : > { %v5022_v45 = vmul.f32 %v5021_v27, %v5018_v43 }
0x3e21   : > { %v5023_v35 = vmul.f32 0.044715, %v5022_v45 }
0x3e23   : > { %v5024_v58 = vadd.f32 %v5023_v35, %v5018_v43 }
0x3e25   : > { %v5025_v59 = vmul.f32 0.7978846, %v5024_v58 }
0x3e27   : > { %7735 = vtanh.f32 %v5025_v59 }
0x3e34   : > { %v7736_v17 = vpop.eup %7735 }
0x3e35   : > { %v5027_v1 = vadd.f32 1.0, %v7736_v17  ;;  %v9344_v17 = vld [vmem:[%s9659_s17 + $0x17] sm:$0x1] }
0x3e37   : > { %v5028_v37 = vmul.f32 0.5, %v5027_v1 }
0x3e39   : > { %v5029_v29 = vmul.f32 %v5028_v37, %v5018_v43  ;;  %v9336_v37 = vld [vmem:[%s9659_s17 + $0x16] sm:$0x1] }
0x3e3b   : > { %7470 = vmatmul.mubr.msk.f32.vlgmr.msra.gmra.mxu0 %vm1350_vm12, %v5029_v29 }
0x3e3c   : > { %7503 = vmatpush3.msra.mxu0 %v8889_v60  ;;  %7510 = vmatprep.mubr.msk.f32.mxu0 %vm7858_vm8, %v9676_v31 }
0x3e3d   : > { %7504 = vmatprep.subr.mxu0 %v9676_v31 }
0x3e3e   : > { %7505 = vmatpush3.msra.mxu0 %v8898_v46 }
0x3e3f   : > { %7506 = vmatprep.subr.mxu0 %v9676_v31 }
0x3e40   : > { %7507 = vmatpush3.msra.mxu0 %v8905_v28 }
0x3e41   : > { %7508 = vmatprep.subr.mxu0 %v9676_v31 }
0x3e42   : > { %7509 = vmatpush3.msra.mxu0 %v8912_v52 }
0x3e43   : > { %7513 = vmatprep.subr.mxu0 %v9676_v31 }
0x3efb   : > { %v5099_v29 = vpop.f32.mrf.mxu0 }
0x3efc   : > { %v5103_v1 = vadd.f32 %v5099_v29, %v4947_v38 }
0x3efd   : > { %v7471_v60 = vpop.f32.mrf.mxu0 }
0x3efe   : > { %v5104_v46 = vadd.f32 %v9336_v37, %v5103_v1  ;;  %v9350_v1 = vld [vmem:[%s9659_s17 + $0x18] sm:$0x1] }
0x3f00   : > { %v5105_v40 = vsel %vm1538_vm13, %v5104_v46, 0.0 }
0x3f01   : > { %5106 = vadd.xlane.f32.xlu0 %v5105_v40  ;;  %v7813_v40 = vld [vmem:[%s9658_s19 + $0x30] sm:$0xff] }
0x3f8a   : > { %v5107_v28 = vpop.xlane.xlu0 %5106 }
0x3f8b   : > { %v5108_v43 = vmul.f32 0.03125, %v5107_v28  ;;  %v7814_v28 = vld [vmem:[%s9658_s19 + $0x28] sm:$0xff] }
0x3f8d   : > { %v5109_v15 = vsub.f32 %v5104_v46, %v5108_v43  ;;  %v7812_v46 = vld [vmem:[%s9658_s19 + $0x38] sm:$0xff]  ;;  %v7815_v43 = vld [vmem:[%s9658_s19 + $0x20] sm:$0xff] }
0x3f8f   : > { %v5110_v27 = vmul.f32 %v5109_v15, %v5109_v15 }
0x3f91   : > { %v5111_v52 = vsel %vm1538_vm13, %v5110_v27, 0.0  ;;  %v7817_v27 = vld [vmem:[%s9658_s19 + $0x10] sm:$0xff] }
0x3f92   : > { %5112 = vadd.xlane.f32.xlu0 %v5111_v52  ;;  %v7818_v52 = vld [vmem:[%s9658_s19 + $0x8] sm:$0xff] }
0x401b   : > { %v5113_v45 = vpop.xlane.xlu0 %5112 }
0x401c   : > { %v5114_v38 = vmul.f32 0.03125, %v5113_v45  ;;  %v7819_v45 = vld [vmem:[%s9658_s19] sm:$0xff] }
0x401e   : > { %v5115_v35 = vadd.f32 1e-05, %v5114_v38 }
0x4020   : > { %7737 = vrsqrt.f32 %v5115_v35  ;;  %v9391_v35 = vld [vmem:[%s9659_s17 + $0x19] sm:$0x1] }
0x402d   : > { %v7738_v58 = vpop.eup %7737 }
0x402e   : > { %v5117_v59 = vmul.f32 %v7738_v58, %v5109_v15  ;;  %v7816_v15 = vld [vmem:[%s9658_s19 + $0x18] sm:$0xff] }
0x4030   : > { %v5118_v29 = vmul.f32 %v9344_v17, %v5117_v59 }
0x4032   : > { %v5119_v60 = vadd.f32 %v9350_v1, %v5118_v29 }
0x4034   : > { %7481 = vmatmul.mubr.msk.f32.vlgmr.msra.gmra.mxu1 %vm714_vm7, %v5119_v60 }
0x4035   : > { %7484 = vmatpush3.msra.mxu1 %v7812_v46  ;;  %7499 = vmatprep.mubr.msk.f32.mxu1 %vm7858_vm8, %v9676_v31 }
0x4036   : > { %7485 = vmatprep.subr.mxu1 %v9676_v31 }
0x4037   : > { %7486 = vmatpush3.msra.mxu1 %v7813_v40 }
0x4038   : > { %7487 = vmatprep.subr.mxu1 %v9676_v31 }
0x4039   : > { %7488 = vmatpush3.msra.mxu1 %v7814_v28 }
0x403a   : > { %7489 = vmatprep.subr.mxu1 %v9676_v31 }
0x403b   : > { %7490 = vmatpush3.msra.mxu1 %v7815_v43 }
0x403c   : > { %7491 = vmatprep.subr.mxu1 %v9676_v31 }
0x403d   : > { %7492 = vmatpush3.msra.mxu1 %v7816_v15 }
0x403e   : > { %7493 = vmatprep.subr.mxu1 %v9676_v31 }
0x403f   : > { %7494 = vmatpush3.msra.mxu1 %v7817_v27 }
0x4040   : > { %7495 = vmatprep.subr.mxu1 %v9676_v31 }
0x4041   : > { %7496 = vmatpush3.msra.mxu1 %v7818_v52 }
0x4042   : > { %7497 = vmatprep.subr.mxu1 %v9676_v31 }
0x4043   : > { %7498 = vmatpush3.msra.mxu1 %v7819_v45 }
0x4044   : > { %7518 = vmatprep.subr.mxu1 %v9676_v31 }
0x40f4   : > { %v5189_v38 = vpop.f32.mrf.mxu1 }
0x40f5   : > { %v5190_v58 = vadd.f32 %v9391_v35, %v5189_v38 }
0x40f6   : > { %v7482_v59 = vpop.f32.mrf.mxu1 }
0x40f7   : > { %v5193_v29 = vsel %vm2481_vm0, %v5190_v58, -inf }
0x40f8   : > { %5194 = vmax.xlane.f32.xlu0 %v5193_v29 }
0x4181   : > { %v5195_v60 = vpop.xlane.xlu0 %5194 }
0x4182   : > { %vm5196_vm2 = vcmp.ge.f32.partialorder %v5190_v58, %v5195_v60 }
0x4183   : > { %v5197_v46 = vsel %vm5196_vm2, %v9682_v9, 64.0  ;;  %vm9694_vm2 = vmmov %vm9693_vm3 }
0x4184   : > { %v5198_v40 = vsel %vm2481_vm0, %v5197_v46, inf }
0x4185   : > { %5199 = vmin.xlane.f32.xlu0 %v5198_v40 }
0x420e   : > { %v5200_v28 = vpop.xlane.xlu0 %5199 }
0x420f   : > { %v7631_v43 = vtrunc.f32 %v5200_v28 }
0x4211   : > { %v7632_v15 = vcvt.f32.s32 %v7631_v43 }
0x4213   : > { %v5202_v27 = vsel %vm8952_vm1, 1, %v7632_v15 }
0x4214   : > { %vm5205_vm4 = vcmp.eq.s32.totalorder %v9684_v30, %v5202_v27  ;;  %v9402_v52 = vsel %vm4114_vm10, %v8949_v25, %v5202_v27  ;;  %vm5203_vm5 = vcmp.eq.s32.totalorder %v5202_v27, 2  ;;  %v5208_v30 = vrot.slane %v8962_v47, 3 }
0x4215   : > { %9690 = vst [vmem:[#allocation15_spill] sm:$0xff] %v9402_v52  ;;  %v6706_v45 = vsel %vm5205_vm4, 1.0, %v9676_v31  ;;  %vm9407_vm6 = vmor %vm8952_vm1, %vm5203_vm5  ;;  %vm5457_vm1 = vcmask 24576   ;;  %vm5470_vm10 = vcmask 31744  }
0x4216   : > { %7500 = vmatmul.mubr.msk.f32.vlgmr.msra.gmra.mxu1 %vm1350_vm12, %v6706_v45 }
0x4217   : > { %7520 = vmatprep.mubr.msk.f32.mxu1 %vm7858_vm8, %v9676_v31 }
0x42d6   : > { %v5279_v58 = vpop.f32.mrf.mxu1 }
0x42d7   : > { %v5280_v59 = vadd.f32 %v5279_v58, %v5208_v30 }
0x42d8   : > { %v7501_v25 = vpop.f32.mrf.mxu1 }
0x42d9   : > { %v5283_v29 = vsel %vm1538_vm13, %v5280_v59, 0.0 }
0x42da   : > { %5284 = vadd.xlane.f32.xlu0 %v5283_v29 }
0x4363   : > { %v5285_v60 = vpop.xlane.xlu0 %5284 }
0x4364   : > { %v5286_v46 = vmul.f32 0.03125, %v5285_v60 }
0x4366   : > { %v5287_v14 = vsub.f32 %v5280_v59, %v5286_v46 }
0x4368   : > { %v5288_v40 = vmul.f32 %v5287_v14, %v5287_v14 }
0x436a   : > { %v5289_v28 = vsel %vm1538_vm13, %v5288_v40, 0.0 }
0x436b   : > { %5290 = vadd.xlane.f32.xlu0 %v5289_v28 }
0x43f4   : > { %v5291_v43 = vpop.xlane.xlu0 %5290 }
0x43f5   : > { %v5292_v15 = vmul.f32 0.03125, %v5291_v43 }
0x43f7   : > { %v5293_v27 = vadd.f32 1e-05, %v5292_v15 }
0x43f9   : > { %7739 = vrsqrt.f32 %v5293_v27 }
0x4406   : > { %v7740_v45 = vpop.eup %7739 }
0x4407   : > { %v5295_v52 = vmul.f32 %v7740_v45, %v5287_v14 }
0x4409   : > { %v5296_v47 = vmul.f32 %v8970_v50, %v5295_v52 }
0x440b   : > { %v9419_v30 = vadd.f32 %v8976_v49, %v5296_v47 }
0x440d   : > { %7511 = vmatmul.mubr.msk.f32.vlgmr.msra.gmra.mxu0 %vm714_vm7, %v9419_v30 }
0x440e   : > { %7515 = vmatprep.mubr.msk.f32.mxu0 %vm7858_vm8, %v9676_v31 }
0x44cd   : > { %v5367_v58 = vpop.f32.mrf.mxu0 }
0x44ce   : > { %v5368_v59 = vadd.f32 %v8988_v2, %v5367_v58 }
0x44cf   : > { %v7512_v25 = vpop.f32.mrf.mxu0 }
0x44d0   : > { %5547 = vrot.lane.b32.xlu0 %v5368_v59, %s7861_s23  ;;  %5372 = vrot.lane.b32.xlu1 %v5368_v59, %s7860_s28  ;;  %s9698_s23 = sld [smem:[#allocation28_spill]] }
0x44d4   : > { %5556 = vrot.lane.b32.xlu1 %v5368_v59, %s7862_s25 }
0x4542   : > { %v5548_v50 = vpop.permute.xlu0 %5547  ;;  %v5373_v52 = vpop.permute.xlu1 %5372 }
0x4543   : > { %5550 = vst.msk [vmem:[#allocation2 + $0xb] sm:$0x1] %vm1631_vm14, %v5548_v50  ;;  %5375 = vst.msk [vmem:[#allocation2 + $0x3] sm:$0x1] %vm1631_vm14, %v5373_v52 }
0x4546   : > { %v5557_v29 = vpop.permute.xlu1 %5556 }
0x454a   : > { %v5380_v49 = vld [vmem:[#allocation2] sm:$0xf]  ;;  %v5555_v2 = vld [vmem:[#allocation2 + $0x8] sm:$0xf] }
0x454b   : > { %7514 = vmatpush3.xpose.msk.msra.mxu0 %vm819_vm9, %v5380_v49 }
0x454c   : > { %7523 = vmatprep.subr.mxu0 %v9676_v31 }
0x454e   : > { %7516 = vmatmul.mubr.msk.f32.vlgmr.msra.gmra.mxu0 %vm819_vm9, %v5368_v59 }
0x454f   : > { %7524 = vmatpush3.xpose.msk.msra.mxu0 %vm819_vm9, %v5555_v2  ;;  %7525 = vmatprep.mubr.msk.f32.mxu0 %vm7858_vm8, %v9676_v31 }
0x4550   : > { %7533 = vmatprep.subr.mxu0 %v9676_v31 }
0x4552   : > { %7526 = vmatmul.mubr.msk.f32.vlgmr.msra.gmra.mxu0 %vm819_vm9, %v5557_v29 }
0x4553   : > { %7534 = vmatpush3.msra.mxu0 %v9007_v55  ;;  %7541 = vmatprep.mubr.msk.f32.mxu0 %vm7858_vm8, %v9676_v31 }
0x4554   : > { %7535 = vmatprep.subr.mxu0 %v9676_v31 }
0x4555   : > { %7536 = vmatpush3.msra.mxu0 %v9016_v13 }
0x4556   : > { %7537 = vmatprep.subr.mxu0 %v9676_v31 }
0x4557   : > { %7538 = vmatpush3.msra.mxu0 %v9023_v18 }
0x4558   : > { %7539 = vmatprep.subr.mxu0 %v9676_v31 }
0x4559   : > { %7540 = vmatpush3.msra.mxu0 %v9030_v62 }
0x455a   : > { %7555 = vmatprep.subr.mxu0 %v9676_v31 }
0x460e   : > { %v5452_v60 = vpop.f32.mrf.mxu0 }
0x460f   : > { %v5456_v55 = vmul.f32 0.25, %v5452_v60 }
0x4610   : > { %v7517_v46 = vpop.f32.mrf.mxu0 }
0x4611   : > { %v5458_v14 = vsel %vm5457_vm1, %v5456_v55, -inf }
0x4612   : > { %5459 = vmax.xlane.f32.xlu1 %v5458_v14  ;;  %v5629_v40 = vpop.f32.mrf.mxu0 }
0x4613   : > { %v5633_v28 = vmul.f32 0.25, %v5629_v40 }
0x4614   : > { %v7527_v13 = vpop.f32.mrf.mxu0 }
0x4615   : > { %v5634_v43 = vsel %vm5457_vm1, %v5633_v28, -inf }
0x4616   : > { %5635 = vmax.xlane.f32.xlu0 %v5634_v43 }
0x469b   : > { %v5460_v18 = vpop.xlane.xlu1 %5459 }
0x469c   : > { %v5461_v15 = vsub.f32 %v5456_v55, %v5460_v18 }
0x469e   : > { %v5462_v27 = vmul.f32 1.442695, %v5461_v15 }
0x469f   : > { %v5636_v45 = vpop.xlane.xlu0 %5635 }
0x46a0   : > { %7741 = vpow2.f32 %v5462_v27  ;;  %v5637_v62 = vsub.f32 %v5633_v28, %v5636_v45 }
0x46a2   : > { %v5638_v47 = vmul.f32 1.442695, %v5637_v62 }
0x46a4   : > { %7743 = vpow2.f32 %v5638_v47 }
0x46ad   : > { %v7742_v58 = vpop.eup %7741 }
0x46ae   : > { %v5464_v25 = vsel %vm5457_vm1, %v7742_v58, 0.0 }
0x46af   : > { %5465 = vadd.xlane.f32.xlu0 %v5464_v25 }
0x46b1   : > { %v7744_v50 = vpop.eup %7743 }
0x46b2   : > { %v5640_v52 = vsel %vm5457_vm1, %v7744_v50, 0.0 }
0x46b3   : > { %5641 = vadd.xlane.f32.xlu1 %v5640_v52 }
0x46c4   : > { %5551 = vrot.lane.b32.xlu1 %v5368_v59, %s7863_s27 }
0x46c5   : > { %5376 = vrot.lane.b32.xlu0 %v5368_v59, %s7859_s4 }
0x4738   : > { %v5466_v49 = vpop.xlane.xlu0 %5465 }
0x4739   : > { %7745 = vrcp.f32 %v5466_v49 }
0x473c   : > { %v5642_v2 = vpop.xlane.xlu1 %5641  ;;  %v5377_v29 = vpop.permute.xlu0 %5376 }
0x473d   : > { %7747 = vrcp.f32 %v5642_v2  ;;  %5379 = vst.msk [vmem:[#allocation3 + $0x3] sm:$0x1] %vm1631_vm14, %v5377_v29 }
0x4740   : > { %v5552_v60 = vpop.permute.xlu1 %5551 }
0x4741   : > { %5554 = vst.msk [vmem:[#allocation3 + $0xb] sm:$0x1] %vm1631_vm14, %v5552_v60 }
0x4744   : > { %v5469_v55 = vld [vmem:[#allocation3] sm:$0xf] }
0x4745   : > { %7519 = vmatpush3.msk.msra.mxu1 %vm9693_vm3, %v5469_v55 }
0x4746   : > { %v7746_v46 = vpop.eup %7745  ;;  %7528 = vmatprep.subr.mxu1 %v9676_v31 }
0x4747   : > { %v5468_v14 = vmul.f32 %v7746_v46, %v7742_v58 }
0x4748   : > { %v5645_v40 = vld [vmem:[#allocation3 + $0x8] sm:$0xf] }
0x4749   : > { %7521 = vmatmul.mubr.msk.f32.vlgmr.msra.gmra.mxu1 %vm5470_vm10, %v5468_v14 }
0x474a   : > { %v7748_v59 = vpop.eup %7747  ;;  %7529 = vmatpush3.msk.msra.mxu1 %vm9694_vm2, %v5645_v40  ;;  %7530 = vmatprep.mubr.msk.f32.mxu1 %vm7858_vm8, %v9676_v31 }
0x474b   : > { %v5644_v28 = vmul.f32 %v7748_v59, %v7744_v50  ;;  %7544 = vmatprep.subr.mxu1 %v9676_v31 }
0x474d   : > { %7531 = vmatmul.mubr.msk.f32.vlgmr.msra.gmra.mxu1 %vm5470_vm10, %v5644_v28 }
0x474e   : > { %7545 = vmatpush3.msra.mxu1 %v9053_v56  ;;  %7552 = vmatprep.mubr.msk.f32.mxu1 %vm7858_vm8, %v9676_v31 }
0x474f   : > { %7546 = vmatprep.subr.mxu1 %v9676_v31 }
0x4750   : > { %7547 = vmatpush3.msra.mxu1 %v9062_v20 }
0x4751   : > { %7548 = vmatprep.subr.mxu1 %v9676_v31 }
0x4752   : > { %7549 = vmatpush3.msra.mxu1 %v9069_v0 }
0x4753   : > { %7550 = vmatprep.subr.mxu1 %v9676_v31 }
0x4754   : > { %7551 = vmatpush3.msra.mxu1 %v9076_v12 }
0x4755   : > { %7560 = vmatprep.subr.mxu1 %v9676_v31 }
0x4809   : > { %v5543_v13 = vpop.f32.mrf.mxu1 }
0x480b   : > { %v7522_v43 = vpop.f32.mrf.mxu1 }
0x480d   : > { %v5718_v56 = vpop.f32.mrf.mxu1 }
0x480e   : > { %5723 = vrot.lane.b32.xlu1 %v5718_v56, %s7864_s1 }
0x480f   : > { %v7532_v18 = vpop.f32.mrf.mxu1 }
0x4880   : > { %v5724_v15 = vpop.permute.xlu1 %5723 }
0x4881   : > { %v5726_v27 = vsel %vm819_vm9, %v5543_v13, %v5724_v15 }
0x4882   : > { %7542 = vmatmul.mubr.msk.f32.vlgmr.msra.gmra.mxu0 %vm714_vm7, %v5726_v27 }
0x4883   : > { %7556 = vmatpush3.xpose.msk.msra.mxu0 %vm819_vm9, %v8318_v11  ;;  %7557 = vmatprep.mubr.msk.f32.mxu0 %vm7858_vm8, %v9676_v31 }
0x4884   : > { %7565 = vmatprep.subr.mxu0 %v9676_v31 }
0x4942   : > { %v5796_v20 = vpop.f32.mrf.mxu0 }
0x4943   : > { %v5800_v0 = vadd.f32 %v5796_v20, %v9419_v30 }
0x4944   : > { %v7543_v12 = vpop.f32.mrf.mxu0 }
0x4945   : > { %v5801_v45 = vadd.f32 %v9092_v63, %v5800_v0 }
0x4947   : > { %v5802_v62 = vsel %vm1538_vm13, %v5801_v45, 0.0 }
0x4948   : > { %5803 = vadd.xlane.f32.xlu1 %v5802_v62 }
0x49d1   : > { %v5804_v47 = vpop.xlane.xlu1 %5803 }
0x49d2   : > { %v5805_v58 = vmul.f32 0.03125, %v5804_v47 }
0x49d4   : > { %v5806_v25 = vsub.f32 %v5801_v45, %v5805_v58 }
0x49d6   : > { %v5807_v50 = vmul.f32 %v5806_v25, %v5806_v25 }
0x49d8   : > { %v5808_v11 = vsel %vm1538_vm13, %v5807_v50, 0.0 }
0x49d9   : > { %5809 = vadd.xlane.f32.xlu0 %v5808_v11 }
0x4a62   : > { %v5810_v52 = vpop.xlane.xlu0 %5809 }
0x4a63   : > { %v5811_v49 = vmul.f32 0.03125, %v5810_v52 }
0x4a65   : > { %v5812_v2 = vadd.f32 1e-05, %v5811_v49 }
0x4a67   : > { %7749 = vrsqrt.f32 %v5812_v2 }
0x4a74   : > { %v7750_v29 = vpop.eup %7749 }
0x4a75   : > { %v5814_v60 = vmul.f32 %v7750_v29, %v5806_v25 }
0x4a77   : > { %v5815_v30 = vmul.f32 %v9100_v42, %v5814_v60 }
0x4a79   : > { %v9489_v63 = vadd.f32 %v9106_v39, %v5815_v30 }
0x4a7b   : > { %7553 = vmatmul.mubr.msk.f32.vlgmr.msra.gmra.mxu1 %vm714_vm7, %v9489_v63 }
0x4a7c   : > { %7561 = vmatpush3.msra.mxu1 %v8411_v21  ;;  %7562 = vmatprep.mubr.msk.f32.mxu1 %vm7858_vm8, %v9676_v31 }
0x4a7d   : > { %7570 = vmatprep.subr.mxu1 %v9676_v31 }
0x4b3b   : > { %v5886_v55 = vpop.f32.mrf.mxu1 }
0x4b3c   : > { %v5887_v46 = vadd.f32 %v9120_v16, %v5886_v55  ;;  %v9695_v55 = vld [vmem:[#allocation10_spill] sm:$0xff] }
0x4b3d   : > { %v7554_v14 = vpop.f32.mrf.mxu1 }
0x4b3e   : > { %6049 = vrot.lane.b32.xlu0 %v5887_v46, %s7862_s25  ;;  %7558 = vmatmul.mubr.msk.f32.vlgmr.msra.gmra.mxu0 %vm819_vm9, %v5887_v46  ;;  %v9696_v46 = vld [vmem:[#allocation13_spill] sm:$0xff]  ;;  %s550_s25 = scalar_lea.vmem %s9698_s23, %s8066_s0 }
0x4b3f   : > { %7566 = vmatpush3.xpose.msk.msra.mxu0 %vm819_vm9, %v8389_v44  ;;  %7567 = vmatprep.mubr.msk.f32.mxu0 %vm7858_vm8, %v9676_v31 }
0x4b40   : > { %7575 = vmatprep.subr.mxu0 %v9676_v31 }
0x4bb0   : > { %v6050_v21 = vpop.permute.xlu0 %6049 }
0x4bb1   : > { %7568 = vmatmul.mubr.msk.f32.vlgmr.msra.gmra.mxu0 %vm819_vm9, %v6050_v21 }
0x4bb2   : > { %7576 = vmatpush3.msra.mxu0 %v9134_v32  ;;  %7583 = vmatprep.mubr.msk.f32.mxu0 %vm7858_vm8, %v9676_v31 }
0x4bb3   : > { %7577 = vmatprep.subr.mxu0 %v9676_v31 }
0x4bb4   : > { %7578 = vmatpush3.msra.mxu0 %v9143_v48 }
0x4bb5   : > { %7579 = vmatprep.subr.mxu0 %v9676_v31 }
0x4bb6   : > { %7580 = vmatpush3.msra.mxu0 %v9150_v26 }
0x4bb7   : > { %7581 = vmatprep.subr.mxu0 %v9676_v31 }
0x4bb8   : > { %7582 = vmatpush3.msra.mxu0 %v9157_v33 }
0x4bb9   : > { %7597 = vmatprep.subr.mxu0 %v9676_v31 }
0x4bfe   : > { %v5959_v44 = vpop.f32.mrf.mxu0 }
0x4bff   : > { %v5963_v42 = vmul.f32 0.25, %v5959_v44 }
0x4c00   : > { %v7559_v39 = vpop.f32.mrf.mxu0 }
0x4c01   : > { %v5964_v16 = vadd.f32 %v5963_v42, %v8074_v54 }
0x4c03   : > { %v5965_v32 = vsel %vm1886_vm15, %v5964_v16, -inf }
0x4c04   : > { %5966 = vmax.xlane.f32.xlu1 %v5965_v32 }
0x4c71   : > { %v6119_v40 = vpop.f32.mrf.mxu0 }
0x4c72   : > { %v6123_v48 = vmul.f32 0.25, %v6119_v40 }
0x4c73   : > { %v7569_v59 = vpop.f32.mrf.mxu0 }
0x4c74   : > { %v6124_v28 = vadd.f32 %v6123_v48, %v8074_v54 }
0x4c76   : > { %v6125_v26 = vsel %vm1886_vm15, %v6124_v28, -inf }
0x4c77   : > { %6126 = vmax.xlane.f32.xlu1 %v6125_v26 }
0x4c8d   : > { %v5967_v13 = vpop.xlane.xlu1 %5966 }
0x4c8e   : > { %v5968_v33 = vsub.f32 %v5964_v16, %v5967_v13 }
0x4c90   : > { %v5969_v43 = vmul.f32 1.442695, %v5968_v33 }
0x4c92   : > { %7751 = vpow2.f32 %v5969_v43 }
0x4c9f   : > { %v7752_v56 = vpop.eup %7751 }
0x4ca0   : > { %v5971_v18 = vsel %vm1886_vm15, %v7752_v56, 0.0 }
0x4ca1   : > { %5972 = vadd.xlane.f32.xlu1 %v5971_v18 }
0x4d00   : > { %v6127_v15 = vpop.xlane.xlu1 %6126 }
0x4d01   : > { %v6128_v27 = vsub.f32 %v6124_v28, %v6127_v15 }
0x4d03   : > { %v6129_v20 = vmul.f32 1.442695, %v6128_v27 }
0x4d05   : > { %7753 = vpow2.f32 %v6129_v20 }
0x4d12   : > { %v7754_v0 = vpop.eup %7753 }
0x4d13   : > { %v6131_v12 = vsel %vm1886_vm15, %v7754_v0, 0.0 }
0x4d14   : > { %6132 = vadd.xlane.f32.xlu1 %v6131_v12 }
0x4d2a   : > { %v5973_v54 = vpop.xlane.xlu1 %5972 }
0x4d2b   : > { %7755 = vrcp.f32 %v5973_v54 }
0x4d38   : > { %v7756_v45 = vpop.eup %7755 }
0x4d39   : > { %v5975_v62 = vmul.f32 %v7756_v45, %v7752_v56 }
0x4d3b   : > { %7563 = vmatmul.mubr.msk.f32.vlgmr.msra.gmra.mxu1 %vm902_vm11, %v5975_v62 }
0x4d3c   : > { %7571 = vmatpush3.msra.mxu1 %v8414_v23  ;;  %7572 = vmatprep.mubr.msk.f32.mxu1 %vm7858_vm8, %v9676_v31 }
0x4d3d   : > { %7586 = vmatprep.subr.mxu1 %v9676_v31 }
0x4d9d   : > { %v6133_v47 = vpop.xlane.xlu1 %6132 }
0x4d9e   : > { %7757 = vrcp.f32 %v6133_v47 }
0x4dab   : > { %v7758_v58 = vpop.eup %7757 }
0x4dac   : > { %v6135_v25 = vmul.f32 %v7758_v58, %v7754_v0 }
0x4dae   : > { %7573 = vmatmul.mubr.msk.f32.vlgmr.msra.gmra.mxu1 %vm902_vm11, %v6135_v25 }
0x4daf   : > { %7587 = vmatpush3.msra.mxu1 %v9176_v19  ;;  %7594 = vmatprep.mubr.msk.f32.mxu1 %vm7858_vm8, %v9676_v31 }
0x4db0   : > { %7588 = vmatprep.subr.mxu1 %v9676_v31 }
0x4db1   : > { %7589 = vmatpush3.msra.mxu1 %v9185_v53 }
0x4db2   : > { %7590 = vmatprep.subr.mxu1 %v9676_v31 }
0x4db3   : > { %7591 = vmatpush3.msra.mxu1 %v9192_v6 }
0x4db4   : > { %7592 = vmatprep.subr.mxu1 %v9676_v31 }
0x4db5   : > { %7593 = vmatpush3.msra.mxu1 %v9199_v22 }
0x4db6   : > { %7616 = vmatprep.subr.mxu1 %v9676_v31 }
0x4dfb   : > { %v6045_v23 = vpop.f32.mrf.mxu1 }
0x4dfd   : > { %v7564_v50 = vpop.f32.mrf.mxu1 }
0x4e6e   : > { %v6205_v19 = vpop.f32.mrf.mxu1 }
0x4e6f   : > { %6210 = vrot.lane.b32.xlu1 %v6205_v19, %s7864_s1 }
0x4e70   : > { %v7574_v11 = vpop.f32.mrf.mxu1 }
0x4ee1   : > { %v6211_v52 = vpop.permute.xlu1 %6210 }
0x4ee2   : > { %v6213_v49 = vsel %vm819_vm9, %v6045_v23, %v6211_v52 }
0x4ee3   : > { %7584 = vmatmul.mubr.msk.f32.vlgmr.msra.gmra.mxu0 %vm714_vm7, %v6213_v49 }
0x4ee4   : > { %7598 = vmatpush3.msra.mxu0 %v9209_v51  ;;  %7613 = vmatprep.mubr.msk.f32.mxu0 %vm7858_vm8, %v9676_v31 }
0x4ee5   : > { %7599 = vmatprep.subr.mxu0 %v9676_v31 }
0x4ee6   : > { %7600 = vmatpush3.msra.mxu0 %v9218_v8 }
0x4ee7   : > { %7601 = vmatprep.subr.mxu0 %v9676_v31 }
0x4ee8   : > { %7602 = vmatpush3.msra.mxu0 %v9225_v57 }
0x4ee9   : > { %7603 = vmatprep.subr.mxu0 %v9676_v31 }
0x4eea   : > { %7604 = vmatpush3.msra.mxu0 %v9232_v5 }
0x4eeb   : > { %7605 = vmatprep.subr.mxu0 %v9676_v31 }
0x4eec   : > { %7606 = vmatpush3.msra.mxu0 %v9239_v61 }
0x4eed   : > { %7607 = vmatprep.subr.mxu0 %v9676_v31 }
0x4eee   : > { %7608 = vmatpush3.msra.mxu0 %v9246_v4 }
0x4eef   : > { %7609 = vmatprep.subr.mxu0 %v9676_v31 }
0x4ef0   : > { %7610 = vmatpush3.msra.mxu0 %v9253_v10 }
0x4ef1   : > { %7611 = vmatprep.subr.mxu0 %v9676_v31 }
0x4ef2   : > { %7612 = vmatpush3.msra.mxu0 %v9260_v34 }
0x4fa3   : > { %v6283_v53 = vpop.f32.mrf.mxu0 }
0x4fa4   : > { %v6287_v6 = vadd.f32 %v6283_v53, %v9489_v63 }
0x4fa5   : > { %v7585_v22 = vpop.f32.mrf.mxu0 }
0x4fa6   : > { %v6288_v51 = vadd.f32 %v9268_v24, %v6287_v6 }
0x4fa8   : > { %v6289_v8 = vsel %vm1538_vm13, %v6288_v51, 0.0 }
0x4fa9   : > { %6290 = vadd.xlane.f32.xlu0 %v6289_v8 }
0x5032   : > { %v6291_v57 = vpop.xlane.xlu0 %6290 }
0x5033   : > { %v6292_v5 = vmul.f32 0.03125, %v6291_v57 }
0x5035   : > { %v6293_v61 = vsub.f32 %v6288_v51, %v6292_v5 }
0x5037   : > { %v6294_v4 = vmul.f32 %v6293_v61, %v6293_v61 }
0x5039   : > { %v6295_v2 = vsel %vm1538_vm13, %v6294_v4, 0.0 }
0x503a   : > { %6296 = vadd.xlane.f32.xlu1 %v6295_v2 }
0x50c3   : > { %v6297_v10 = vpop.xlane.xlu1 %6296 }
0x50c4   : > { %v6298_v29 = vmul.f32 0.03125, %v6297_v10 }
0x50c6   : > { %v6299_v60 = vadd.f32 1e-05, %v6298_v29 }
0x50c8   : > { %7759 = vrsqrt.f32 %v6299_v60 }
0x50d5   : > { %v7760_v34 = vpop.eup %7759 }
0x50d6   : > { %v6301_v30 = vmul.f32 %v7760_v34, %v6293_v61 }
0x50d8   : > { %v6302_v63 = vmul.f32 %v9276_v3, %v6301_v30  ;;  %v9697_v3 = vld [vmem:[#allocation14_spill] sm:$0xff] }
0x50da   : > { %v6303_v24 = vadd.f32 %v9282_v36, %v6302_v63 }
0x50dc   : > { %7595 = vmatmul.mubr.msk.f32.vlgmr.msra.gmra.mxu1 %vm714_vm7, %v6303_v24 }
0x50dd   : > { %7617 = vmatpush3.msra.mxu1 %v9289_v7  ;;  %7624 = vmatprep.mubr.msk.f32.mxu1 %vm7858_vm8, %v9676_v31 }
0x50de   : > { %7618 = vmatprep.subr.mxu1 %v9676_v31 }
0x50df   : > { %7619 = vmatpush3.msra.mxu1 %v9695_v55 }
0x50e0   : > { %7620 = vmatprep.subr.mxu1 %v9676_v31 }
0x50e1   : > { %7621 = vmatpush3.msra.mxu1 %v9696_v46 }
0x50e2   : > { %7622 = vmatprep.subr.mxu1 %v9676_v31 }
0x50e3   : > { %7623 = vmatpush3.msra.mxu1 %v9697_v3 }
0x519c   : > { %v6373_v36 = vpop.f32.mrf.mxu1 }
0x519d   : > { %v6374_v14 = vadd.f32 %v9319_v41, %v6373_v36 }
0x519e   : > { %v7596_v21 = vpop.f32.mrf.mxu1 }
0x519f   : > { %v6377_v7 = vmul.f32 %v6374_v14, %v6374_v14 }
0x51a1   : > { %v6378_v44 = vmul.f32 %v6377_v7, %v6374_v14 }
0x51a3   : > { %v6379_v42 = vmul.f32 0.044715, %v6378_v44 }
0x51a5   : > { %v6380_v39 = vadd.f32 %v6379_v42, %v6374_v14 }
0x51a7   : > { %v6381_v16 = vmul.f32 0.7978846, %v6380_v39 }
0x51a9   : > { %7761 = vtanh.f32 %v6381_v16 }
0x51b6   : > { %v7762_v32 = vpop.eup %7761 }
0x51b7   : > { %v6383_v40 = vadd.f32 1.0, %v7762_v32 }
0x51b9   : > { %v6384_v48 = vmul.f32 0.5, %v6383_v40 }
0x51bb   : > { %v6385_v59 = vmul.f32 %v6384_v48, %v6374_v14 }
0x51bd   : > { %7614 = vmatmul.mubr.msk.f32.vlgmr.msra.gmra.mxu0 %vm1350_vm12, %v6385_v59 }
0x527d   : > { %v6455_v28 = vpop.f32.mrf.mxu0 }
0x527e   : > { %v6459_v31 = vadd.f32 %v6455_v28, %v6303_v24 }
0x527f   : > { %v7615_v26 = vpop.f32.mrf.mxu0 }
0x5280   : > { %v6460_v13 = vadd.f32 %v9336_v37, %v6459_v31 }
0x5282   : > { %v6461_v41 = vsel %vm1538_vm13, %v6460_v13, 0.0 }
0x5283   : > { %6462 = vadd.xlane.f32.xlu0 %v6461_v41 }
0x530c   : > { %v6463_v33 = vpop.xlane.xlu0 %6462 }
0x530d   : > { %v6464_v43 = vmul.f32 0.03125, %v6463_v33 }
0x530f   : > { %v6465_v56 = vsub.f32 %v6460_v13, %v6464_v43 }
0x5311   : > { %v6466_v18 = vmul.f32 %v6465_v56, %v6465_v56 }
0x5313   : > { %v6467_v15 = vsel %vm1538_vm13, %v6466_v18, 0.0 }
0x5314   : > { %6468 = vadd.xlane.f32.xlu0 %v6467_v15 }
0x539d   : > { %v6469_v27 = vpop.xlane.xlu0 %6468 }
0x539e   : > { %v6470_v20 = vmul.f32 0.03125, %v6469_v27 }
0x53a0   : > { %v6471_v0 = vadd.f32 1e-05, %v6470_v20 }
0x53a2   : > { %7763 = vrsqrt.f32 %v6471_v0 }
0x53af   : > { %v7764_v12 = vpop.eup %7763 }
0x53b0   : > { %v6473_v54 = vmul.f32 %v7764_v12, %v6465_v56 }
0x53b2   : > { %v6474_v45 = vmul.f32 %v9344_v17, %v6473_v54 }
0x53b4   : > { %v6475_v37 = vadd.f32 %v9350_v1, %v6474_v45 }
0x53b6   : > { %7625 = vmatmul.mubr.msk.f32.vlgmr.msra.gmra.mxu1 %vm714_vm7, %v6475_v37  ;;  %vm6564_vm7 = vcmask 32768  }
0x5476   : > { %v6545_v62 = vpop.f32.mrf.mxu1 }
0x5477   : > { %v6546_v47 = vadd.f32 %v9391_v35, %v6545_v62  ;;  %v9699_v35 = vld [vmem:[#allocation15_spill] sm:$0xff] }
0x5478   : > { %v7626_v58 = vpop.f32.mrf.mxu1 }
0x5479   : > { %v6549_v25 = vsel %vm2481_vm0, %v6546_v47, -inf }
0x547a   : > { %6550 = vmax.xlane.f32.xlu0 %v6549_v25 }
0x5503   : > { %v6551_v23 = vpop.xlane.xlu0 %6550 }
0x5504   : > { %vm6552_vm8 = vcmp.ge.f32.partialorder %v6546_v47, %v6551_v23 }
0x5505   : > { %v6553_v50 = vsel %vm6552_vm8, %v9682_v9, 64.0 }
0x5506   : > { %v6554_v19 = vsel %vm2481_vm0, %v6553_v50, inf }
0x5507   : > { %6555 = vmin.xlane.f32.xlu0 %v6554_v19 }
0x5590   : > { %v6556_v17 = vpop.xlane.xlu0 %6555 }
0x5591   : > { %v7633_v11 = vtrunc.f32 %v6556_v17 }
0x5593   : > { %v7634_v52 = vcvt.f32.s32 %v7633_v11 }
0x5595   : > { %v6558_v1 = vsel %vm9407_vm6, 1, %v7634_v52 }
0x5596   : > { %v6563_v49 = vsel %vm5470_vm10, %v9699_v35, %v6558_v1 }
0x5597   : > { %6565 = vst.msk [vmem:[%s550_s25] sm:$0x1] %vm6564_vm7, %v6563_v49 }
0x5598 PF: > { %s9700_s27 = sld [smem:[#allocation8_spill]] }
0x559e   : > { %s39_s1 = sadd.s32 1, %s9700_s27  }
0x559f   : > { %p36_p0 = scmp.ge.s32.totalorder %s39_s1, 4  }
0x55a1   :  { %38 = sbr.rel (!%p36_p0) target bundleno = 44 (0x2c), region = 127 }

</bundles_post_ra>
